<compile_context>
chip_gen: v7x
topology: tpu7x:2x2x1
jax: 0.10.0
libtpu: 0.0.40
codegen_flags: <defaults>
</compile_context>

<pallas_src>
import functools

import jax
import jax.numpy as jnp
from jax.experimental import pallas as pl
from jax.experimental.pallas import tpu as pltpu


def _round_up(x, m):
    return (x + m - 1) // m * m


def _lstm_kernel(x_ref,                       # (S, Bp, Ep)  bf16 time-major embeddings
                 wx1_ref, wh1_ref, b1_ref,    # (Ep,4Hp) bf16, (Hp,4Hp) bf16, (1,4Hp) f32
                 wx2_ref, wh2_ref, b2_ref,    # (Hp,4Hp) bf16, (Hp,4Hp) bf16, (1,4Hp) f32
                 wfc_ref, bfc_ref,            # (Hp,Op) bf16, (1,Op) f32
                 out_ref,                     # (Bp, Op) f32
                 xproj_ref,                   # (S, Bp, 4Hp) f32 VMEM scratch
                 *, seq_len, hidden_pad):
    Hp = hidden_pad
    S, Bp, Ep = x_ref.shape

    # Hoist weight loads / bias broadcast out of the recurrence loop.
    wh1 = wh1_ref[...]
    wx2 = wx2_ref[...]
    wh2 = wh2_ref[...]
    b2 = jnp.broadcast_to(b2_ref[...], (Bp, 4 * Hp))

    # Hoisted layer-1 input projection: one (S*Bp, Ep) x (Ep, 4Hp) MXU pass
    # (bias folded in) instead of S tiny per-step matmuls on the critical path.
    x2d = x_ref[...].reshape(S * Bp, Ep)
    xproj = jnp.dot(x2d, wx1_ref[...], preferred_element_type=jnp.float32)
    xproj_ref[...] = (xproj + b1_ref[...]).reshape(S, Bp, 4 * Hp)

    def gates(g, c):
        # Gate blocks are 128-lane aligned (Hp == 128): slices are free views.
        i = jax.nn.sigmoid(g[:, 0 * Hp:1 * Hp])
        f = jax.nn.sigmoid(g[:, 1 * Hp:2 * Hp])
        gg = jnp.tanh(g[:, 2 * Hp:3 * Hp])
        o = jax.nn.sigmoid(g[:, 3 * Hp:4 * Hp])
        c_new = f * c + i * gg
        return o * jnp.tanh(c_new), c_new

    def step(t, carry):
        h1, c1, h2, c2 = carry
        # Layer 1: only the hidden projection is on the serial path.
        g1 = xproj_ref[t] + jnp.dot(h1.astype(jnp.bfloat16), wh1,
                                    preferred_element_type=jnp.float32)
        h1, c1 = gates(g1, c1)
        # TODO(synk): nn.LSTM(dropout=0.5) inter-layer dropout is a no-op in
        # eval mode and is intentionally omitted.
        # Layer 2: split dots (no concat), both accumulate in f32.
        g2 = (jnp.dot(h1.astype(jnp.bfloat16), wx2,
                      preferred_element_type=jnp.float32)
              + jnp.dot(h2.astype(jnp.bfloat16), wh2,
                        preferred_element_type=jnp.float32)
              + b2)
        h2, c2 = gates(g2, c2)
        return h1, c1, h2, c2

    z = jnp.zeros((Bp, Hp), jnp.float32)
    _, _, h2, _ = jax.lax.fori_loop(0, seq_len, step, (z, z, z, z),
                                    unroll=min(seq_len, 8))

    # fc(hidden[-1]) into a lane/sublane-dense (Bp, Op) slab (sliced outside).
    out_ref[...] = (jnp.dot(h2.astype(jnp.bfloat16), wfc_ref[...],
                            preferred_element_type=jnp.float32)
                    + bfc_ref[...])


def pack_params(params):
    """One-time packing of PyTorch-layout weights into padded kernel layouts.

    Gate order i, f, g, o; each gate block padded to Hp=round_up(H,128) lanes;
    bih+bhh folded into one bias row per layer; MXU operands cast to bf16.
    """
    emb = params["embedding"]
    V, E = emb.shape
    H = params["whh_l0"].shape[0] // 4
    O = params["w_fc"].shape[0]
    Ep = _round_up(E, 128)
    Hp = _round_up(H, 128)
    Op = _round_up(O, 128)

    def gate_matrix(w, in_dim, in_pad):
        W = jnp.zeros((in_pad, 4 * Hp), jnp.float32)
        for g in range(4):
            W = W.at[:in_dim, g * Hp:g * Hp + H].set(w[g * H:(g + 1) * H, :].T)
        return W.astype(jnp.bfloat16)

    def gate_bias(bih, bhh):
        b = jnp.zeros((1, 4 * Hp), jnp.float32)
        for g in range(4):
            b = b.at[0, g * Hp:g * Hp + H].set(
                bih[g * H:(g + 1) * H] + bhh[g * H:(g + 1) * H])
        return b

    packed = {
        "emb": jnp.zeros((V, Ep), jnp.float32).at[:, :E].set(emb)
                  .astype(jnp.bfloat16),
        "wx1": gate_matrix(params["wih_l0"], E, Ep),
        "wh1": gate_matrix(params["whh_l0"], H, Hp),
        "b1": gate_bias(params["bih_l0"], params["bhh_l0"]),
        "wx2": gate_matrix(params["wih_l1"], H, Hp),
        "wh2": gate_matrix(params["whh_l1"], H, Hp),
        "b2": gate_bias(params["bih_l1"], params["bhh_l1"]),
        "wfc": jnp.zeros((Hp, Op), jnp.float32).at[:H, :O]
                  .set(params["w_fc"].T).astype(jnp.bfloat16),
        "bfc": jnp.zeros((1, Op), jnp.float32).at[0, :O].set(params["b_fc"]),
    }
    return jax.device_put(packed)


@functools.partial(jax.jit, static_argnames=("output_dim",))
def lstm_model_forward(x_ids, packed, *, output_dim):
    """x_ids: (batch, seq) int32 token ids -> (batch, output_dim) float32."""
    B, S = x_ids.shape
    Bp = _round_up(max(B, 8), 8)
    Hp = packed["wh1"].shape[0]
    Op = packed["wfc"].shape[1]
    Ep = packed["emb"].shape[1]

    # Sublane-pad the batch (padded rows use token id 0, sliced off below):
    # full vreg occupancy for gate math and an unmasked output store.
    ids_p = jnp.zeros((Bp, S), jnp.int32).at[:B, :].set(x_ids)
    # Embedding gather emitted time-major directly (dropout = identity, eval).
    x_tm = jnp.take(packed["emb"], ids_p.T, axis=0)        # (S, Bp, Ep) bf16
    # TODO(synk): for large vocab / long S, move this gather into the kernel
    # via PrefetchScalarGridSpec scalar-prefetched ids to kill the HBM round
    # trip of the embedded slab (matters most on v5e).

    vmem = pl.BlockSpec(memory_space=pltpu.MemorySpace.VMEM)
    out_pad = pl.pallas_call(
        functools.partial(_lstm_kernel, seq_len=S, hidden_pad=Hp),
        out_shape=jax.ShapeDtypeStruct((Bp, Op), jnp.float32),
        in_specs=[vmem] * 9,
        out_specs=vmem,
        scratch_shapes=[pltpu.VMEM((S, Bp, 4 * Hp), jnp.float32)],
    )(x_tm, packed["wx1"], packed["wh1"], packed["b1"],
      packed["wx2"], packed["wh2"], packed["b2"],
      packed["wfc"], packed["bfc"])
    # TODO(synk): at production sizes, tile the time axis with a grid
    # BlockSpec((St, Bp, Ep)) + 'arbitrary' semantics (v7x 64 MiB VMEM) and
    # split Bp across the two v7x TensorCores with a 'parallel' batch axis.
    return out_pad[:B, :output_dim]


def reference_forward(x_ids, params):
    """Pure-JAX f32 reference of the PyTorch forward (eval mode)."""
    emb = params["embedding"]
    embedded = jnp.take(emb, x_ids, axis=0)                # (B, S, E)
    H = params["whh_l0"].shape[0] // 4

    def cell(x, h, c, wih, whh, bih, bhh):
        g = x @ wih.T + h @ whh.T + bih + bhh
        i = jax.nn.sigmoid(g[:, 0 * H:1 * H])
        f = jax.nn.sigmoid(g[:, 1 * H:2 * H])
        gg = jnp.tanh(g[:, 2 * H:3 * H])
        o = jax.nn.sigmoid(g[:, 3 * H:4 * H])
        c_new = f * c + i * gg
        return o * jnp.tanh(c_new), c_new

    B = x_ids.shape[0]
    h1 = c1 = h2 = c2 = jnp.zeros((B, H), jnp.float32)
    for t in range(x_ids.shape[1]):
        x_t = embedded[:, t, :]
        h1, c1 = cell(x_t, h1, c1, params["wih_l0"], params["whh_l0"],
                      params["bih_l0"], params["bhh_l0"])
        h2, c2 = cell(h1, h2, c2, params["wih_l1"], params["whh_l1"],
                      params["bih_l1"], params["bhh_l1"])
    return h2 @ params["w_fc"].T + params["b_fc"]


def init_params(key, vocab_size, embedding_dim, hidden_dim, output_dim):
    ks = jax.random.split(key, 12)
    s = 0.1
    H, E, V, O = hidden_dim, embedding_dim, vocab_size, output_dim
    return {
        "embedding": s * jax.random.normal(ks[0], (V, E), jnp.float32),
        "wih_l0": s * jax.random.normal(ks[1], (4 * H, E), jnp.float32),
        "whh_l0": s * jax.random.normal(ks[2], (4 * H, H), jnp.float32),
        "bih_l0": s * jax.random.normal(ks[3], (4 * H,), jnp.float32),
        "bhh_l0": s * jax.random.normal(ks[4], (4 * H,), jnp.float32),
        "wih_l1": s * jax.random.normal(ks[5], (4 * H, H), jnp.float32),
        "whh_l1": s * jax.random.normal(ks[6], (4 * H, H), jnp.float32),
        "bih_l1": s * jax.random.normal(ks[7], (4 * H,), jnp.float32),
        "bhh_l1": s * jax.random.normal(ks[8], (4 * H,), jnp.float32),
        "w_fc": s * jax.random.normal(ks[9], (O, H), jnp.float32),
        "b_fc": s * jax.random.normal(ks[10], (O,), jnp.float32),
    }


if __name__ == "__main__":
    vocab_size, embedding_dim, hidden_dim, output_dim = 50, 16, 32, 4
    batch, seq = 2, 8

    key = jax.random.PRNGKey(0)
    k_param, k_ids = jax.random.split(key)
    params = init_params(k_param, vocab_size, embedding_dim, hidden_dim,
                         output_dim)
    x_ids = jax.random.randint(k_ids, (batch, seq), 0, vocab_size, jnp.int32)

    packed = pack_params(params)          # one-time packing (cached, not per call)
    out = lstm_model_forward(x_ids, packed, output_dim=output_dim)
    out = jax.block_until_ready(out)

    ref = reference_forward(x_ids, params)
    assert out.shape == (batch, output_dim)
    # bf16 MXU operands -> compare against the f32 reference at bf16 tolerance.
    assert jnp.allclose(out, ref, atol=2e-2, rtol=2e-2), (out, ref)
    print("KERNEL_OK")
</pallas_src>

<mosaic_0001>
module attributes {stable_mosaic.version = 11 : i64} {
  func.func @_lstm_kernel(%arg0: memref<8x8x128xbf16, #tpu.memory_space<vmem>>, %arg1: memref<128x512xbf16, #tpu.memory_space<vmem>>, %arg2: memref<128x512xbf16, #tpu.memory_space<vmem>>, %arg3: memref<1x512xf32, #tpu.memory_space<vmem>>, %arg4: memref<128x512xbf16, #tpu.memory_space<vmem>>, %arg5: memref<128x512xbf16, #tpu.memory_space<vmem>>, %arg6: memref<1x512xf32, #tpu.memory_space<vmem>>, %arg7: memref<128x128xbf16, #tpu.memory_space<vmem>>, %arg8: memref<1x128xf32, #tpu.memory_space<vmem>>, %arg9: memref<8x128xf32, #tpu.memory_space<vmem>>, %arg10: memref<8x8x512xf32, #tpu.memory_space<vmem>>) attributes {dimension_semantics = [], scalar_prefetch = 0 : i64, scratch_operands = 1 : i64, tpu.core_type = #tpu.core_type<tc>} {
    %c0 = arith.constant 0 : index
    %c0_0 = arith.constant 0 : index
    %0 = vector.load %arg2[%c0, %c0_0] : memref<128x512xbf16, #tpu.memory_space<vmem>>, vector<128x512xbf16>
    %c0_1 = arith.constant 0 : index
    %c0_2 = arith.constant 0 : index
    %1 = vector.load %arg4[%c0_1, %c0_2] : memref<128x512xbf16, #tpu.memory_space<vmem>>, vector<128x512xbf16>
    %c0_3 = arith.constant 0 : index
    %c0_4 = arith.constant 0 : index
    %2 = vector.load %arg5[%c0_3, %c0_4] : memref<128x512xbf16, #tpu.memory_space<vmem>>, vector<128x512xbf16>
    %c0_5 = arith.constant 0 : index
    %c0_6 = arith.constant 0 : index
    %3 = vector.load %arg6[%c0_5, %c0_6] : memref<1x512xf32, #tpu.memory_space<vmem>>, vector<1x512xf32>
    %4 = vector.shape_cast %3 : vector<1x512xf32> to vector<1x512xf32>
    %5 = vector.broadcast %4 : vector<1x512xf32> to vector<8x512xf32>
    %c0_7 = arith.constant 0 : index
    %c0_8 = arith.constant 0 : index
    %c0_9 = arith.constant 0 : index
    %6 = vector.load %arg0[%c0_7, %c0_8, %c0_9] : memref<8x8x128xbf16, #tpu.memory_space<vmem>>, vector<8x8x128xbf16>
    %7 = vector.shape_cast %6 : vector<8x8x128xbf16> to vector<64x128xbf16>
    %c0_10 = arith.constant 0 : index
    %c0_11 = arith.constant 0 : index
    %8 = vector.load %arg1[%c0_10, %c0_11] : memref<128x512xbf16, #tpu.memory_space<vmem>>, vector<128x512xbf16>
    %cst = arith.constant dense<0.000000e+00> : vector<64x512xf32>
    %9 = tpu.matmul %7, %8, %cst {dimension_numbers = #tpu.dot_dimension_numbers<[1], [0], [0], [1], [0, 0, 1, 1], [], []>} : vector<64x128xbf16>, vector<128x512xbf16>, vector<64x512xf32> -> vector<64x512xf32>
    %c0_12 = arith.constant 0 : index
    %c0_13 = arith.constant 0 : index
    %10 = vector.load %arg3[%c0_12, %c0_13] : memref<1x512xf32, #tpu.memory_space<vmem>>, vector<1x512xf32>
    %11 = vector.broadcast %10 : vector<1x512xf32> to vector<64x512xf32>
    %12 = arith.addf %9, %11 : vector<64x512xf32>
    %13 = vector.shape_cast %12 : vector<64x512xf32> to vector<8x8x512xf32>
    %c0_14 = arith.constant 0 : index
    %c0_15 = arith.constant 0 : index
    %c0_16 = arith.constant 0 : index
    %14 = vector.load %arg10[%c0_14, %c0_15, %c0_16] : memref<8x8x512xf32, #tpu.memory_space<vmem>>, vector<8x8x512xf32>
    tpu.vector_store %arg10[%c0_14, %c0_15, %c0_16], %13 {strides = array<i32>} : memref<8x8x512xf32, #tpu.memory_space<vmem>>, vector<8x8x512xf32>,
    %cst_17 = arith.constant 0.000000e+00 : f32
    %15 = vector.broadcast %cst_17 : f32 to vector<8x128xf32>
    %c0_i32 = arith.constant 0 : i32
    %16 = arith.index_cast %c0_i32 : i32 to index
    %c0_18 = arith.constant 0 : index
    %c0_19 = arith.constant 0 : index
    %17 = vector.load %arg10[%16, %c0_18, %c0_19] : memref<8x8x512xf32, #tpu.memory_space<vmem>>, vector<1x8x512xf32>
    %18 = vector.shape_cast %17 : vector<1x8x512xf32> to vector<8x512xf32>
    %19 = arith.truncf %15 : vector<8x128xf32> to vector<8x128xbf16>
    %cst_20 = arith.constant dense<0.000000e+00> : vector<8x512xf32>
    %20 = tpu.matmul %19, %0, %cst_20 {dimension_numbers = #tpu.dot_dimension_numbers<[1], [0], [0], [1], [0, 0, 1, 1], [], []>} : vector<8x128xbf16>, vector<128x512xbf16>, vector<8x512xf32> -> vector<8x512xf32>
    %21 = arith.addf %18, %20 : vector<8x512xf32>
    %22 = vector.extract_strided_slice %21 {offsets = [0, 0], sizes = [8, 128], strides = [1, 1]} : vector<8x512xf32> to vector<8x128xf32>
    %23 = arith.negf %22 : vector<8x128xf32>
    %24 = math.exp %23 : vector<8x128xf32>
    %cst_21 = arith.constant 1.000000e+00 : f32
    %25 = vector.broadcast %cst_21 : f32 to vector<8x128xf32>
    %26 = arith.addf %25, %24 : vector<8x128xf32>
    %27 = arith.divf %25, %26 : vector<8x128xf32>
    %28 = vector.extract_strided_slice %21 {offsets = [0, 128], sizes = [8, 128], strides = [1, 1]} : vector<8x512xf32> to vector<8x128xf32>
    %29 = arith.negf %28 : vector<8x128xf32>
    %30 = math.exp %29 : vector<8x128xf32>
    %cst_22 = arith.constant 1.000000e+00 : f32
    %31 = vector.broadcast %cst_22 : f32 to vector<8x128xf32>
    %32 = arith.addf %31, %30 : vector<8x128xf32>
    %33 = arith.divf %31, %32 : vector<8x128xf32>
    %34 = vector.extract_strided_slice %21 {offsets = [0, 256], sizes = [8, 128], strides = [1, 1]} : vector<8x512xf32> to vector<8x128xf32>
    %35 = math.tanh %34 : vector<8x128xf32>
    %36 = vector.extract_strided_slice %21 {offsets = [0, 384], sizes = [8, 128], strides = [1, 1]} : vector<8x512xf32> to vector<8x128xf32>
    %37 = arith.negf %36 : vector<8x128xf32>
    %38 = math.exp %37 : vector<8x128xf32>
    %cst_23 = arith.constant 1.000000e+00 : f32
    %39 = vector.broadcast %cst_23 : f32 to vector<8x128xf32>
    %40 = arith.addf %39, %38 : vector<8x128xf32>
    %41 = arith.divf %39, %40 : vector<8x128xf32>
    %42 = arith.mulf %33, %15 : vector<8x128xf32>
    %43 = arith.mulf %27, %35 : vector<8x128xf32>
    %44 = arith.addf %42, %43 : vector<8x128xf32>
    %45 = math.tanh %44 : vector<8x128xf32>
    %46 = arith.mulf %41, %45 : vector<8x128xf32>
    %47 = arith.truncf %46 : vector<8x128xf32> to vector<8x128xbf16>
    %cst_24 = arith.constant dense<0.000000e+00> : vector<8x512xf32>
    %48 = tpu.matmul %47, %1, %cst_24 {dimension_numbers = #tpu.dot_dimension_numbers<[1], [0], [0], [1], [0, 0, 1, 1], [], []>} : vector<8x128xbf16>, vector<128x512xbf16>, vector<8x512xf32> -> vector<8x512xf32>
    %49 = arith.truncf %15 : vector<8x128xf32> to vector<8x128xbf16>
    %cst_25 = arith.constant dense<0.000000e+00> : vector<8x512xf32>
    %50 = tpu.matmul %49, %2, %cst_25 {dimension_numbers = #tpu.dot_dimension_numbers<[1], [0], [0], [1], [0, 0, 1, 1], [], []>} : vector<8x128xbf16>, vector<128x512xbf16>, vector<8x512xf32> -> vector<8x512xf32>
    %51 = arith.addf %48, %50 : vector<8x512xf32>
    %52 = arith.addf %51, %5 : vector<8x512xf32>
    %53 = vector.extract_strided_slice %52 {offsets = [0, 0], sizes = [8, 128], strides = [1, 1]} : vector<8x512xf32> to vector<8x128xf32>
    %54 = arith.negf %53 : vector<8x128xf32>
    %55 = math.exp %54 : vector<8x128xf32>
    %cst_26 = arith.constant 1.000000e+00 : f32
    %56 = vector.broadcast %cst_26 : f32 to vector<8x128xf32>
    %57 = arith.addf %56, %55 : vector<8x128xf32>
    %58 = arith.divf %56, %57 : vector<8x128xf32>
    %59 = vector.extract_strided_slice %52 {offsets = [0, 128], sizes = [8, 128], strides = [1, 1]} : vector<8x512xf32> to vector<8x128xf32>
    %60 = arith.negf %59 : vector<8x128xf32>
    %61 = math.exp %60 : vector<8x128xf32>
    %cst_27 = arith.constant 1.000000e+00 : f32
    %62 = vector.broadcast %cst_27 : f32 to vector<8x128xf32>
    %63 = arith.addf %62, %61 : vector<8x128xf32>
    %64 = arith.divf %62, %63 : vector<8x128xf32>
    %65 = vector.extract_strided_slice %52 {offsets = [0, 256], sizes = [8, 128], strides = [1, 1]} : vector<8x512xf32> to vector<8x128xf32>
    %66 = math.tanh %65 : vector<8x128xf32>
    %67 = vector.extract_strided_slice %52 {offsets = [0, 384], sizes = [8, 128], strides = [1, 1]} : vector<8x512xf32> to vector<8x128xf32>
    %68 = arith.negf %67 : vector<8x128xf32>
    %69 = math.exp %68 : vector<8x128xf32>
    %cst_28 = arith.constant 1.000000e+00 : f32
    %70 = vector.broadcast %cst_28 : f32 to vector<8x128xf32>
    %71 = arith.addf %70, %69 : vector<8x128xf32>
    %72 = arith.divf %70, %71 : vector<8x128xf32>
    %73 = arith.mulf %64, %15 : vector<8x128xf32>
    %74 = arith.mulf %58, %66 : vector<8x128xf32>
    %75 = arith.addf %73, %74 : vector<8x128xf32>
    %76 = math.tanh %75 : vector<8x128xf32>
    %77 = arith.mulf %72, %76 : vector<8x128xf32>
    %c1_i32 = arith.constant 1 : i32
    %78 = arith.index_cast %c1_i32 : i32 to index
    %c0_29 = arith.constant 0 : index
    %c0_30 = arith.constant 0 : index
    %79 = vector.load %arg10[%78, %c0_29, %c0_30] : memref<8x8x512xf32, #tpu.memory_space<vmem>>, vector<1x8x512xf32>
    %80 = vector.shape_cast %79 : vector<1x8x512xf32> to vector<8x512xf32>
    %81 = arith.truncf %46 : vector<8x128xf32> to vector<8x128xbf16>
    %cst_31 = arith.constant dense<0.000000e+00> : vector<8x512xf32>
    %82 = tpu.matmul %81, %0, %cst_31 {dimension_numbers = #tpu.dot_dimension_numbers<[1], [0], [0], [1], [0, 0, 1, 1], [], []>} : vector<8x128xbf16>, vector<128x512xbf16>, vector<8x512xf32> -> vector<8x512xf32>
    %83 = arith.addf %80, %82 : vector<8x512xf32>
    %84 = vector.extract_strided_slice %83 {offsets = [0, 0], sizes = [8, 128], strides = [1, 1]} : vector<8x512xf32> to vector<8x128xf32>
    %85 = arith.negf %84 : vector<8x128xf32>
    %86 = math.exp %85 : vector<8x128xf32>
    %cst_32 = arith.constant 1.000000e+00 : f32
    %87 = vector.broadcast %cst_32 : f32 to vector<8x128xf32>
    %88 = arith.addf %87, %86 : vector<8x128xf32>
    %89 = arith.divf %87, %88 : vector<8x128xf32>
    %90 = vector.extract_strided_slice %83 {offsets = [0, 128], sizes = [8, 128], strides = [1, 1]} : vector<8x512xf32> to vector<8x128xf32>
    %91 = arith.negf %90 : vector<8x128xf32>
    %92 = math.exp %91 : vector<8x128xf32>
    %cst_33 = arith.constant 1.000000e+00 : f32
    %93 = vector.broadcast %cst_33 : f32 to vector<8x128xf32>
    %94 = arith.addf %93, %92 : vector<8x128xf32>
    %95 = arith.divf %93, %94 : vector<8x128xf32>
    %96 = vector.extract_strided_slice %83 {offsets = [0, 256], sizes = [8, 128], strides = [1, 1]} : vector<8x512xf32> to vector<8x128xf32>
    %97 = math.tanh %96 : vector<8x128xf32>
    %98 = vector.extract_strided_slice %83 {offsets = [0, 384], sizes = [8, 128], strides = [1, 1]} : vector<8x512xf32> to vector<8x128xf32>
    %99 = arith.negf %98 : vector<8x128xf32>
    %100 = math.exp %99 : vector<8x128xf32>
    %cst_34 = arith.constant 1.000000e+00 : f32
    %101 = vector.broadcast %cst_34 : f32 to vector<8x128xf32>
    %102 = arith.addf %101, %100 : vector<8x128xf32>
    %103 = arith.divf %101, %102 : vector<8x128xf32>
    %104 = arith.mulf %95, %44 : vector<8x128xf32>
    %105 = arith.mulf %89, %97 : vector<8x128xf32>
    %106 = arith.addf %104, %105 : vector<8x128xf32>
    %107 = math.tanh %106 : vector<8x128xf32>
    %108 = arith.mulf %103, %107 : vector<8x128xf32>
    %109 = arith.truncf %108 : vector<8x128xf32> to vector<8x128xbf16>
    %cst_35 = arith.constant dense<0.000000e+00> : vector<8x512xf32>
    %110 = tpu.matmul %109, %1, %cst_35 {dimension_numbers = #tpu.dot_dimension_numbers<[1], [0], [0], [1], [0, 0, 1, 1], [], []>} : vector<8x128xbf16>, vector<128x512xbf16>, vector<8x512xf32> -> vector<8x512xf32>
    %111 = arith.truncf %77 : vector<8x128xf32> to vector<8x128xbf16>
    %cst_36 = arith.constant dense<0.000000e+00> : vector<8x512xf32>
    %112 = tpu.matmul %111, %2, %cst_36 {dimension_numbers = #tpu.dot_dimension_numbers<[1], [0], [0], [1], [0, 0, 1, 1], [], []>} : vector<8x128xbf16>, vector<128x512xbf16>, vector<8x512xf32> -> vector<8x512xf32>
    %113 = arith.addf %110, %112 : vector<8x512xf32>
    %114 = arith.addf %113, %5 : vector<8x512xf32>
    %115 = vector.extract_strided_slice %114 {offsets = [0, 0], sizes = [8, 128], strides = [1, 1]} : vector<8x512xf32> to vector<8x128xf32>
    %116 = arith.negf %115 : vector<8x128xf32>
    %117 = math.exp %116 : vector<8x128xf32>
    %cst_37 = arith.constant 1.000000e+00 : f32
    %118 = vector.broadcast %cst_37 : f32 to vector<8x128xf32>
    %119 = arith.addf %118, %117 : vector<8x128xf32>
    %120 = arith.divf %118, %119 : vector<8x128xf32>
    %121 = vector.extract_strided_slice %114 {offsets = [0, 128], sizes = [8, 128], strides = [1, 1]} : vector<8x512xf32> to vector<8x128xf32>
    %122 = arith.negf %121 : vector<8x128xf32>
    %123 = math.exp %122 : vector<8x128xf32>
    %cst_38 = arith.constant 1.000000e+00 : f32
    %124 = vector.broadcast %cst_38 : f32 to vector<8x128xf32>
    %125 = arith.addf %124, %123 : vector<8x128xf32>
    %126 = arith.divf %124, %125 : vector<8x128xf32>
    %127 = vector.extract_strided_slice %114 {offsets = [0, 256], sizes = [8, 128], strides = [1, 1]} : vector<8x512xf32> to vector<8x128xf32>
    %128 = math.tanh %127 : vector<8x128xf32>
    %129 = vector.extract_strided_slice %114 {offsets = [0, 384], sizes = [8, 128], strides = [1, 1]} : vector<8x512xf32> to vector<8x128xf32>
    %130 = arith.negf %129 : vector<8x128xf32>
    %131 = math.exp %130 : vector<8x128xf32>
    %cst_39 = arith.constant 1.000000e+00 : f32
    %132 = vector.broadcast %cst_39 : f32 to vector<8x128xf32>
    %133 = arith.addf %132, %131 : vector<8x128xf32>
    %134 = arith.divf %132, %133 : vector<8x128xf32>
    %135 = arith.mulf %126, %75 : vector<8x128xf32>
    %136 = arith.mulf %120, %128 : vector<8x128xf32>
    %137 = arith.addf %135, %136 : vector<8x128xf32>
    %138 = math.tanh %137 : vector<8x128xf32>
    %139 = arith.mulf %134, %138 : vector<8x128xf32>
    %c2_i32 = arith.constant 2 : i32
    %140 = arith.index_cast %c2_i32 : i32 to index
    %c0_40 = arith.constant 0 : index
    %c0_41 = arith.constant 0 : index
    %141 = vector.load %arg10[%140, %c0_40, %c0_41] : memref<8x8x512xf32, #tpu.memory_space<vmem>>, vector<1x8x512xf32>
    %142 = vector.shape_cast %141 : vector<1x8x512xf32> to vector<8x512xf32>
    %143 = arith.truncf %108 : vector<8x128xf32> to vector<8x128xbf16>
    %cst_42 = arith.constant dense<0.000000e+00> : vector<8x512xf32>
    %144 = tpu.matmul %143, %0, %cst_42 {dimension_numbers = #tpu.dot_dimension_numbers<[1], [0], [0], [1], [0, 0, 1, 1], [], []>} : vector<8x128xbf16>, vector<128x512xbf16>, vector<8x512xf32> -> vector<8x512xf32>
    %145 = arith.addf %142, %144 : vector<8x512xf32>
    %146 = vector.extract_strided_slice %145 {offsets = [0, 0], sizes = [8, 128], strides = [1, 1]} : vector<8x512xf32> to vector<8x128xf32>
    %147 = arith.negf %146 : vector<8x128xf32>
    %148 = math.exp %147 : vector<8x128xf32>
    %cst_43 = arith.constant 1.000000e+00 : f32
    %149 = vector.broadcast %cst_43 : f32 to vector<8x128xf32>
    %150 = arith.addf %149, %148 : vector<8x128xf32>
    %151 = arith.divf %149, %150 : vector<8x128xf32>
    %152 = vector.extract_strided_slice %145 {offsets = [0, 128], sizes = [8, 128], strides = [1, 1]} : vector<8x512xf32> to vector<8x128xf32>
    %153 = arith.negf %152 : vector<8x128xf32>
    %154 = math.exp %153 : vector<8x128xf32>
    %cst_44 = arith.constant 1.000000e+00 : f32
    %155 = vector.broadcast %cst_44 : f32 to vector<8x128xf32>
    %156 = arith.addf %155, %154 : vector<8x128xf32>
    %157 = arith.divf %155, %156 : vector<8x128xf32>
    %158 = vector.extract_strided_slice %145 {offsets = [0, 256], sizes = [8, 128], strides = [1, 1]} : vector<8x512xf32> to vector<8x128xf32>
    %159 = math.tanh %158 : vector<8x128xf32>
    %160 = vector.extract_strided_slice %145 {offsets = [0, 384], sizes = [8, 128], strides = [1, 1]} : vector<8x512xf32> to vector<8x128xf32>
    %161 = arith.negf %160 : vector<8x128xf32>
    %162 = math.exp %161 : vector<8x128xf32>
    %cst_45 = arith.constant 1.000000e+00 : f32
    %163 = vector.broadcast %cst_45 : f32 to vector<8x128xf32>
    %164 = arith.addf %163, %162 : vector<8x128xf32>
    %165 = arith.divf %163, %164 : vector<8x128xf32>
    %166 = arith.mulf %157, %106 : vector<8x128xf32>
    %167 = arith.mulf %151, %159 : vector<8x128xf32>
    %168 = arith.addf %166, %167 : vector<8x128xf32>
    %169 = math.tanh %168 : vector<8x128xf32>
    %170 = arith.mulf %165, %169 : vector<8x128xf32>
    %171 = arith.truncf %170 : vector<8x128xf32> to vector<8x128xbf16>
    %cst_46 = arith.constant dense<0.000000e+00> : vector<8x512xf32>
    %172 = tpu.matmul %171, %1, %cst_46 {dimension_numbers = #tpu.dot_dimension_numbers<[1], [0], [0], [1], [0, 0, 1, 1], [], []>} : vector<8x128xbf16>, vector<128x512xbf16>, vector<8x512xf32> -> vector<8x512xf32>
    %173 = arith.truncf %139 : vector<8x128xf32> to vector<8x128xbf16>
    %cst_47 = arith.constant dense<0.000000e+00> : vector<8x512xf32>
    %174 = tpu.matmul %173, %2, %cst_47 {dimension_numbers = #tpu.dot_dimension_numbers<[1], [0], [0], [1], [0, 0, 1, 1], [], []>} : vector<8x128xbf16>, vector<128x512xbf16>, vector<8x512xf32> -> vector<8x512xf32>
    %175 = arith.addf %172, %174 : vector<8x512xf32>
    %176 = arith.addf %175, %5 : vector<8x512xf32>
    %177 = vector.extract_strided_slice %176 {offsets = [0, 0], sizes = [8, 128], strides = [1, 1]} : vector<8x512xf32> to vector<8x128xf32>
    %178 = arith.negf %177 : vector<8x128xf32>
    %179 = math.exp %178 : vector<8x128xf32>
    %cst_48 = arith.constant 1.000000e+00 : f32
    %180 = vector.broadcast %cst_48 : f32 to vector<8x128xf32>
    %181 = arith.addf %180, %179 : vector<8x128xf32>
    %182 = arith.divf %180, %181 : vector<8x128xf32>
    %183 = vector.extract_strided_slice %176 {offsets = [0, 128], sizes = [8, 128], strides = [1, 1]} : vector<8x512xf32> to vector<8x128xf32>
    %184 = arith.negf %183 : vector<8x128xf32>
    %185 = math.exp %184 : vector<8x128xf32>
    %cst_49 = arith.constant 1.000000e+00 : f32
    %186 = vector.broadcast %cst_49 : f32 to vector<8x128xf32>
    %187 = arith.addf %186, %185 : vector<8x128xf32>
    %188 = arith.divf %186, %187 : vector<8x128xf32>
    %189 = vector.extract_strided_slice %176 {offsets = [0, 256], sizes = [8, 128], strides = [1, 1]} : vector<8x512xf32> to vector<8x128xf32>
    %190 = math.tanh %189 : vector<8x128xf32>
    %191 = vector.extract_strided_slice %176 {offsets = [0, 384], sizes = [8, 128], strides = [1, 1]} : vector<8x512xf32> to vector<8x128xf32>
    %192 = arith.negf %191 : vector<8x128xf32>
    %193 = math.exp %192 : vector<8x128xf32>
    %cst_50 = arith.constant 1.000000e+00 : f32
    %194 = vector.broadcast %cst_50 : f32 to vector<8x128xf32>
    %195 = arith.addf %194, %193 : vector<8x128xf32>
    %196 = arith.divf %194, %195 : vector<8x128xf32>
    %197 = arith.mulf %188, %137 : vector<8x128xf32>
    %198 = arith.mulf %182, %190 : vector<8x128xf32>
    %199 = arith.addf %197, %198 : vector<8x128xf32>
    %200 = math.tanh %199 : vector<8x128xf32>
    %201 = arith.mulf %196, %200 : vector<8x128xf32>
    %c3_i32 = arith.constant 3 : i32
    %202 = arith.index_cast %c3_i32 : i32 to index
    %c0_51 = arith.constant 0 : index
    %c0_52 = arith.constant 0 : index
    %203 = vector.load %arg10[%202, %c0_51, %c0_52] : memref<8x8x512xf32, #tpu.memory_space<vmem>>, vector<1x8x512xf32>
    %204 = vector.shape_cast %203 : vector<1x8x512xf32> to vector<8x512xf32>
    %205 = arith.truncf %170 : vector<8x128xf32> to vector<8x128xbf16>
    %cst_53 = arith.constant dense<0.000000e+00> : vector<8x512xf32>
    %206 = tpu.matmul %205, %0, %cst_53 {dimension_numbers = #tpu.dot_dimension_numbers<[1], [0], [0], [1], [0, 0, 1, 1], [], []>} : vector<8x128xbf16>, vector<128x512xbf16>, vector<8x512xf32> -> vector<8x512xf32>
    %207 = arith.addf %204, %206 : vector<8x512xf32>
    %208 = vector.extract_strided_slice %207 {offsets = [0, 0], sizes = [8, 128], strides = [1, 1]} : vector<8x512xf32> to vector<8x128xf32>
    %209 = arith.negf %208 : vector<8x128xf32>
    %210 = math.exp %209 : vector<8x128xf32>
    %cst_54 = arith.constant 1.000000e+00 : f32
    %211 = vector.broadcast %cst_54 : f32 to vector<8x128xf32>
    %212 = arith.addf %211, %210 : vector<8x128xf32>
    %213 = arith.divf %211, %212 : vector<8x128xf32>
    %214 = vector.extract_strided_slice %207 {offsets = [0, 128], sizes = [8, 128], strides = [1, 1]} : vector<8x512xf32> to vector<8x128xf32>
    %215 = arith.negf %214 : vector<8x128xf32>
    %216 = math.exp %215 : vector<8x128xf32>
    %cst_55 = arith.constant 1.000000e+00 : f32
    %217 = vector.broadcast %cst_55 : f32 to vector<8x128xf32>
    %218 = arith.addf %217, %216 : vector<8x128xf32>
    %219 = arith.divf %217, %218 : vector<8x128xf32>
    %220 = vector.extract_strided_slice %207 {offsets = [0, 256], sizes = [8, 128], strides = [1, 1]} : vector<8x512xf32> to vector<8x128xf32>
    %221 = math.tanh %220 : vector<8x128xf32>
    %222 = vector.extract_strided_slice %207 {offsets = [0, 384], sizes = [8, 128], strides = [1, 1]} : vector<8x512xf32> to vector<8x128xf32>
    %223 = arith.negf %222 : vector<8x128xf32>
    %224 = math.exp %223 : vector<8x128xf32>
    %cst_56 = arith.constant 1.000000e+00 : f32
    %225 = vector.broadcast %cst_56 : f32 to vector<8x128xf32>
    %226 = arith.addf %225, %224 : vector<8x128xf32>
    %227 = arith.divf %225, %226 : vector<8x128xf32>
    %228 = arith.mulf %219, %168 : vector<8x128xf32>
    %229 = arith.mulf %213, %221 : vector<8x128xf32>
    %230 = arith.addf %228, %229 : vector<8x128xf32>
    %231 = math.tanh %230 : vector<8x128xf32>
    %232 = arith.mulf %227, %231 : vector<8x128xf32>
    %233 = arith.truncf %232 : vector<8x128xf32> to vector<8x128xbf16>
    %cst_57 = arith.constant dense<0.000000e+00> : vector<8x512xf32>
    %234 = tpu.matmul %233, %1, %cst_57 {dimension_numbers = #tpu.dot_dimension_numbers<[1], [0], [0], [1], [0, 0, 1, 1], [], []>} : vector<8x128xbf16>, vector<128x512xbf16>, vector<8x512xf32> -> vector<8x512xf32>
    %235 = arith.truncf %201 : vector<8x128xf32> to vector<8x128xbf16>
    %cst_58 = arith.constant dense<0.000000e+00> : vector<8x512xf32>
    %236 = tpu.matmul %235, %2, %cst_58 {dimension_numbers = #tpu.dot_dimension_numbers<[1], [0], [0], [1], [0, 0, 1, 1], [], []>} : vector<8x128xbf16>, vector<128x512xbf16>, vector<8x512xf32> -> vector<8x512xf32>
    %237 = arith.addf %234, %236 : vector<8x512xf32>
    %238 = arith.addf %237, %5 : vector<8x512xf32>
    %239 = vector.extract_strided_slice %238 {offsets = [0, 0], sizes = [8, 128], strides = [1, 1]} : vector<8x512xf32> to vector<8x128xf32>
    %240 = arith.negf %239 : vector<8x128xf32>
    %241 = math.exp %240 : vector<8x128xf32>
    %cst_59 = arith.constant 1.000000e+00 : f32
    %242 = vector.broadcast %cst_59 : f32 to vector<8x128xf32>
    %243 = arith.addf %242, %241 : vector<8x128xf32>
    %244 = arith.divf %242, %243 : vector<8x128xf32>
    %245 = vector.extract_strided_slice %238 {offsets = [0, 128], sizes = [8, 128], strides = [1, 1]} : vector<8x512xf32> to vector<8x128xf32>
    %246 = arith.negf %245 : vector<8x128xf32>
    %247 = math.exp %246 : vector<8x128xf32>
    %cst_60 = arith.constant 1.000000e+00 : f32
    %248 = vector.broadcast %cst_60 : f32 to vector<8x128xf32>
    %249 = arith.addf %248, %247 : vector<8x128xf32>
    %250 = arith.divf %248, %249 : vector<8x128xf32>
    %251 = vector.extract_strided_slice %238 {offsets = [0, 256], sizes = [8, 128], strides = [1, 1]} : vector<8x512xf32> to vector<8x128xf32>
    %252 = math.tanh %251 : vector<8x128xf32>
    %253 = vector.extract_strided_slice %238 {offsets = [0, 384], sizes = [8, 128], strides = [1, 1]} : vector<8x512xf32> to vector<8x128xf32>
    %254 = arith.negf %253 : vector<8x128xf32>
    %255 = math.exp %254 : vector<8x128xf32>
    %cst_61 = arith.constant 1.000000e+00 : f32
    %256 = vector.broadcast %cst_61 : f32 to vector<8x128xf32>
    %257 = arith.addf %256, %255 : vector<8x128xf32>
    %258 = arith.divf %256, %257 : vector<8x128xf32>
    %259 = arith.mulf %250, %199 : vector<8x128xf32>
    %260 = arith.mulf %244, %252 : vector<8x128xf32>
    %261 = arith.addf %259, %260 : vector<8x128xf32>
    %262 = math.tanh %261 : vector<8x128xf32>
    %263 = arith.mulf %258, %262 : vector<8x128xf32>
    %c4_i32 = arith.constant 4 : i32
    %264 = arith.index_cast %c4_i32 : i32 to index
    %c0_62 = arith.constant 0 : index
    %c0_63 = arith.constant 0 : index
    %265 = vector.load %arg10[%264, %c0_62, %c0_63] : memref<8x8x512xf32, #tpu.memory_space<vmem>>, vector<1x8x512xf32>
    %266 = vector.shape_cast %265 : vector<1x8x512xf32> to vector<8x512xf32>
    %267 = arith.truncf %232 : vector<8x128xf32> to vector<8x128xbf16>
    %cst_64 = arith.constant dense<0.000000e+00> : vector<8x512xf32>
    %268 = tpu.matmul %267, %0, %cst_64 {dimension_numbers = #tpu.dot_dimension_numbers<[1], [0], [0], [1], [0, 0, 1, 1], [], []>} : vector<8x128xbf16>, vector<128x512xbf16>, vector<8x512xf32> -> vector<8x512xf32>
    %269 = arith.addf %266, %268 : vector<8x512xf32>
    %270 = vector.extract_strided_slice %269 {offsets = [0, 0], sizes = [8, 128], strides = [1, 1]} : vector<8x512xf32> to vector<8x128xf32>
    %271 = arith.negf %270 : vector<8x128xf32>
    %272 = math.exp %271 : vector<8x128xf32>
    %cst_65 = arith.constant 1.000000e+00 : f32
    %273 = vector.broadcast %cst_65 : f32 to vector<8x128xf32>
    %274 = arith.addf %273, %272 : vector<8x128xf32>
    %275 = arith.divf %273, %274 : vector<8x128xf32>
    %276 = vector.extract_strided_slice %269 {offsets = [0, 128], sizes = [8, 128], strides = [1, 1]} : vector<8x512xf32> to vector<8x128xf32>
    %277 = arith.negf %276 : vector<8x128xf32>
    %278 = math.exp %277 : vector<8x128xf32>
    %cst_66 = arith.constant 1.000000e+00 : f32
    %279 = vector.broadcast %cst_66 : f32 to vector<8x128xf32>
    %280 = arith.addf %279, %278 : vector<8x128xf32>
    %281 = arith.divf %279, %280 : vector<8x128xf32>
    %282 = vector.extract_strided_slice %269 {offsets = [0, 256], sizes = [8, 128], strides = [1, 1]} : vector<8x512xf32> to vector<8x128xf32>
    %283 = math.tanh %282 : vector<8x128xf32>
    %284 = vector.extract_strided_slice %269 {offsets = [0, 384], sizes = [8, 128], strides = [1, 1]} : vector<8x512xf32> to vector<8x128xf32>
    %285 = arith.negf %284 : vector<8x128xf32>
    %286 = math.exp %285 : vector<8x128xf32>
    %cst_67 = arith.constant 1.000000e+00 : f32
    %287 = vector.broadcast %cst_67 : f32 to vector<8x128xf32>
    %288 = arith.addf %287, %286 : vector<8x128xf32>
    %289 = arith.divf %287, %288 : vector<8x128xf32>
    %290 = arith.mulf %281, %230 : vector<8x128xf32>
    %291 = arith.mulf %275, %283 : vector<8x128xf32>
    %292 = arith.addf %290, %291 : vector<8x128xf32>
    %293 = math.tanh %292 : vector<8x128xf32>
    %294 = arith.mulf %289, %293 : vector<8x128xf32>
    %295 = arith.truncf %294 : vector<8x128xf32> to vector<8x128xbf16>
    %cst_68 = arith.constant dense<0.000000e+00> : vector<8x512xf32>
    %296 = tpu.matmul %295, %1, %cst_68 {dimension_numbers = #tpu.dot_dimension_numbers<[1], [0], [0], [1], [0, 0, 1, 1], [], []>} : vector<8x128xbf16>, vector<128x512xbf16>, vector<8x512xf32> -> vector<8x512xf32>
    %297 = arith.truncf %263 : vector<8x128xf32> to vector<8x128xbf16>
    %cst_69 = arith.constant dense<0.000000e+00> : vector<8x512xf32>
    %298 = tpu.matmul %297, %2, %cst_69 {dimension_numbers = #tpu.dot_dimension_numbers<[1], [0], [0], [1], [0, 0, 1, 1], [], []>} : vector<8x128xbf16>, vector<128x512xbf16>, vector<8x512xf32> -> vector<8x512xf32>
    %299 = arith.addf %296, %298 : vector<8x512xf32>
    %300 = arith.addf %299, %5 : vector<8x512xf32>
    %301 = vector.extract_strided_slice %300 {offsets = [0, 0], sizes = [8, 128], strides = [1, 1]} : vector<8x512xf32> to vector<8x128xf32>
    %302 = arith.negf %301 : vector<8x128xf32>
    %303 = math.exp %302 : vector<8x128xf32>
    %cst_70 = arith.constant 1.000000e+00 : f32
    %304 = vector.broadcast %cst_70 : f32 to vector<8x128xf32>
    %305 = arith.addf %304, %303 : vector<8x128xf32>
    %306 = arith.divf %304, %305 : vector<8x128xf32>
    %307 = vector.extract_strided_slice %300 {offsets = [0, 128], sizes = [8, 128], strides = [1, 1]} : vector<8x512xf32> to vector<8x128xf32>
    %308 = arith.negf %307 : vector<8x128xf32>
    %309 = math.exp %308 : vector<8x128xf32>
    %cst_71 = arith.constant 1.000000e+00 : f32
    %310 = vector.broadcast %cst_71 : f32 to vector<8x128xf32>
    %311 = arith.addf %310, %309 : vector<8x128xf32>
    %312 = arith.divf %310, %311 : vector<8x128xf32>
    %313 = vector.extract_strided_slice %300 {offsets = [0, 256], sizes = [8, 128], strides = [1, 1]} : vector<8x512xf32> to vector<8x128xf32>
    %314 = math.tanh %313 : vector<8x128xf32>
    %315 = vector.extract_strided_slice %300 {offsets = [0, 384], sizes = [8, 128], strides = [1, 1]} : vector<8x512xf32> to vector<8x128xf32>
    %316 = arith.negf %315 : vector<8x128xf32>
    %317 = math.exp %316 : vector<8x128xf32>
    %cst_72 = arith.constant 1.000000e+00 : f32
    %318 = vector.broadcast %cst_72 : f32 to vector<8x128xf32>
    %319 = arith.addf %318, %317 : vector<8x128xf32>
    %320 = arith.divf %318, %319 : vector<8x128xf32>
    %321 = arith.mulf %312, %261 : vector<8x128xf32>
    %322 = arith.mulf %306, %314 : vector<8x128xf32>
    %323 = arith.addf %321, %322 : vector<8x128xf32>
    %324 = math.tanh %323 : vector<8x128xf32>
    %325 = arith.mulf %320, %324 : vector<8x128xf32>
    %c5_i32 = arith.constant 5 : i32
    %326 = arith.index_cast %c5_i32 : i32 to index
    %c0_73 = arith.constant 0 : index
    %c0_74 = arith.constant 0 : index
    %327 = vector.load %arg10[%326, %c0_73, %c0_74] : memref<8x8x512xf32, #tpu.memory_space<vmem>>, vector<1x8x512xf32>
    %328 = vector.shape_cast %327 : vector<1x8x512xf32> to vector<8x512xf32>
    %329 = arith.truncf %294 : vector<8x128xf32> to vector<8x128xbf16>
    %cst_75 = arith.constant dense<0.000000e+00> : vector<8x512xf32>
    %330 = tpu.matmul %329, %0, %cst_75 {dimension_numbers = #tpu.dot_dimension_numbers<[1], [0], [0], [1], [0, 0, 1, 1], [], []>} : vector<8x128xbf16>, vector<128x512xbf16>, vector<8x512xf32> -> vector<8x512xf32>
    %331 = arith.addf %328, %330 : vector<8x512xf32>
    %332 = vector.extract_strided_slice %331 {offsets = [0, 0], sizes = [8, 128], strides = [1, 1]} : vector<8x512xf32> to vector<8x128xf32>
    %333 = arith.negf %332 : vector<8x128xf32>
    %334 = math.exp %333 : vector<8x128xf32>
    %cst_76 = arith.constant 1.000000e+00 : f32
    %335 = vector.broadcast %cst_76 : f32 to vector<8x128xf32>
    %336 = arith.addf %335, %334 : vector<8x128xf32>
    %337 = arith.divf %335, %336 : vector<8x128xf32>
    %338 = vector.extract_strided_slice %331 {offsets = [0, 128], sizes = [8, 128], strides = [1, 1]} : vector<8x512xf32> to vector<8x128xf32>
    %339 = arith.negf %338 : vector<8x128xf32>
    %340 = math.exp %339 : vector<8x128xf32>
    %cst_77 = arith.constant 1.000000e+00 : f32
    %341 = vector.broadcast %cst_77 : f32 to vector<8x128xf32>
    %342 = arith.addf %341, %340 : vector<8x128xf32>
    %343 = arith.divf %341, %342 : vector<8x128xf32>
    %344 = vector.extract_strided_slice %331 {offsets = [0, 256], sizes = [8, 128], strides = [1, 1]} : vector<8x512xf32> to vector<8x128xf32>
    %345 = math.tanh %344 : vector<8x128xf32>
    %346 = vector.extract_strided_slice %331 {offsets = [0, 384], sizes = [8, 128], strides = [1, 1]} : vector<8x512xf32> to vector<8x128xf32>
    %347 = arith.negf %346 : vector<8x128xf32>
    %348 = math.exp %347 : vector<8x128xf32>
    %cst_78 = arith.constant 1.000000e+00 : f32
    %349 = vector.broadcast %cst_78 : f32 to vector<8x128xf32>
    %350 = arith.addf %349, %348 : vector<8x128xf32>
    %351 = arith.divf %349, %350 : vector<8x128xf32>
    %352 = arith.mulf %343, %292 : vector<8x128xf32>
    %353 = arith.mulf %337, %345 : vector<8x128xf32>
    %354 = arith.addf %352, %353 : vector<8x128xf32>
    %355 = math.tanh %354 : vector<8x128xf32>
    %356 = arith.mulf %351, %355 : vector<8x128xf32>
    %357 = arith.truncf %356 : vector<8x128xf32> to vector<8x128xbf16>
    %cst_79 = arith.constant dense<0.000000e+00> : vector<8x512xf32>
    %358 = tpu.matmul %357, %1, %cst_79 {dimension_numbers = #tpu.dot_dimension_numbers<[1], [0], [0], [1], [0, 0, 1, 1], [], []>} : vector<8x128xbf16>, vector<128x512xbf16>, vector<8x512xf32> -> vector<8x512xf32>
    %359 = arith.truncf %325 : vector<8x128xf32> to vector<8x128xbf16>
    %cst_80 = arith.constant dense<0.000000e+00> : vector<8x512xf32>
    %360 = tpu.matmul %359, %2, %cst_80 {dimension_numbers = #tpu.dot_dimension_numbers<[1], [0], [0], [1], [0, 0, 1, 1], [], []>} : vector<8x128xbf16>, vector<128x512xbf16>, vector<8x512xf32> -> vector<8x512xf32>
    %361 = arith.addf %358, %360 : vector<8x512xf32>
    %362 = arith.addf %361, %5 : vector<8x512xf32>
    %363 = vector.extract_strided_slice %362 {offsets = [0, 0], sizes = [8, 128], strides = [1, 1]} : vector<8x512xf32> to vector<8x128xf32>
    %364 = arith.negf %363 : vector<8x128xf32>
    %365 = math.exp %364 : vector<8x128xf32>
    %cst_81 = arith.constant 1.000000e+00 : f32
    %366 = vector.broadcast %cst_81 : f32 to vector<8x128xf32>
    %367 = arith.addf %366, %365 : vector<8x128xf32>
    %368 = arith.divf %366, %367 : vector<8x128xf32>
    %369 = vector.extract_strided_slice %362 {offsets = [0, 128], sizes = [8, 128], strides = [1, 1]} : vector<8x512xf32> to vector<8x128xf32>
    %370 = arith.negf %369 : vector<8x128xf32>
    %371 = math.exp %370 : vector<8x128xf32>
    %cst_82 = arith.constant 1.000000e+00 : f32
    %372 = vector.broadcast %cst_82 : f32 to vector<8x128xf32>
    %373 = arith.addf %372, %371 : vector<8x128xf32>
    %374 = arith.divf %372, %373 : vector<8x128xf32>
    %375 = vector.extract_strided_slice %362 {offsets = [0, 256], sizes = [8, 128], strides = [1, 1]} : vector<8x512xf32> to vector<8x128xf32>
    %376 = math.tanh %375 : vector<8x128xf32>
    %377 = vector.extract_strided_slice %362 {offsets = [0, 384], sizes = [8, 128], strides = [1, 1]} : vector<8x512xf32> to vector<8x128xf32>
    %378 = arith.negf %377 : vector<8x128xf32>
    %379 = math.exp %378 : vector<8x128xf32>
    %cst_83 = arith.constant 1.000000e+00 : f32
    %380 = vector.broadcast %cst_83 : f32 to vector<8x128xf32>
    %381 = arith.addf %380, %379 : vector<8x128xf32>
    %382 = arith.divf %380, %381 : vector<8x128xf32>
    %383 = arith.mulf %374, %323 : vector<8x128xf32>
    %384 = arith.mulf %368, %376 : vector<8x128xf32>
    %385 = arith.addf %383, %384 : vector<8x128xf32>
    %386 = math.tanh %385 : vector<8x128xf32>
    %387 = arith.mulf %382, %386 : vector<8x128xf32>
    %c6_i32 = arith.constant 6 : i32
    %388 = arith.index_cast %c6_i32 : i32 to index
    %c0_84 = arith.constant 0 : index
    %c0_85 = arith.constant 0 : index
    %389 = vector.load %arg10[%388, %c0_84, %c0_85] : memref<8x8x512xf32, #tpu.memory_space<vmem>>, vector<1x8x512xf32>
    %390 = vector.shape_cast %389 : vector<1x8x512xf32> to vector<8x512xf32>
    %391 = arith.truncf %356 : vector<8x128xf32> to vector<8x128xbf16>
    %cst_86 = arith.constant dense<0.000000e+00> : vector<8x512xf32>
    %392 = tpu.matmul %391, %0, %cst_86 {dimension_numbers = #tpu.dot_dimension_numbers<[1], [0], [0], [1], [0, 0, 1, 1], [], []>} : vector<8x128xbf16>, vector<128x512xbf16>, vector<8x512xf32> -> vector<8x512xf32>
    %393 = arith.addf %390, %392 : vector<8x512xf32>
    %394 = vector.extract_strided_slice %393 {offsets = [0, 0], sizes = [8, 128], strides = [1, 1]} : vector<8x512xf32> to vector<8x128xf32>
    %395 = arith.negf %394 : vector<8x128xf32>
    %396 = math.exp %395 : vector<8x128xf32>
    %cst_87 = arith.constant 1.000000e+00 : f32
    %397 = vector.broadcast %cst_87 : f32 to vector<8x128xf32>
    %398 = arith.addf %397, %396 : vector<8x128xf32>
    %399 = arith.divf %397, %398 : vector<8x128xf32>
    %400 = vector.extract_strided_slice %393 {offsets = [0, 128], sizes = [8, 128], strides = [1, 1]} : vector<8x512xf32> to vector<8x128xf32>
    %401 = arith.negf %400 : vector<8x128xf32>
    %402 = math.exp %401 : vector<8x128xf32>
    %cst_88 = arith.constant 1.000000e+00 : f32
    %403 = vector.broadcast %cst_88 : f32 to vector<8x128xf32>
    %404 = arith.addf %403, %402 : vector<8x128xf32>
    %405 = arith.divf %403, %404 : vector<8x128xf32>
    %406 = vector.extract_strided_slice %393 {offsets = [0, 256], sizes = [8, 128], strides = [1, 1]} : vector<8x512xf32> to vector<8x128xf32>
    %407 = math.tanh %406 : vector<8x128xf32>
    %408 = vector.extract_strided_slice %393 {offsets = [0, 384], sizes = [8, 128], strides = [1, 1]} : vector<8x512xf32> to vector<8x128xf32>
    %409 = arith.negf %408 : vector<8x128xf32>
    %410 = math.exp %409 : vector<8x128xf32>
    %cst_89 = arith.constant 1.000000e+00 : f32
    %411 = vector.broadcast %cst_89 : f32 to vector<8x128xf32>
    %412 = arith.addf %411, %410 : vector<8x128xf32>
    %413 = arith.divf %411, %412 : vector<8x128xf32>
    %414 = arith.mulf %405, %354 : vector<8x128xf32>
    %415 = arith.mulf %399, %407 : vector<8x128xf32>
    %416 = arith.addf %414, %415 : vector<8x128xf32>
    %417 = math.tanh %416 : vector<8x128xf32>
    %418 = arith.mulf %413, %417 : vector<8x128xf32>
    %419 = arith.truncf %418 : vector<8x128xf32> to vector<8x128xbf16>
    %cst_90 = arith.constant dense<0.000000e+00> : vector<8x512xf32>
    %420 = tpu.matmul %419, %1, %cst_90 {dimension_numbers = #tpu.dot_dimension_numbers<[1], [0], [0], [1], [0, 0, 1, 1], [], []>} : vector<8x128xbf16>, vector<128x512xbf16>, vector<8x512xf32> -> vector<8x512xf32>
    %421 = arith.truncf %387 : vector<8x128xf32> to vector<8x128xbf16>
    %cst_91 = arith.constant dense<0.000000e+00> : vector<8x512xf32>
    %422 = tpu.matmul %421, %2, %cst_91 {dimension_numbers = #tpu.dot_dimension_numbers<[1], [0], [0], [1], [0, 0, 1, 1], [], []>} : vector<8x128xbf16>, vector<128x512xbf16>, vector<8x512xf32> -> vector<8x512xf32>
    %423 = arith.addf %420, %422 : vector<8x512xf32>
    %424 = arith.addf %423, %5 : vector<8x512xf32>
    %425 = vector.extract_strided_slice %424 {offsets = [0, 0], sizes = [8, 128], strides = [1, 1]} : vector<8x512xf32> to vector<8x128xf32>
    %426 = arith.negf %425 : vector<8x128xf32>
    %427 = math.exp %426 : vector<8x128xf32>
    %cst_92 = arith.constant 1.000000e+00 : f32
    %428 = vector.broadcast %cst_92 : f32 to vector<8x128xf32>
    %429 = arith.addf %428, %427 : vector<8x128xf32>
    %430 = arith.divf %428, %429 : vector<8x128xf32>
    %431 = vector.extract_strided_slice %424 {offsets = [0, 128], sizes = [8, 128], strides = [1, 1]} : vector<8x512xf32> to vector<8x128xf32>
    %432 = arith.negf %431 : vector<8x128xf32>
    %433 = math.exp %432 : vector<8x128xf32>
    %cst_93 = arith.constant 1.000000e+00 : f32
    %434 = vector.broadcast %cst_93 : f32 to vector<8x128xf32>
    %435 = arith.addf %434, %433 : vector<8x128xf32>
    %436 = arith.divf %434, %435 : vector<8x128xf32>
    %437 = vector.extract_strided_slice %424 {offsets = [0, 256], sizes = [8, 128], strides = [1, 1]} : vector<8x512xf32> to vector<8x128xf32>
    %438 = math.tanh %437 : vector<8x128xf32>
    %439 = vector.extract_strided_slice %424 {offsets = [0, 384], sizes = [8, 128], strides = [1, 1]} : vector<8x512xf32> to vector<8x128xf32>
    %440 = arith.negf %439 : vector<8x128xf32>
    %441 = math.exp %440 : vector<8x128xf32>
    %cst_94 = arith.constant 1.000000e+00 : f32
    %442 = vector.broadcast %cst_94 : f32 to vector<8x128xf32>
    %443 = arith.addf %442, %441 : vector<8x128xf32>
    %444 = arith.divf %442, %443 : vector<8x128xf32>
    %445 = arith.mulf %436, %385 : vector<8x128xf32>
    %446 = arith.mulf %430, %438 : vector<8x128xf32>
    %447 = arith.addf %445, %446 : vector<8x128xf32>
    %448 = math.tanh %447 : vector<8x128xf32>
    %449 = arith.mulf %444, %448 : vector<8x128xf32>
    %c7_i32 = arith.constant 7 : i32
    %450 = arith.index_cast %c7_i32 : i32 to index
    %c0_95 = arith.constant 0 : index
    %c0_96 = arith.constant 0 : index
    %451 = vector.load %arg10[%450, %c0_95, %c0_96] : memref<8x8x512xf32, #tpu.memory_space<vmem>>, vector<1x8x512xf32>
    %452 = vector.shape_cast %451 : vector<1x8x512xf32> to vector<8x512xf32>
    %453 = arith.truncf %418 : vector<8x128xf32> to vector<8x128xbf16>
    %cst_97 = arith.constant dense<0.000000e+00> : vector<8x512xf32>
    %454 = tpu.matmul %453, %0, %cst_97 {dimension_numbers = #tpu.dot_dimension_numbers<[1], [0], [0], [1], [0, 0, 1, 1], [], []>} : vector<8x128xbf16>, vector<128x512xbf16>, vector<8x512xf32> -> vector<8x512xf32>
    %455 = arith.addf %452, %454 : vector<8x512xf32>
    %456 = vector.extract_strided_slice %455 {offsets = [0, 0], sizes = [8, 128], strides = [1, 1]} : vector<8x512xf32> to vector<8x128xf32>
    %457 = arith.negf %456 : vector<8x128xf32>
    %458 = math.exp %457 : vector<8x128xf32>
    %cst_98 = arith.constant 1.000000e+00 : f32
    %459 = vector.broadcast %cst_98 : f32 to vector<8x128xf32>
    %460 = arith.addf %459, %458 : vector<8x128xf32>
    %461 = arith.divf %459, %460 : vector<8x128xf32>
    %462 = vector.extract_strided_slice %455 {offsets = [0, 128], sizes = [8, 128], strides = [1, 1]} : vector<8x512xf32> to vector<8x128xf32>
    %463 = arith.negf %462 : vector<8x128xf32>
    %464 = math.exp %463 : vector<8x128xf32>
    %cst_99 = arith.constant 1.000000e+00 : f32
    %465 = vector.broadcast %cst_99 : f32 to vector<8x128xf32>
    %466 = arith.addf %465, %464 : vector<8x128xf32>
    %467 = arith.divf %465, %466 : vector<8x128xf32>
    %468 = vector.extract_strided_slice %455 {offsets = [0, 256], sizes = [8, 128], strides = [1, 1]} : vector<8x512xf32> to vector<8x128xf32>
    %469 = math.tanh %468 : vector<8x128xf32>
    %470 = vector.extract_strided_slice %455 {offsets = [0, 384], sizes = [8, 128], strides = [1, 1]} : vector<8x512xf32> to vector<8x128xf32>
    %471 = arith.negf %470 : vector<8x128xf32>
    %472 = math.exp %471 : vector<8x128xf32>
    %cst_100 = arith.constant 1.000000e+00 : f32
    %473 = vector.broadcast %cst_100 : f32 to vector<8x128xf32>
    %474 = arith.addf %473, %472 : vector<8x128xf32>
    %475 = arith.divf %473, %474 : vector<8x128xf32>
    %476 = arith.mulf %467, %416 : vector<8x128xf32>
    %477 = arith.mulf %461, %469 : vector<8x128xf32>
    %478 = arith.addf %476, %477 : vector<8x128xf32>
    %479 = math.tanh %478 : vector<8x128xf32>
    %480 = arith.mulf %475, %479 : vector<8x128xf32>
    %481 = arith.truncf %480 : vector<8x128xf32> to vector<8x128xbf16>
    %cst_101 = arith.constant dense<0.000000e+00> : vector<8x512xf32>
    %482 = tpu.matmul %481, %1, %cst_101 {dimension_numbers = #tpu.dot_dimension_numbers<[1], [0], [0], [1], [0, 0, 1, 1], [], []>} : vector<8x128xbf16>, vector<128x512xbf16>, vector<8x512xf32> -> vector<8x512xf32>
    %483 = arith.truncf %449 : vector<8x128xf32> to vector<8x128xbf16>
    %cst_102 = arith.constant dense<0.000000e+00> : vector<8x512xf32>
    %484 = tpu.matmul %483, %2, %cst_102 {dimension_numbers = #tpu.dot_dimension_numbers<[1], [0], [0], [1], [0, 0, 1, 1], [], []>} : vector<8x128xbf16>, vector<128x512xbf16>, vector<8x512xf32> -> vector<8x512xf32>
    %485 = arith.addf %482, %484 : vector<8x512xf32>
    %486 = arith.addf %485, %5 : vector<8x512xf32>
    %487 = vector.extract_strided_slice %486 {offsets = [0, 0], sizes = [8, 128], strides = [1, 1]} : vector<8x512xf32> to vector<8x128xf32>
    %488 = arith.negf %487 : vector<8x128xf32>
    %489 = math.exp %488 : vector<8x128xf32>
    %cst_103 = arith.constant 1.000000e+00 : f32
    %490 = vector.broadcast %cst_103 : f32 to vector<8x128xf32>
    %491 = arith.addf %490, %489 : vector<8x128xf32>
    %492 = arith.divf %490, %491 : vector<8x128xf32>
    %493 = vector.extract_strided_slice %486 {offsets = [0, 128], sizes = [8, 128], strides = [1, 1]} : vector<8x512xf32> to vector<8x128xf32>
    %494 = arith.negf %493 : vector<8x128xf32>
    %495 = math.exp %494 : vector<8x128xf32>
    %cst_104 = arith.constant 1.000000e+00 : f32
    %496 = vector.broadcast %cst_104 : f32 to vector<8x128xf32>
    %497 = arith.addf %496, %495 : vector<8x128xf32>
    %498 = arith.divf %496, %497 : vector<8x128xf32>
    %499 = vector.extract_strided_slice %486 {offsets = [0, 256], sizes = [8, 128], strides = [1, 1]} : vector<8x512xf32> to vector<8x128xf32>
    %500 = math.tanh %499 : vector<8x128xf32>
    %501 = vector.extract_strided_slice %486 {offsets = [0, 384], sizes = [8, 128], strides = [1, 1]} : vector<8x512xf32> to vector<8x128xf32>
    %502 = arith.negf %501 : vector<8x128xf32>
    %503 = math.exp %502 : vector<8x128xf32>
    %cst_105 = arith.constant 1.000000e+00 : f32
    %504 = vector.broadcast %cst_105 : f32 to vector<8x128xf32>
    %505 = arith.addf %504, %503 : vector<8x128xf32>
    %506 = arith.divf %504, %505 : vector<8x128xf32>
    %507 = arith.mulf %498, %447 : vector<8x128xf32>
    %508 = arith.mulf %492, %500 : vector<8x128xf32>
    %509 = arith.addf %507, %508 : vector<8x128xf32>
    %510 = math.tanh %509 : vector<8x128xf32>
    %511 = arith.mulf %506, %510 : vector<8x128xf32>
    %c8_i32 = arith.constant 8 : i32
    %512 = arith.truncf %511 : vector<8x128xf32> to vector<8x128xbf16>
    %c0_106 = arith.constant 0 : index
    %c0_107 = arith.constant 0 : index
    %513 = vector.load %arg7[%c0_106, %c0_107] : memref<128x128xbf16, #tpu.memory_space<vmem>>, vector<128x128xbf16>
    %cst_108 = arith.constant dense<0.000000e+00> : vector<8x128xf32>
    %514 = tpu.matmul %512, %513, %cst_108 {dimension_numbers = #tpu.dot_dimension_numbers<[1], [0], [0], [1], [0, 0, 1, 1], [], []>} : vector<8x128xbf16>, vector<128x128xbf16>, vector<8x128xf32> -> vector<8x128xf32>
    %c0_109 = arith.constant 0 : index
    %c0_110 = arith.constant 0 : index
    %515 = vector.load %arg8[%c0_109, %c0_110] : memref<1x128xf32, #tpu.memory_space<vmem>>, vector<1x128xf32>
    %516 = vector.broadcast %515 : vector<1x128xf32> to vector<8x128xf32>
    %517 = arith.addf %514, %516 : vector<8x128xf32>
    %c0_111 = arith.constant 0 : index
    %c0_112 = arith.constant 0 : index
    %518 = vector.load %arg9[%c0_111, %c0_112] : memref<8x128xf32, #tpu.memory_space<vmem>>, vector<8x128xf32>
    tpu.vector_store %arg9[%c0_111, %c0_112], %517 {strides = array<i32>} : memref<8x128xf32, #tpu.memory_space<vmem>>, vector<8x128xf32>,
    return
  }
}

</mosaic_0001>

<bundles_post_ra>
// kernel: lstm_model_forward.1
= control target key start
LH: loop header
LB: loop body
LE: loop exit
PB: predicated region body
PF: predicated region fallthrough
CT: control target
= control target key end

     0   :  { %14 = vsyncpa [#allocation4], 0  ;;  %s6531_s0 = inlined_call_operand.vmem [shape: bf16[8,8,128], index: 0, kind: input, shape index: {}]   ;;  %s6532_s1 = inlined_call_operand.vmem [shape: bf16[128,512], index: 1, kind: input, shape index: {}]   ;;  %s6533_s2 = inlined_call_operand.hbm [shape: bf16[128,512], index: 2, kind: input, shape index: {}]   ;;  %s6534_s3 = inlined_call_operand.vmem [shape: f32[1,512], index: 3, kind: input, shape index: {}]   ;;  %s6535_s4 = inlined_call_operand.hbm [shape: bf16[128,512], index: 4, kind: input, shape index: {}]   ;;  %s6536_s5 = inlined_call_operand.hbm [shape: bf16[128,512], index: 5, kind: input, shape index: {}]   ;;  %s6537_s6 = inlined_call_operand.vmem [shape: f32[1,512], index: 6, kind: input, shape index: {}]   ;;  %s6538_s7 = inlined_call_operand.vmem [shape: bf16[128,128], index: 7, kind: input, shape index: {}]   ;;  %s6539_s8 = inlined_call_operand.vmem [shape: f32[1,128], index: 8, kind: input, shape index: {}]   ;;  %s6540_s9 = inlined_call_operand.vmem [shape: f32[8,128], index: 9, kind: output, shape index: {}]  }
   0x1   :  { %15 = vsyncpa [#allocation6], 0  ;;  %s4633_s30 = smov [#allocation5]   ;;  %s4634_s11 = smov [#allocation3]  }
   0x2   :  { %s39_s10 = sshll.u32 %s4633_s30, 4  ;;  %s25_s12 = sshll.u32 %s4634_s11, 4  ;;  %s40_s10 = int_to_ptr.vmem [resolvable:$true] %s39_s10  ;;  %s4691_s12 = int_to_ptr.vmem [resolvable:$true] %s25_s12 }
   0x3   :  { %s4563_s15 = scalar_lea.hbm %s6535_s4, 4096 }
   0x4   :  { %p4564_p0 = scmp.ne.s32.totalorder %s6535_s4, %s4563_s15  ;;  %p4567_p1 = scmp.lt.u32.totalorder %s4563_s15, %s6535_s4 }
   0x6   :  { %p4569_p2 = pnand %p4567_p1, %p4564_p0 }
   0x8   :  { %4572 = shalt.err (!%p4569_p2)
}
   0x9   :  { %s4573_s20 = scalar_lea.vmem %s40_s10, 4096  ;;  %p4578_p4 = scmp.lt.s32.totalorder %s40_s10, %s40_s10 }
   0xa   :  { %p4574_p3 = scmp.ne.s32.totalorder %s40_s10, %s4573_s20  ;;  %p4579_p5 = scmp.lt.s32.totalorder %s4573_s20, %s4573_s20 }
   0xc   :  { %p4580_p6 = por %p4579_p5, %p4578_p4 }
   0xe   :  { %p4581_p7 = pnand %p4580_p6, %p4574_p3 }
  0x10   :  { %4584 = shalt.err (!%p4581_p7)
}
  0x11   :  { %s4635_s21 = smov 256   ;;  %s4636_s22 = smov 16  }
  0x12   :  { %45 = dma.hbm_to_vmem [thread:$0]  %s6535_s4, 4096, %s40_s10, [#allocation6], %s4635_s21, %s4635_s21, %s4636_s22  }
  0x13   :  { %s4585_s27 = scalar_lea.hbm %s6533_s2, 4096 }
  0x14   :  { %p4586_p8 = scmp.ne.s32.totalorder %s6533_s2, %s4585_s27  ;;  %p4589_p9 = scmp.lt.u32.totalorder %s4585_s27, %s6533_s2 }
  0x16   :  { %p4591_p10 = pnand %p4589_p9, %p4586_p8 }
  0x18   :  { %4594 = shalt.err (!%p4591_p10)
}
  0x19   :  { %s4595_s13 = scalar_lea.vmem %s4691_s12, 4096  ;;  %p4600_p12 = scmp.lt.s32.totalorder %s4691_s12, %s4691_s12 }
  0x1a   :  { %p4596_p11 = scmp.ne.s32.totalorder %s4691_s12, %s4595_s13  ;;  %p4601_p13 = scmp.lt.s32.totalorder %s4595_s13, %s4595_s13 }
  0x1c   :  { %p4602_p0 = por %p4601_p13, %p4600_p12 }
  0x1e   :  { %p4603_p1 = pnand %p4602_p0, %p4596_p11 }
  0x20   :  { %4606 = shalt.err (!%p4603_p1)
}
  0x21   :  { %31 = dma.hbm_to_vmem [thread:$0]  %s6533_s2, 4096, %s4691_s12, [#allocation4], %s4635_s21, %s4635_s21, %s4636_s22  }
  0x22   :  { %s4637_s14 = smov [#allocation7]   ;;  %s4607_s18 = scalar_lea.hbm %s6536_s5, 4096 }
  0x23   :  { %s51_s15 = sshll.u32 %s4637_s14, 4  ;;  %p4608_p2 = scmp.ne.s32.totalorder %s6536_s5, %s4607_s18  ;;  %s52_s15 = int_to_ptr.vmem [resolvable:$true] %s51_s15 }
  0x24   :  { %p4611_p3 = scmp.lt.u32.totalorder %s4607_s18, %s6536_s5 }
  0x26   :  { %p4613_p4 = pnand %p4611_p3, %p4608_p2 }
  0x28   :  { %4616 = shalt.err (!%p4613_p4)
}
  0x29   :  { %s4617_s25 = scalar_lea.vmem %s52_s15, 4096  ;;  %p4622_p6 = scmp.lt.s32.totalorder %s52_s15, %s52_s15 }
  0x2a   :  { %p4618_p5 = scmp.ne.s32.totalorder %s52_s15, %s4617_s25  ;;  %p4623_p7 = scmp.lt.s32.totalorder %s4617_s25, %s4617_s25 }
  0x2c   :  { %p4624_p8 = por %p4623_p7, %p4622_p6 }
  0x2e   :  { %p4625_p9 = pnand %p4624_p8, %p4618_p5 }
  0x30   :  { %4628 = shalt.err (!%p4625_p9)
}
  0x31   :  { %57 = dma.hbm_to_vmem [thread:$0]  %s6536_s5, 4096, %s52_s15, [#allocation6], %s4635_s21, %s4635_s21, %s4636_s22  }
  0x32   :  { %4629 = dma.done.wait [#allocation4], 4096  }
  0x33   :  { %4630 = vsyncadd [#allocation4], 4294963200 }
  0x34   :  { %4631 = dma.done.wait [#allocation6], 8192  }
  0x35   :  { %4632 = vsyncadd [#allocation6], 4294959104  ;;  %v6541_v0 = vmov 0   ;;  %v3911_v1 = vld [vmem:[%s6532_s1 + $0x4] ss:$16 sps:$4 sm:$0xff]   ;;  %v3972_v44 = vld [vmem:[%s6531_s0 + $0x8] sm:$0xff]  }
  0x36   :  { %470 = vmatprep.mubr.bf16.mxu0 %v6541_v0  ;;  %543 = vmatprep.mubr.bf16.mxu1 %v6541_v0  ;;  %v3913_v2 = vld [vmem:[%s6532_s1 + $0xc] ss:$16 sps:$4 sm:$0xff]   ;;  %v3915_v3 = vld [vmem:[%s6532_s1] ss:$16 sps:$4 sm:$0xff]   ;;  %v3916_v4 = vld [vmem:[%s6532_s1 + $0x8] ss:$16 sps:$4 sm:$0xff]  }
  0x37   :  { %438 = vmatprep.subr.bf16.mxu0 %v3911_v1  ;;  %511 = vmatprep.subr.bf16.mxu1 %v3913_v2  ;;  %v3917_v5 = vld [vmem:[%s6532_s1 + $0x24] ss:$16 sps:$4 sm:$0xff]   ;;  %v3919_v6 = vld [vmem:[%s6532_s1 + $0x2c] ss:$16 sps:$4 sm:$0xff]   ;;  %v3921_v7 = vld [vmem:[%s6532_s1 + $0x20] ss:$16 sps:$4 sm:$0xff]  }
  0x38   :  { %439 = vmatpush1.bf16.msra.mxu0 %v3915_v3  ;;  %512 = vmatpush1.bf16.msra.mxu1 %v3916_v4  ;;  %v3922_v8 = vld [vmem:[%s6532_s1 + $0x28] ss:$16 sps:$4 sm:$0xff]   ;;  %v3923_v9 = vld [vmem:[%s6532_s1 + $0x44] ss:$16 sps:$4 sm:$0xff]   ;;  %v3925_v10 = vld [vmem:[%s6532_s1 + $0x4c] ss:$16 sps:$4 sm:$0xff]  }
  0x39   :  { %440 = vmatprep.subr.bf16.mxu0 %v3917_v5  ;;  %513 = vmatprep.subr.bf16.mxu1 %v3919_v6  ;;  %v3927_v11 = vld [vmem:[%s6532_s1 + $0x40] ss:$16 sps:$4 sm:$0xff]   ;;  %v3928_v12 = vld [vmem:[%s6532_s1 + $0x48] ss:$16 sps:$4 sm:$0xff]   ;;  %v3929_v13 = vld [vmem:[%s6532_s1 + $0x64] ss:$16 sps:$4 sm:$0xff]  }
  0x3a   :  { %v3931_v14 = vld [vmem:[%s6532_s1 + $0x6c] ss:$16 sps:$4 sm:$0xff]   ;;  %v3933_v15 = vld [vmem:[%s6532_s1 + $0x60] ss:$16 sps:$4 sm:$0xff]   ;;  %v3934_v16 = vld [vmem:[%s6532_s1 + $0x68] ss:$16 sps:$4 sm:$0xff]  }
  0x3b   :  { %v3935_v17 = vld [vmem:[%s6532_s1 + $0x84] ss:$16 sps:$4 sm:$0xff]   ;;  %v3937_v18 = vld [vmem:[%s6532_s1 + $0x8c] ss:$16 sps:$4 sm:$0xff]   ;;  %v3939_v19 = vld [vmem:[%s6532_s1 + $0x80] ss:$16 sps:$4 sm:$0xff]  }
  0x3c   :  { %441 = vmatpush1.bf16.msra.mxu0 %v3921_v7  ;;  %514 = vmatpush1.bf16.msra.mxu1 %v3922_v8  ;;  %v3940_v20 = vld [vmem:[%s6532_s1 + $0x88] ss:$16 sps:$4 sm:$0xff]   ;;  %v3941_v21 = vld [vmem:[%s6532_s1 + $0xa4] ss:$16 sps:$4 sm:$0xff]   ;;  %v3943_v22 = vld [vmem:[%s6532_s1 + $0xac] ss:$16 sps:$4 sm:$0xff]  }
  0x3d   :  { %442 = vmatprep.subr.bf16.mxu0 %v3923_v9  ;;  %515 = vmatprep.subr.bf16.mxu1 %v3925_v10  ;;  %v3945_v23 = vld [vmem:[%s6532_s1 + $0xa0] ss:$16 sps:$4 sm:$0xff]   ;;  %v3946_v24 = vld [vmem:[%s6532_s1 + $0xa8] ss:$16 sps:$4 sm:$0xff]   ;;  %v3947_v25 = vld [vmem:[%s6532_s1 + $0xc4] ss:$16 sps:$4 sm:$0xff]  }
  0x3e   :  { %v3949_v26 = vld [vmem:[%s6532_s1 + $0xcc] ss:$16 sps:$4 sm:$0xff]   ;;  %v3951_v27 = vld [vmem:[%s6532_s1 + $0xc0] ss:$16 sps:$4 sm:$0xff]   ;;  %v3952_v28 = vld [vmem:[%s6532_s1 + $0xc8] ss:$16 sps:$4 sm:$0xff]  }
  0x3f   :  { %v3953_v29 = vld [vmem:[%s6532_s1 + $0xe4] ss:$16 sps:$4 sm:$0xff]   ;;  %v3955_v30 = vld [vmem:[%s6532_s1 + $0xec] ss:$16 sps:$4 sm:$0xff]   ;;  %v3957_v31 = vld [vmem:[%s6532_s1 + $0xe0] ss:$16 sps:$4 sm:$0xff]  }
  0x40   :  { %443 = vmatpush1.bf16.msra.mxu0 %v3927_v11  ;;  %516 = vmatpush1.bf16.msra.mxu1 %v3928_v12  ;;  %v3958_v32 = vld [vmem:[%s6532_s1 + $0xe8] ss:$16 sps:$4 sm:$0xff]   ;;  %v4841_v33 = vld [vmem:[#allocation3 + $0x4] ss:$16 sps:$4 sm:$0xff]   ;;  %v4843_v34 = vld [vmem:[#allocation3 + $0xc] ss:$16 sps:$4 sm:$0xff]  }
  0x41   :  { %444 = vmatprep.subr.bf16.mxu0 %v3929_v13  ;;  %517 = vmatprep.subr.bf16.mxu1 %v3931_v14  ;;  %v3959_v35 = vld [vmem:[%s6531_s0] sm:$0xff]   ;;  %v4850_v37 = vld [vmem:[#allocation3 + $0x8] ss:$16 sps:$4 sm:$0xff]   ;;  %v4856_v39 = vld [vmem:[#allocation3 + $0x2c] ss:$16 sps:$4 sm:$0xff]   ;;  %vm4640_vm0 = vmmov 0  }
  0x42   :  { %v4848_v36 = vld [vmem:[#allocation3] ss:$16 sps:$4 sm:$0xff]   ;;  %v4854_v38 = vld [vmem:[#allocation3 + $0x24] ss:$16 sps:$4 sm:$0xff]   ;;  %v4862_v41 = vld [vmem:[#allocation3 + $0x28] ss:$16 sps:$4 sm:$0xff]  }
  0x43   :  { %v4858_v40 = vld [vmem:[#allocation3 + $0x20] ss:$16 sps:$4 sm:$0xff]   ;;  %v4866_v42 = vld [vmem:[#allocation3 + $0x44] ss:$16 sps:$4 sm:$0xff]   ;;  %v4868_v43 = vld [vmem:[#allocation3 + $0x4c] ss:$16 sps:$4 sm:$0xff]  }
  0x44   :  { %445 = vmatpush1.bf16.msra.mxu0 %v3933_v15  ;;  %518 = vmatpush1.bf16.msra.mxu1 %v3934_v16  ;;  %v4875_v45 = vld [vmem:[#allocation3 + $0x40] ss:$16 sps:$4 sm:$0xff]   ;;  %v4877_v46 = vld [vmem:[#allocation3 + $0x48] ss:$16 sps:$4 sm:$0xff]   ;;  %v4881_v47 = vld [vmem:[#allocation3 + $0x64] ss:$16 sps:$4 sm:$0xff]  }
  0x45   :  { %446 = vmatprep.subr.bf16.mxu0 %v3935_v17  ;;  %519 = vmatprep.subr.bf16.mxu1 %v3937_v18  ;;  %v4885_v48 = vld [vmem:[#allocation3 + $0x6c] ss:$16 sps:$4 sm:$0xff]   ;;  %v4887_v49 = vld [vmem:[#allocation3 + $0x60] ss:$16 sps:$4 sm:$0xff]   ;;  %v4889_v50 = vld [vmem:[#allocation3 + $0x68] ss:$16 sps:$4 sm:$0xff]  }
  0x46   :  { %v4893_v51 = vld [vmem:[#allocation3 + $0x84] ss:$16 sps:$4 sm:$0xff]   ;;  %v4897_v52 = vld [vmem:[#allocation3 + $0x8c] ss:$16 sps:$4 sm:$0xff]   ;;  %v4904_v54 = vld [vmem:[#allocation3 + $0x80] ss:$16 sps:$4 sm:$0xff]  }
  0x47   :  { %v3985_v53 = vld [vmem:[%s6531_s0 + $0x10] sm:$0xff]   ;;  %v4906_v55 = vld [vmem:[#allocation3 + $0x88] ss:$16 sps:$4 sm:$0xff]   ;;  %v4910_v57 = vld [vmem:[#allocation3 + $0xac] ss:$16 sps:$4 sm:$0xff]  }
  0x48   :  { %447 = vmatpush1.bf16.msra.mxu0 %v3939_v19  ;;  %520 = vmatpush1.bf16.msra.mxu1 %v3940_v20  ;;  %v4908_v56 = vld [vmem:[#allocation3 + $0xa4] ss:$16 sps:$4 sm:$0xff]   ;;  %v4916_v58 = vld [vmem:[#allocation3 + $0xa0] ss:$16 sps:$4 sm:$0xff]   ;;  %v4918_v59 = vld [vmem:[#allocation3 + $0xa8] ss:$16 sps:$4 sm:$0xff]  }
  0x49   :  { %448 = vmatprep.subr.bf16.mxu0 %v3941_v21  ;;  %521 = vmatprep.subr.bf16.mxu1 %v3943_v22  ;;  %v4920_v60 = vld [vmem:[#allocation3 + $0xc4] ss:$16 sps:$4 sm:$0xff]   ;;  %v4922_v61 = vld [vmem:[#allocation3 + $0xcc] ss:$16 sps:$4 sm:$0xff]   ;;  %v4933_v63 = vld [vmem:[#allocation3 + $0xc0] ss:$16 sps:$4 sm:$0xff]  }
  0x4a   :  { %v3998_v62 = vld [vmem:[%s6531_s0 + $0x18] sm:$0xff]   ;;  %v4937_v2 = vld [vmem:[#allocation3 + $0xe4] ss:$16 sps:$4 sm:$0xff]   ;;  %v4945_v4 = vld [vmem:[#allocation3 + $0xe0] ss:$16 sps:$4 sm:$0xff]  }
  0x4b   :  { %v4935_v1 = vld [vmem:[#allocation3 + $0xc8] ss:$16 sps:$4 sm:$0xff]   ;;  %v4939_v3 = vld [vmem:[#allocation3 + $0xec] ss:$16 sps:$4 sm:$0xff]   ;;  %v4961_v6 = vld [vmem:[#allocation7 + $0x4] ss:$16 sps:$4 sm:$0xff]  }
  0x4c   :  { %449 = vmatpush1.bf16.msra.mxu0 %v3945_v23  ;;  %522 = vmatpush1.bf16.msra.mxu1 %v3946_v24  ;;  %v4947_v5 = vld [vmem:[#allocation3 + $0xe8] ss:$16 sps:$4 sm:$0xff]   ;;  %v4963_v7 = vld [vmem:[#allocation7 + $0xc] ss:$16 sps:$4 sm:$0xff]   ;;  %v4965_v8 = vld [vmem:[#allocation7] ss:$16 sps:$4 sm:$0xff]  }
  0x4d   :  { %450 = vmatprep.subr.bf16.mxu0 %v3947_v25  ;;  %523 = vmatprep.subr.bf16.mxu1 %v3949_v26  ;;  %v4968_v9 = vld [vmem:[#allocation7 + $0x8] ss:$16 sps:$4 sm:$0xff]   ;;  %v4973_v10 = vld [vmem:[#allocation7 + $0x24] ss:$16 sps:$4 sm:$0xff]   ;;  %v4975_v11 = vld [vmem:[#allocation7 + $0x2c] ss:$16 sps:$4 sm:$0xff]  }
  0x4e   :  { %v4977_v12 = vld [vmem:[#allocation7 + $0x20] ss:$16 sps:$4 sm:$0xff]   ;;  %v4980_v13 = vld [vmem:[#allocation7 + $0x28] ss:$16 sps:$4 sm:$0xff]   ;;  %v4985_v14 = vld [vmem:[#allocation7 + $0x44] ss:$16 sps:$4 sm:$0xff]  }
  0x4f   :  { %6806 = vst [vmem:[#allocation10_spill] sm:$0xff] %v4985_v14  ;;  %v4987_v15 = vld [vmem:[#allocation7 + $0x4c] ss:$16 sps:$4 sm:$0xff]   ;;  %v4989_v16 = vld [vmem:[#allocation7 + $0x40] ss:$16 sps:$4 sm:$0xff]  }
  0x50   :  { %451 = vmatpush1.bf16.msra.mxu0 %v3951_v27  ;;  %524 = vmatpush1.bf16.msra.mxu1 %v3952_v28  ;;  %6807 = vst [vmem:[#allocation11_spill] sm:$0xff] %v4987_v15  ;;  %6808 = vst [vmem:[#allocation12_spill] sm:$0xff] %v4989_v16  ;;  %v4992_v17 = vld [vmem:[#allocation7 + $0x48] ss:$16 sps:$4 sm:$0xff]   ;;  %v4997_v18 = vld [vmem:[#allocation7 + $0x64] ss:$16 sps:$4 sm:$0xff]  }
  0x51   :  { %452 = vmatprep.subr.bf16.mxu0 %v3953_v29  ;;  %525 = vmatprep.subr.bf16.mxu1 %v3955_v30  ;;  %6809 = vst [vmem:[#allocation13_spill] sm:$0xff] %v4992_v17  ;;  %6810 = vst [vmem:[#allocation14_spill] sm:$0xff] %v4997_v18  ;;  %v4999_v19 = vld [vmem:[#allocation7 + $0x6c] ss:$16 sps:$4 sm:$0xff]   ;;  %v5001_v20 = vld [vmem:[#allocation7 + $0x60] ss:$16 sps:$4 sm:$0xff]  }
  0x52   :  { %6811 = vst [vmem:[#allocation15_spill] sm:$0xff] %v4999_v19  ;;  %6812 = vst [vmem:[#allocation16_spill] sm:$0xff] %v5001_v20  ;;  %v5004_v21 = vld [vmem:[#allocation7 + $0x68] ss:$16 sps:$4 sm:$0xff]   ;;  %v5009_v22 = vld [vmem:[#allocation7 + $0x84] ss:$16 sps:$4 sm:$0xff]  }
  0x53   :  { %6813 = vst [vmem:[#allocation17_spill] sm:$0xff] %v5004_v21  ;;  %6814 = vst [vmem:[#allocation18_spill] sm:$0xff] %v5009_v22  ;;  %v5011_v23 = vld [vmem:[#allocation7 + $0x8c] ss:$16 sps:$4 sm:$0xff]   ;;  %v5014_v24 = vld [vmem:[#allocation7 + $0x80] ss:$16 sps:$4 sm:$0xff]  }
  0x54   :  { %453 = vmatpush1.bf16.msra.mxu0 %v3957_v31  ;;  %526 = vmatpush1.bf16.msra.mxu1 %v3958_v32  ;;  %6815 = vst [vmem:[#allocation19_spill] sm:$0xff] %v5011_v23  ;;  %6816 = vst [vmem:[#allocation20_spill] sm:$0xff] %v5014_v24  ;;  %v5017_v25 = vld [vmem:[#allocation7 + $0x88] ss:$16 sps:$4 sm:$0xff]   ;;  %v5021_v26 = vld [vmem:[#allocation7 + $0xa4] ss:$16 sps:$4 sm:$0xff]  }
  0x55   :  { %780 = vmatprep.subr.bf16.mxu0 %v4841_v33  ;;  %821 = vmatprep.subr.bf16.mxu1 %v4843_v34  ;;  %6817 = vst [vmem:[#allocation21_spill] sm:$0xff] %v5017_v25  ;;  %6818 = vst [vmem:[#allocation22_spill] sm:$0xff] %v5021_v26  ;;  %v5023_v27 = vld [vmem:[#allocation7 + $0xac] ss:$16 sps:$4 sm:$0xff]   ;;  %v5025_v28 = vld [vmem:[#allocation7 + $0xa0] ss:$16 sps:$4 sm:$0xff]  }
  0x56   :  { %6819 = vst [vmem:[#allocation23_spill] sm:$0xff] %v5023_v27  ;;  %6820 = vst [vmem:[#allocation24_spill] sm:$0xff] %v5025_v28  ;;  %v5028_v29 = vld [vmem:[#allocation7 + $0xa8] ss:$16 sps:$4 sm:$0xff]   ;;  %v5033_v30 = vld [vmem:[#allocation7 + $0xc4] ss:$16 sps:$4 sm:$0xff]  }
  0x57   :  { %471 = vmatmul.mubr.bf16.vlgmr.msra.gmra.mrb[0].mxu0 %v3959_v35  ;;  %544 = vmatmul.mubr.bf16.vlgmr.msra.gmra.mrb[0].mxu1 %v3959_v35  ;;  %6821 = vst [vmem:[#allocation25_spill] sm:$0xff] %v5028_v29  ;;  %6822 = vst [vmem:[#allocation26_spill] sm:$0xff] %v5033_v30  ;;  %v5035_v31 = vld [vmem:[#allocation7 + $0xcc] ss:$16 sps:$4 sm:$0xff]   ;;  %v5037_v32 = vld [vmem:[#allocation7 + $0xc0] ss:$16 sps:$4 sm:$0xff]  }
  0x58   :  { %781 = vmatpush1.bf16.msra.mxu0 %v4848_v36  ;;  %822 = vmatpush1.bf16.msra.mxu1 %v4850_v37  ;;  %6823 = vst [vmem:[#allocation27_spill] sm:$0xff] %v5035_v31  ;;  %6824 = vst [vmem:[#allocation28_spill] sm:$0xff] %v5037_v32  ;;  %v5040_v35 = vld [vmem:[#allocation7 + $0xc8] ss:$16 sps:$4 sm:$0xff]  }
  0x59   :  { %782 = vmatprep.subr.bf16.mxu0 %v4854_v38  ;;  %823 = vmatprep.subr.bf16.mxu1 %v4856_v39  ;;  %6825 = vst [vmem:[#allocation29_spill] sm:$0xff] %v5040_v35 }
  0x5a   :  { %480 = vmatprep.mubr.bf16.mxu0 %v6541_v0  ;;  %553 = vmatprep.mubr.bf16.mxu1 %v6541_v0 }
  0x5c   :  { %783 = vmatpush1.bf16.msra.mxu0 %v4858_v40  ;;  %824 = vmatpush1.bf16.msra.mxu1 %v4862_v41 }
  0x5d   :  { %784 = vmatprep.subr.bf16.mxu0 %v4866_v42  ;;  %825 = vmatprep.subr.bf16.mxu1 %v4868_v43 }
  0x5f   :  { %481 = vmatmul.mubr.bf16.gmra.mrb[4].mxu0 %v3972_v44  ;;  %554 = vmatmul.mubr.bf16.gmra.mrb[4].mxu1 %v3972_v44  ;;  %v5045_v44 = vld [vmem:[#allocation7 + $0xe4] ss:$16 sps:$4 sm:$0xff]  }
  0x60   :  { %785 = vmatpush1.bf16.msra.mxu0 %v4875_v45  ;;  %826 = vmatpush1.bf16.msra.mxu1 %v4877_v46  ;;  %6826 = vst [vmem:[#allocation30_spill] sm:$0xff] %v5045_v44 }
  0x61   :  { %786 = vmatprep.subr.bf16.mxu0 %v4881_v47  ;;  %827 = vmatprep.subr.bf16.mxu1 %v4885_v48 }
  0x62   :  { %490 = vmatprep.mubr.bf16.mxu0 %v6541_v0  ;;  %563 = vmatprep.mubr.bf16.mxu1 %v6541_v0 }
  0x64   :  { %787 = vmatpush1.bf16.msra.mxu0 %v4887_v49  ;;  %828 = vmatpush1.bf16.msra.mxu1 %v4889_v50 }
  0x65   :  { %788 = vmatprep.subr.bf16.mxu0 %v4893_v51  ;;  %829 = vmatprep.subr.bf16.mxu1 %v4897_v52 }
  0x67   :  { %491 = vmatmul.mubr.bf16.gmra.mrb[8].mxu0 %v3985_v53  ;;  %564 = vmatmul.mubr.bf16.gmra.mrb[8].mxu1 %v3985_v53  ;;  %v5047_v53 = vld [vmem:[#allocation7 + $0xec] ss:$16 sps:$4 sm:$0xff]  }
  0x68   :  { %789 = vmatpush1.bf16.msra.mxu0 %v4904_v54  ;;  %830 = vmatpush1.bf16.msra.mxu1 %v4906_v55  ;;  %6827 = vst [vmem:[#allocation31_spill] sm:$0xff] %v5047_v53 }
  0x69   :  { %790 = vmatprep.subr.bf16.mxu0 %v4908_v56  ;;  %831 = vmatprep.subr.bf16.mxu1 %v4910_v57 }
  0x6a   :  { %500 = vmatprep.mubr.bf16.mxu0 %v6541_v0  ;;  %573 = vmatprep.mubr.bf16.mxu1 %v6541_v0 }
  0x6c   :  { %791 = vmatpush1.bf16.msra.mxu0 %v4916_v58  ;;  %832 = vmatpush1.bf16.msra.mxu1 %v4918_v59 }
  0x6d   :  { %792 = vmatprep.subr.bf16.mxu0 %v4920_v60  ;;  %833 = vmatprep.subr.bf16.mxu1 %v4922_v61 }
  0x6f   :  { %501 = vmatmul.mubr.bf16.gmra.mrb[12].mxu0 %v3998_v62  ;;  %574 = vmatmul.mubr.bf16.gmra.mrb[12].mxu1 %v3998_v62  ;;  %v5049_v62 = vld [vmem:[#allocation7 + $0xe0] ss:$16 sps:$4 sm:$0xff]  }
  0x70   :  { %793 = vmatpush1.bf16.msra.mxu0 %v4933_v63  ;;  %834 = vmatpush1.bf16.msra.mxu1 %v4935_v1  ;;  %6828 = vst [vmem:[#allocation32_spill] sm:$0xff] %v5049_v62 }
  0x71   :  { %794 = vmatprep.subr.bf16.mxu0 %v4937_v2  ;;  %835 = vmatprep.subr.bf16.mxu1 %v4939_v3 }
  0x72   :  { %812 = vmatprep.mubr.bf16.mxu0 %v6541_v0  ;;  %853 = vmatprep.mubr.bf16.mxu1 %v6541_v0 }
  0x74   :  { %795 = vmatpush1.bf16.msra.mxu0 %v4945_v4  ;;  %836 = vmatpush1.bf16.msra.mxu1 %v4947_v5 }
  0x75   :  { %1051 = vmatprep.subr.bf16.mxu0 %v4961_v6  ;;  %1092 = vmatprep.subr.bf16.mxu1 %v4963_v7 }
  0x77   :  { %813 = vmatmul.mubr.bf16.vlgmr.msra.gmra.mrb[16].mxu0 %v6541_v0  ;;  %854 = vmatmul.mubr.bf16.vlgmr.msra.gmra.mrb[16].mxu1 %v6541_v0 }
  0x78   :  { %1083 = vmatprep.mubr.bf16.mxu0 %v6541_v0  ;;  %1124 = vmatprep.mubr.bf16.mxu1 %v6541_v0  ;;  %v5052_v0 = vld [vmem:[#allocation7 + $0xe8] ss:$16 sps:$4 sm:$0xff]  }
  0x79   :  { %1052 = vmatpush1.bf16.msra.mxu0 %v4965_v8  ;;  %1093 = vmatpush1.bf16.msra.mxu1 %v4968_v9  ;;  %6829 = vst [vmem:[#allocation33_spill] sm:$0xff] %v5052_v0 }
  0x7a   :  { %1053 = vmatprep.subr.bf16.mxu0 %v4973_v10  ;;  %1094 = vmatprep.subr.bf16.mxu1 %v4975_v11 }
  0x7d   :  { %1054 = vmatpush1.bf16.msra.mxu0 %v4977_v12  ;;  %1095 = vmatpush1.bf16.msra.mxu1 %v4980_v13 }
  0x7e   :  { %1055 = vmatprep.subr.bf16.mxu0 %v4985_v14  ;;  %1096 = vmatprep.subr.bf16.mxu1 %v4987_v15 }
  0x81   :  { %1056 = vmatpush1.bf16.msra.mxu0 %v4989_v16  ;;  %1097 = vmatpush1.bf16.msra.mxu1 %v4992_v17 }
  0x82   :  { %1057 = vmatprep.subr.bf16.mxu0 %v4997_v18  ;;  %1098 = vmatprep.subr.bf16.mxu1 %v4999_v19 }
  0x85   :  { %1058 = vmatpush1.bf16.msra.mxu0 %v5001_v20  ;;  %1099 = vmatpush1.bf16.msra.mxu1 %v5004_v21 }
  0x86   :  { %1059 = vmatprep.subr.bf16.mxu0 %v5009_v22  ;;  %1100 = vmatprep.subr.bf16.mxu1 %v5011_v23 }
  0x89   :  { %1060 = vmatpush1.bf16.msra.mxu0 %v5014_v24  ;;  %1101 = vmatpush1.bf16.msra.mxu1 %v5017_v25 }
  0x8a   :  { %1061 = vmatprep.subr.bf16.mxu0 %v5021_v26  ;;  %1102 = vmatprep.subr.bf16.mxu1 %v5023_v27  ;;  %v5145_v27 = vld [vmem:[#allocation5 + $0xec] ss:$16 sps:$4 sm:$0xff]  }
  0x8b   :  { %6860 = vst [vmem:[#allocation63_spill] sm:$0xff] %v5145_v27 }
  0x8d   :  { %1062 = vmatpush1.bf16.msra.mxu0 %v5025_v28  ;;  %1103 = vmatpush1.bf16.msra.mxu1 %v5028_v29  ;;  %v5064_v29 = vld [vmem:[#allocation5 + $0x8] ss:$16 sps:$4 sm:$0xff]   ;;  %v5129_v28 = vld [vmem:[#allocation5 + $0xc4] ss:$16 sps:$4 sm:$0xff]  }
  0x8e   :  { %1063 = vmatprep.subr.bf16.mxu0 %v5033_v30  ;;  %1104 = vmatprep.subr.bf16.mxu1 %v5035_v31  ;;  %v5057_v31 = vld [vmem:[#allocation5 + $0x4] ss:$16 sps:$4 sm:$0xff]   ;;  %v5062_v30 = vld [vmem:[#allocation5] ss:$16 sps:$4 sm:$0xff]   ;;  %6834 = vst [vmem:[#allocation37_spill] sm:$0xff] %v5064_v29  ;;  %6855 = vst [vmem:[#allocation58_spill] sm:$0xff] %v5129_v28 }
  0x8f   :  { %6830 = vst [vmem:[#allocation34_spill] sm:$0xff] %v5057_v31  ;;  %6833 = vst [vmem:[#allocation36_spill] sm:$0xff] %v5062_v30 }
  0x91   :  { %1064 = vmatpush1.bf16.msra.mxu0 %v5037_v32  ;;  %1105 = vmatpush1.bf16.msra.mxu1 %v5040_v35  ;;  %v5059_v32 = vld [vmem:[#allocation5 + $0xc] ss:$16 sps:$4 sm:$0xff]   ;;  %v6832_v35 = vmov 0  }
  0x92   :  { %1065 = vmatprep.subr.bf16.mxu0 %v5045_v44  ;;  %1106 = vmatprep.subr.bf16.mxu1 %v5047_v53  ;;  %6831 = vst [vmem:[#allocation35_spill] sm:$0xff] %v5059_v32  ;;  %v5076_v53 = vld [vmem:[#allocation5 + $0x20] ss:$16 sps:$4 sm:$0xff]   ;;  %v5078_v44 = vld [vmem:[#allocation5 + $0x28] ss:$16 sps:$4 sm:$0xff]  }
  0x93   :  { %6837 = vst [vmem:[#allocation40_spill] sm:$0xff] %v5076_v53  ;;  %6838 = vst [vmem:[#allocation41_spill] sm:$0xff] %v5078_v44 }
  0x95   :  { %1066 = vmatpush1.bf16.msra.mxu0 %v5049_v62  ;;  %1107 = vmatpush1.bf16.msra.mxu1 %v5052_v0  ;;  %v5071_v0 = vld [vmem:[#allocation5 + $0x24] ss:$16 sps:$4 sm:$0xff]   ;;  %v5073_v62 = vld [vmem:[#allocation5 + $0x2c] ss:$16 sps:$4 sm:$0xff]  }
  0x96   :  { %1293 = vmatprep.subr.bf16.mxu0 %v5057_v31  ;;  %1334 = vmatprep.subr.bf16.mxu1 %v5059_v32  ;;  %6835 = vst [vmem:[#allocation38_spill] sm:$0xff] %v5071_v0  ;;  %6836 = vst [vmem:[#allocation39_spill] sm:$0xff] %v5073_v62  ;;  %v5089_v32 = vld [vmem:[#allocation5 + $0x40] ss:$16 sps:$4 sm:$0xff]   ;;  %v5091_v31 = vld [vmem:[#allocation5 + $0x48] ss:$16 sps:$4 sm:$0xff]  }
  0x97   :  { %6841 = vst [vmem:[#allocation44_spill] sm:$0xff] %v5089_v32  ;;  %6842 = vst [vmem:[#allocation45_spill] sm:$0xff] %v5091_v31 }
  0x98   :  { %1084 = vmatmul.mubr.bf16.vlgmr.msra.gmra.mrb[20].mxu0 %v6832_v35  ;;  %1125 = vmatmul.mubr.bf16.vlgmr.msra.gmra.mrb[20].mxu1 %v6832_v35 }
  0x99   :  { %1294 = vmatpush1.bf16.msra.mxu0 %v5062_v30  ;;  %1335 = vmatpush1.bf16.msra.mxu1 %v5064_v29  ;;  %v5085_v29 = vld [vmem:[#allocation5 + $0x44] ss:$16 sps:$4 sm:$0xff]   ;;  %v5087_v30 = vld [vmem:[#allocation5 + $0x4c] ss:$16 sps:$4 sm:$0xff]  }
  0x9a   :  { %1325 = vmatprep.mubr.bf16.mxu0 %v6832_v35  ;;  %1366 = vmatprep.mubr.bf16.mxu1 %v6832_v35  ;;  %6839 = vst [vmem:[#allocation42_spill] sm:$0xff] %v5085_v29  ;;  %6840 = vst [vmem:[#allocation43_spill] sm:$0xff] %v5087_v30 }
  0x9b   :  { %1295 = vmatprep.subr.bf16.mxu0 %v5071_v0  ;;  %1336 = vmatprep.subr.bf16.mxu1 %v5073_v62  ;;  %v5097_v62 = vld [vmem:[#allocation5 + $0x64] ss:$16 sps:$4 sm:$0xff]   ;;  %v5103_v0 = vld [vmem:[#allocation5 + $0x68] ss:$16 sps:$4 sm:$0xff]  }
  0x9c   :  { %6843 = vst [vmem:[#allocation46_spill] sm:$0xff] %v5097_v62  ;;  %6846 = vst [vmem:[#allocation49_spill] sm:$0xff] %v5103_v0 }
  0x9d   :  { %1296 = vmatpush1.bf16.msra.mxu0 %v5076_v53  ;;  %1337 = vmatpush1.bf16.msra.mxu1 %v5078_v44  ;;  %v5099_v53 = vld [vmem:[#allocation5 + $0x6c] ss:$16 sps:$4 sm:$0xff]   ;;  %v5101_v44 = vld [vmem:[#allocation5 + $0x60] ss:$16 sps:$4 sm:$0xff]  }
  0x9e   :  { %1297 = vmatprep.subr.bf16.mxu0 %v5085_v29  ;;  %1338 = vmatprep.subr.bf16.mxu1 %v5087_v30  ;;  %6844 = vst [vmem:[#allocation47_spill] sm:$0xff] %v5099_v53  ;;  %6845 = vst [vmem:[#allocation48_spill] sm:$0xff] %v5101_v44  ;;  %v5109_v30 = vld [vmem:[#allocation5 + $0x84] ss:$16 sps:$4 sm:$0xff]   ;;  %v5115_v29 = vld [vmem:[#allocation5 + $0x88] ss:$16 sps:$4 sm:$0xff]  }
  0x9f   :  { %6847 = vst [vmem:[#allocation50_spill] sm:$0xff] %v5109_v30  ;;  %6850 = vst [vmem:[#allocation53_spill] sm:$0xff] %v5115_v29 }
  0xa1   :  { %1298 = vmatpush1.bf16.msra.mxu0 %v5089_v32  ;;  %1339 = vmatpush1.bf16.msra.mxu1 %v5091_v31  ;;  %v5111_v32 = vld [vmem:[#allocation5 + $0x8c] ss:$16 sps:$4 sm:$0xff]   ;;  %v5113_v31 = vld [vmem:[#allocation5 + $0x80] ss:$16 sps:$4 sm:$0xff]  }
  0xa2   :  { %1299 = vmatprep.subr.bf16.mxu0 %v5097_v62  ;;  %1340 = vmatprep.subr.bf16.mxu1 %v5099_v53  ;;  %6848 = vst [vmem:[#allocation51_spill] sm:$0xff] %v5111_v32  ;;  %6849 = vst [vmem:[#allocation52_spill] sm:$0xff] %v5113_v31  ;;  %v5120_v62 = vld [vmem:[#allocation5 + $0xa4] ss:$16 sps:$4 sm:$0xff]   ;;  %v5122_v53 = vld [vmem:[#allocation5 + $0xac] ss:$16 sps:$4 sm:$0xff]  }
  0xa3   :  { %6851 = vst [vmem:[#allocation54_spill] sm:$0xff] %v5120_v62  ;;  %6852 = vst [vmem:[#allocation55_spill] sm:$0xff] %v5122_v53 }
  0xa5   :  { %1300 = vmatpush1.bf16.msra.mxu0 %v5101_v44  ;;  %1341 = vmatpush1.bf16.msra.mxu1 %v5103_v0  ;;  %v5124_v44 = vld [vmem:[#allocation5 + $0xa0] ss:$16 sps:$4 sm:$0xff]   ;;  %v5127_v0 = vld [vmem:[#allocation5 + $0xa8] ss:$16 sps:$4 sm:$0xff]  }
  0xa6   :  { %1301 = vmatprep.subr.bf16.mxu0 %v5109_v30  ;;  %1342 = vmatprep.subr.bf16.mxu1 %v5111_v32  ;;  %6853 = vst [vmem:[#allocation56_spill] sm:$0xff] %v5124_v44  ;;  %6854 = vst [vmem:[#allocation57_spill] sm:$0xff] %v5127_v0  ;;  %v5133_v30 = vld [vmem:[#allocation5 + $0xcc] ss:$16 sps:$4 sm:$0xff]   ;;  %v5140_v32 = vld [vmem:[#allocation5 + $0xc8] ss:$16 sps:$4 sm:$0xff]  }
  0xa7   :  { %6856 = vst [vmem:[#allocation59_spill] sm:$0xff] %v5133_v30  ;;  %6858 = vst [vmem:[#allocation61_spill] sm:$0xff] %v5140_v32 }
  0xa9   :  { %1302 = vmatpush1.bf16.msra.mxu0 %v5113_v31  ;;  %1343 = vmatpush1.bf16.msra.mxu1 %v5115_v29  ;;  %v5136_v31 = vld [vmem:[#allocation5 + $0xc0] ss:$16 sps:$4 sm:$0xff]   ;;  %v5142_v29 = vld [vmem:[#allocation5 + $0xe4] ss:$16 sps:$4 sm:$0xff]  }
  0xaa   :  { %1303 = vmatprep.subr.bf16.mxu0 %v5120_v62  ;;  %1344 = vmatprep.subr.bf16.mxu1 %v5122_v53  ;;  %6857 = vst [vmem:[#allocation60_spill] sm:$0xff] %v5136_v31  ;;  %6859 = vst [vmem:[#allocation62_spill] sm:$0xff] %v5142_v29  ;;  %v5148_v53 = vld [vmem:[#allocation5 + $0xe0] ss:$16 sps:$4 sm:$0xff]  }
  0xab   :  { %6861 = vst [vmem:[#allocation64_spill] sm:$0xff] %v5148_v53 }
  0xad   :  { %1304 = vmatpush1.bf16.msra.mxu0 %v5124_v44  ;;  %1345 = vmatpush1.bf16.msra.mxu1 %v5127_v0  ;;  %v5152_v44 = vld [vmem:[#allocation5 + $0xe8] ss:$16 sps:$4 sm:$0xff]  }
  0xae   :  { %1305 = vmatprep.subr.bf16.mxu0 %v5129_v28  ;;  %1346 = vmatprep.subr.bf16.mxu1 %v5133_v30  ;;  %6862 = vst [vmem:[#allocation65_spill] sm:$0xff] %v5152_v44  ;;  %v172_v30 = vlaneseq }
  0xb1   :  { %1306 = vmatpush1.bf16.msra.mxu0 %v5136_v31  ;;  %1347 = vmatpush1.bf16.msra.mxu1 %v5140_v32  ;;  %v5159_v31 = vshrl.u32 %v172_v30, 7 }
  0xb2   :  { %1307 = vmatprep.subr.bf16.mxu0 %v5142_v29  ;;  %1348 = vmatprep.subr.bf16.mxu1 %v5145_v27  ;;  %v232_v27 = vld [vmem:[%s6534_s3] sm:$0xf] }
  0xb3   :  { %6863 = vst [vmem:[#allocation66_spill] sm:$0xff] %v5159_v31  ;;  %v6607_v28 = vsub.s32 2, %v5159_v31  ;;  %v6616_v32 = vsub.s32 3, %v5159_v31  ;;  %v6617_v29 = vsub.s32 0, %v5159_v31 }
  0xb5   :  { %1308 = vmatpush1.bf16.msra.mxu0 %v5148_v53  ;;  %1349 = vmatpush1.bf16.msra.mxu1 %v5152_v44  ;;  %v6624_v53 = vsub.s32 1, %v5159_v31  ;;  %v5178_v44 = vrot.slane %v232_v27, %v6616_v32  ;;  %v237_v0 = vrot.slane %v232_v27, %v6617_v29 }
  0xb6   :  { %1408 = vmatprep.subr.bf16.mxu0 %v4841_v33  ;;  %1449 = vmatprep.subr.bf16.mxu1 %v4843_v34  ;;  %v5170_v33 = vrot.slane %v232_v27, %v6607_v28 }
  0xb7   :  { %v241_v25 = vrot.slane %v232_v27, %v6624_v53 }
 0x12a   :  { %v5172_v34 = vpop.f32.mrb[0].mxu0  ;;  %v5174_v30 = vpop.f32.mrb[0].mxu1 }
 0x12b   :  { %v474_v62 = vpop.f32.mrb[1].mxu0  ;;  %v547_v26 = vpop.f32.mrb[1].mxu1 }
 0x12c   :  { %v476_v24 = vpop.f32.mrb[2].mxu0  ;;  %v549_v23 = vpop.f32.mrb[2].mxu1 }
 0x12d   :  { %v5184_v28 = vadd.f32 %v476_v24, %v237_v0  ;;  %v478_v22 = vpop.f32.mrb[3].mxu0  ;;  %v5187_v21 = vadd.f32 %v549_v23, %v5170_v33  ;;  %v551_v20 = vpop.f32.mrb[3].mxu1 }
 0x12e   :  { %v5189_v19 = vadd.f32 %v478_v22, %v241_v25  ;;  %v5192_v32 = vadd.f32 %v551_v20, %v5178_v44 }
 0x12f   :  { %6864 = vst [vmem:[#allocation67_spill] sm:$0xff] %v5184_v28  ;;  %6865 = vst [vmem:[#allocation68_spill] sm:$0xff] %v5187_v21 }
 0x130   :  { %6866 = vst [vmem:[#allocation69_spill] sm:$0xff] %v5189_v19  ;;  %6867 = vst [vmem:[#allocation70_spill] sm:$0xff] %v5192_v32 }
 0x132   :  { %v482_v29 = vpop.f32.mrb[4].mxu0  ;;  %v555_v18 = vpop.f32.mrb[4].mxu1 }
 0x133   :  { %v5194_v17 = vadd.f32 %v482_v29, %v237_v0  ;;  %v484_v31 = vpop.f32.mrb[5].mxu0  ;;  %v5197_v27 = vadd.f32 %v555_v18, %v5170_v33  ;;  %v557_v24 = vpop.f32.mrb[5].mxu1 }
 0x134   :  { %v5199_v53 = vadd.f32 %v484_v31, %v241_v25  ;;  %v486_v28 = vpop.f32.mrb[6].mxu0  ;;  %v5202_v23 = vadd.f32 %v557_v24, %v5178_v44  ;;  %v559_v22 = vpop.f32.mrb[6].mxu1 }
 0x135   :  { %6868 = vst [vmem:[#allocation71_spill] sm:$0xff] %v5194_v17  ;;  %6869 = vst [vmem:[#allocation72_spill] sm:$0xff] %v5197_v27  ;;  %v5204_v19 = vadd.f32 %v486_v28, %v237_v0  ;;  %v488_v20 = vpop.f32.mrb[7].mxu0  ;;  %v5207_v32 = vadd.f32 %v559_v22, %v5170_v33  ;;  %v561_v29 = vpop.f32.mrb[7].mxu1 }
 0x136   :  { %6870 = vst [vmem:[#allocation73_spill] sm:$0xff] %v5199_v53  ;;  %6871 = vst [vmem:[#allocation74_spill] sm:$0xff] %v5202_v23  ;;  %v5209_v17 = vadd.f32 %v488_v20, %v241_v25  ;;  %v5212_v18 = vadd.f32 %v561_v29, %v5178_v44 }
 0x137   :  { %6872 = vst [vmem:[#allocation75_spill] sm:$0xff] %v5204_v19  ;;  %6873 = vst [vmem:[#allocation76_spill] sm:$0xff] %v5207_v32 }
 0x138   :  { %6874 = vst [vmem:[#allocation77_spill] sm:$0xff] %v5209_v17  ;;  %6875 = vst [vmem:[#allocation78_spill] sm:$0xff] %v5212_v18 }
 0x13a   :  { %v492_v27 = vpop.f32.mrb[8].mxu0  ;;  %v565_v31 = vpop.f32.mrb[8].mxu1 }
 0x13b   :  { %v5214_v53 = vadd.f32 %v492_v27, %v237_v0  ;;  %v494_v21 = vpop.f32.mrb[9].mxu0  ;;  %v5217_v24 = vadd.f32 %v565_v31, %v5170_v33  ;;  %v567_v28 = vpop.f32.mrb[9].mxu1 }
 0x13c   :  { %v5219_v19 = vadd.f32 %v494_v21, %v241_v25  ;;  %v496_v23 = vpop.f32.mrb[10].mxu0  ;;  %v5222_v22 = vadd.f32 %v567_v28, %v5178_v44  ;;  %v569_v20 = vpop.f32.mrb[10].mxu1 }
 0x13d   :  { %6876 = vst [vmem:[#allocation79_spill] sm:$0xff] %v5214_v53  ;;  %6877 = vst [vmem:[#allocation80_spill] sm:$0xff] %v5217_v24  ;;  %v5224_v17 = vadd.f32 %v496_v23, %v237_v0  ;;  %v498_v29 = vpop.f32.mrb[11].mxu0  ;;  %v5227_v18 = vadd.f32 %v569_v20, %v5170_v33  ;;  %v571_v27 = vpop.f32.mrb[11].mxu1 }
 0x13e   :  { %6878 = vst [vmem:[#allocation81_spill] sm:$0xff] %v5219_v19  ;;  %6879 = vst [vmem:[#allocation82_spill] sm:$0xff] %v5222_v22  ;;  %v5229_v53 = vadd.f32 %v498_v29, %v241_v25  ;;  %v5232_v31 = vadd.f32 %v571_v27, %v5178_v44 }
 0x13f   :  { %6880 = vst [vmem:[#allocation83_spill] sm:$0xff] %v5224_v17  ;;  %6881 = vst [vmem:[#allocation84_spill] sm:$0xff] %v5227_v18 }
 0x140   :  { %6882 = vst [vmem:[#allocation85_spill] sm:$0xff] %v5229_v53  ;;  %6883 = vst [vmem:[#allocation86_spill] sm:$0xff] %v5232_v31 }
 0x142   :  { %v502_v24 = vpop.f32.mrb[12].mxu0  ;;  %v575_v21 = vpop.f32.mrb[12].mxu1 }
 0x143   :  { %v5234_v19 = vadd.f32 %v502_v24, %v237_v0  ;;  %v504_v32 = vpop.f32.mrb[13].mxu0  ;;  %v5237_v28 = vadd.f32 %v575_v21, %v5170_v33  ;;  %v577_v23 = vpop.f32.mrb[13].mxu1 }
 0x144   :  { %v5239_v17 = vadd.f32 %v504_v32, %v241_v25  ;;  %v506_v22 = vpop.f32.mrb[14].mxu0  ;;  %v5242_v20 = vadd.f32 %v577_v23, %v5178_v44  ;;  %v579_v29 = vpop.f32.mrb[14].mxu1  ;;  %v473_v32 = vadd.f32 %v5172_v34, %v237_v0  ;;  %v475_v23 = vadd.f32 %v474_v62, %v241_v25 }
 0x145   :  { %6884 = vst [vmem:[#allocation87_spill] sm:$0xff] %v5234_v19  ;;  %6885 = vst [vmem:[#allocation88_spill] sm:$0xff] %v5237_v28  ;;  %v5244_v53 = vadd.f32 %v506_v22, %v237_v0  ;;  %v508_v27 = vpop.f32.mrb[15].mxu0  ;;  %v5247_v31 = vadd.f32 %v579_v29, %v5170_v33  ;;  %v581_v24 = vpop.f32.mrb[15].mxu1 }
 0x146   :  { %6886 = vst [vmem:[#allocation89_spill] sm:$0xff] %v5239_v17  ;;  %6887 = vst [vmem:[#allocation90_spill] sm:$0xff] %v5242_v20  ;;  %v5249_v19 = vadd.f32 %v508_v27, %v241_v25  ;;  %v5252_v21 = vadd.f32 %v581_v24, %v5178_v44  ;;  %v546_v17 = vadd.f32 %v5174_v30, %v5170_v33 }
 0x147   :  { %6888 = vst [vmem:[#allocation91_spill] sm:$0xff] %v5244_v53  ;;  %6889 = vst [vmem:[#allocation92_spill] sm:$0xff] %v5247_v31  ;;  %v548_v20 = vadd.f32 %v547_v26, %v5178_v44 }
 0x148   :  { %6890 = vst [vmem:[#allocation93_spill] sm:$0xff] %v5249_v19  ;;  %6891 = vst [vmem:[#allocation94_spill] sm:$0xff] %v5252_v21 }
 0x14a   :  { %v814_v22 = vpop.f32.mrb[16].mxu0  ;;  %v855_v53 = vpop.f32.mrb[16].mxu1 }
 0x14b   :  { %v862_v28 = vadd.f32 %v814_v22, %v473_v32  ;;  %v864_v18 = vadd.f32 %v855_v53, %v546_v17  ;;  %v816_v29 = vpop.f32.mrb[17].mxu0  ;;  %v857_v31 = vpop.f32.mrb[17].mxu1  ;;  %v6915_v32 = vld [vmem:[#allocation33_spill] sm:$0xff]  ;;  %v6917_v22 = vld [vmem:[#allocation35_spill] sm:$0xff] }
 0x14c   :  { %v863_v16 = vadd.f32 %v816_v29, %v475_v23  ;;  %v865_v27 = vadd.f32 %v857_v31, %v548_v20  ;;  %v818_v19 = vpop.f32.mrb[18].mxu0  ;;  %v859_v15 = vpop.f32.mrb[18].mxu1  ;;  %v6916_v23 = vld [vmem:[#allocation34_spill] sm:$0xff] }
 0x14d   :  { %v3753_v24 = vmul.f32 -1.442695, %v862_v28  ;;  %v819_v21 = vpop.f32.mrb[19].mxu0  ;;  %v860_v14 = vpop.f32.mrb[19].mxu1  ;;  %v170_v29 = vld [vmem:[%s6537_s6] sm:$0xf] }
 0x14e   :  { %v3754_v0 = vmul.f32 -1.442695, %v863_v16  ;;  %v3755_v33 = vmul.f32 -1.442695, %v865_v27  ;;  %v6918_v27 = vld [vmem:[#allocation66_spill] sm:$0xff] }
 0x14f   :  { %4115 = vpow2.f32 %v3753_v24  ;;  %v6919_v24 = vsub.s32 0, %v6918_v27 }
 0x150   :  { %4117 = vpow2.f32 %v3754_v0 }
 0x151   :  { %4119 = vpow2.f32 %v3755_v33  ;;  %v5334_v0 = vrot.slane %v170_v29, %v6919_v24 }
 0x152   :  { %4121 = vtanh.f32 %v864_v18  ;;  %v6914_v18 = vld [vmem:[#allocation32_spill] sm:$0xff] }
 0x159   :  { %v4116_v25 = vpop.eup %4115 }
 0x15a   :  { %v4118_v62 = vpop.eup %4117  ;;  %v869_v26 = vadd.f32 1.0, %v4116_v25 }
 0x15b   :  { %v875_v44 = vadd.f32 1.0, %v4118_v62  ;;  %v4120_v17 = vpop.eup %4119  ;;  %v6920_v62 = vsub.s32 1, %v6918_v27 }
 0x15c   :  { %4123 = vrcp.f32 %v869_v26  ;;  %v4122_v53 = vpop.eup %4121  ;;  %v882_v30 = vadd.f32 1.0, %v4120_v17 }
 0x15d   :  { %4125 = vrcp.f32 %v875_v44  ;;  %v5338_v26 = vrot.slane %v170_v29, %v6920_v62 }
 0x15e   :  { %4127 = vrcp.f32 %v882_v30 }
 0x166   :  { %v4124_v34 = vpop.eup %4123 }
 0x167   :  { %v4126_v19 = vpop.eup %4125  ;;  %v886_v15 = vmul.f32 %v4124_v34, %v4122_v53 }
 0x168   :  { %v885_v31 = vmul.f32 0.0, %v4126_v19  ;;  %v4128_v16 = vpop.eup %4127 }
 0x16a   :  { %v5258_v14 = vadd.f32 %v886_v15, %v885_v31 }
 0x16c   :  { %4129 = vtanh.f32 %v5258_v14 }
 0x176   :  { %v4130_v28 = vpop.eup %4129 }
 0x177   :  { %v889_v20 = vmul.f32 %v4130_v28, %v4128_v16 }
 0x179   :  { %v890_v21 = vpack.c.bf16 %v889_v20, %v889_v20 }
 0x17b   :  { %1326 = vmatmul.mubr.bf16.vlgmr.msra.gmra.mrb[24].mxu0 %v890_v21  ;;  %1367 = vmatmul.mubr.bf16.vlgmr.msra.gmra.mrb[24].mxu1 %v890_v21 }
 0x17c   :  { %1409 = vmatpush1.bf16.msra.mxu0 %v4848_v36  ;;  %1450 = vmatpush1.bf16.msra.mxu1 %v4850_v37  ;;  %v6892_v36 = vld [vmem:[#allocation10_spill] sm:$0xff]  ;;  %v6893_v37 = vld [vmem:[#allocation11_spill] sm:$0xff] }
 0x17d   :  { %1410 = vmatprep.subr.bf16.mxu0 %v4854_v38  ;;  %1451 = vmatprep.subr.bf16.mxu1 %v4856_v39  ;;  %v6894_v38 = vld [vmem:[#allocation12_spill] sm:$0xff]  ;;  %v6895_v39 = vld [vmem:[#allocation13_spill] sm:$0xff] }
 0x17e   :  { %1440 = vmatprep.mubr.bf16.mxu0 %v6832_v35  ;;  %1481 = vmatprep.mubr.bf16.mxu1 %v6832_v35 }
 0x180   :  { %1411 = vmatpush1.bf16.msra.mxu0 %v4858_v40  ;;  %1452 = vmatpush1.bf16.msra.mxu1 %v4862_v41  ;;  %v6896_v40 = vld [vmem:[#allocation14_spill] sm:$0xff]  ;;  %v6897_v41 = vld [vmem:[#allocation15_spill] sm:$0xff] }
 0x181   :  { %1412 = vmatprep.subr.bf16.mxu0 %v4866_v42  ;;  %1453 = vmatprep.subr.bf16.mxu1 %v4868_v43  ;;  %v6898_v42 = vld [vmem:[#allocation16_spill] sm:$0xff]  ;;  %v6899_v43 = vld [vmem:[#allocation17_spill] sm:$0xff] }
 0x184   :  { %1413 = vmatpush1.bf16.msra.mxu0 %v4875_v45  ;;  %1454 = vmatpush1.bf16.msra.mxu1 %v4877_v46  ;;  %v6900_v45 = vld [vmem:[#allocation18_spill] sm:$0xff]  ;;  %v6901_v46 = vld [vmem:[#allocation19_spill] sm:$0xff] }
 0x185   :  { %1414 = vmatprep.subr.bf16.mxu0 %v4881_v47  ;;  %1455 = vmatprep.subr.bf16.mxu1 %v4885_v48  ;;  %v6902_v47 = vld [vmem:[#allocation20_spill] sm:$0xff]  ;;  %v6903_v48 = vld [vmem:[#allocation21_spill] sm:$0xff] }
 0x188   :  { %1415 = vmatpush1.bf16.msra.mxu0 %v4887_v49  ;;  %1456 = vmatpush1.bf16.msra.mxu1 %v4889_v50  ;;  %v1085_v49 = vpop.f32.mrb[20].mxu0  ;;  %v6904_v50 = vld [vmem:[#allocation22_spill] sm:$0xff] }
 0x189   :  { %1416 = vmatprep.subr.bf16.mxu0 %v4893_v51  ;;  %1457 = vmatprep.subr.bf16.mxu1 %v4897_v52  ;;  %v6905_v51 = vld [vmem:[#allocation23_spill] sm:$0xff]  ;;  %v1087_v52 = vpop.f32.mrb[21].mxu0 }
 0x18c   :  { %1417 = vmatpush1.bf16.msra.mxu0 %v4904_v54  ;;  %1458 = vmatpush1.bf16.msra.mxu1 %v4906_v55  ;;  %v1089_v54 = vpop.f32.mrb[22].mxu0  ;;  %v1126_v55 = vpop.f32.mrb[20].mxu1 }
 0x18d   :  { %1418 = vmatprep.subr.bf16.mxu0 %v4908_v56  ;;  %1459 = vmatprep.subr.bf16.mxu1 %v4910_v57  ;;  %v1090_v56 = vpop.f32.mrb[23].mxu0  ;;  %v1128_v57 = vpop.f32.mrb[21].mxu1 }
 0x190   :  { %1419 = vmatpush1.bf16.msra.mxu0 %v4916_v58  ;;  %1460 = vmatpush1.bf16.msra.mxu1 %v4918_v59  ;;  %v6906_v58 = vld [vmem:[#allocation24_spill] sm:$0xff]  ;;  %v6907_v59 = vld [vmem:[#allocation25_spill] sm:$0xff] }
 0x191   :  { %1420 = vmatprep.subr.bf16.mxu0 %v4920_v60  ;;  %1461 = vmatprep.subr.bf16.mxu1 %v4922_v61  ;;  %v1130_v60 = vpop.f32.mrb[22].mxu1  ;;  %v6908_v61 = vld [vmem:[#allocation26_spill] sm:$0xff] }
 0x192   :  { %v6921_v60 = vsub.s32 3, %v6918_v27 }
 0x194   :  { %1421 = vmatpush1.bf16.msra.mxu0 %v4933_v63  ;;  %1462 = vmatpush1.bf16.msra.mxu1 %v4935_v1  ;;  %v6909_v63 = vld [vmem:[#allocation27_spill] sm:$0xff]  ;;  %v1131_v1 = vpop.f32.mrb[23].mxu1 }
 0x195   :  { %1422 = vmatprep.subr.bf16.mxu0 %v4937_v2  ;;  %1463 = vmatprep.subr.bf16.mxu1 %v4939_v3  ;;  %v6910_v2 = vld [vmem:[#allocation28_spill] sm:$0xff]  ;;  %v6911_v3 = vld [vmem:[#allocation29_spill] sm:$0xff]  ;;  %v5344_v1 = vrot.slane %v170_v29, %v6921_v60 }
 0x198   :  { %1423 = vmatpush1.bf16.msra.mxu0 %v4945_v4  ;;  %1464 = vmatpush1.bf16.msra.mxu1 %v4947_v5  ;;  %v6912_v4 = vld [vmem:[#allocation30_spill] sm:$0xff]  ;;  %v6913_v5 = vld [vmem:[#allocation31_spill] sm:$0xff] }
 0x199   :  { %1520 = vmatprep.subr.bf16.mxu0 %v4961_v6  ;;  %1561 = vmatprep.subr.bf16.mxu1 %v4963_v7 }
 0x19b   :  { %1441 = vmatmul.mubr.bf16.vlgmr.msra.gmra.mrb[28].mxu0 %v890_v21  ;;  %1482 = vmatmul.mubr.bf16.vlgmr.msra.gmra.mrb[28].mxu1 %v890_v21 }
 0x19c   :  { %1521 = vmatpush1.bf16.msra.mxu0 %v4965_v8  ;;  %1562 = vmatpush1.bf16.msra.mxu1 %v4968_v9 }
 0x19d   :  { %1522 = vmatprep.subr.bf16.mxu0 %v4973_v10  ;;  %1563 = vmatprep.subr.bf16.mxu1 %v4975_v11 }
 0x19e   :  { %1552 = vmatprep.mubr.bf16.mxu0 %v6832_v35  ;;  %1593 = vmatprep.mubr.bf16.mxu1 %v6832_v35 }
 0x1a0   :  { %1523 = vmatpush1.bf16.msra.mxu0 %v4977_v12  ;;  %1564 = vmatpush1.bf16.msra.mxu1 %v4980_v13 }
 0x1a1   :  { %1524 = vmatprep.subr.bf16.mxu0 %v6892_v36  ;;  %1565 = vmatprep.subr.bf16.mxu1 %v6893_v37 }
 0x1a4   :  { %1525 = vmatpush1.bf16.msra.mxu0 %v6894_v38  ;;  %1566 = vmatpush1.bf16.msra.mxu1 %v6895_v39 }
 0x1a5   :  { %1526 = vmatprep.subr.bf16.mxu0 %v6896_v40  ;;  %1567 = vmatprep.subr.bf16.mxu1 %v6897_v41 }
 0x1a8   :  { %1527 = vmatpush1.bf16.msra.mxu0 %v6898_v42  ;;  %1568 = vmatpush1.bf16.msra.mxu1 %v6899_v43 }
 0x1a9   :  { %1528 = vmatprep.subr.bf16.mxu0 %v6900_v45  ;;  %1569 = vmatprep.subr.bf16.mxu1 %v6901_v46 }
 0x1ac   :  { %1529 = vmatpush1.bf16.msra.mxu0 %v6902_v47  ;;  %1570 = vmatpush1.bf16.msra.mxu1 %v6903_v48 }
 0x1ad   :  { %1530 = vmatprep.subr.bf16.mxu0 %v6904_v50  ;;  %1571 = vmatprep.subr.bf16.mxu1 %v6905_v51 }
 0x1b0   :  { %1531 = vmatpush1.bf16.msra.mxu0 %v6906_v58  ;;  %1572 = vmatpush1.bf16.msra.mxu1 %v6907_v59 }
 0x1b1   :  { %1532 = vmatprep.subr.bf16.mxu0 %v6908_v61  ;;  %1573 = vmatprep.subr.bf16.mxu1 %v6909_v63 }
 0x1b4   :  { %1533 = vmatpush1.bf16.msra.mxu0 %v6910_v2  ;;  %1574 = vmatpush1.bf16.msra.mxu1 %v6911_v3 }
 0x1b5   :  { %1534 = vmatprep.subr.bf16.mxu0 %v6912_v4  ;;  %1575 = vmatprep.subr.bf16.mxu1 %v6913_v5 }
 0x1b8   :  { %1535 = vmatpush1.bf16.msra.mxu0 %v6914_v18  ;;  %1576 = vmatpush1.bf16.msra.mxu1 %v6915_v32 }
 0x1b9   :  { %1602 = vmatprep.subr.bf16.mxu0 %v6916_v23  ;;  %1643 = vmatprep.subr.bf16.mxu1 %v6917_v22 }
 0x24e   :  { %v1327_v33 = vpop.f32.mrb[24].mxu0  ;;  %v1368_v25 = vpop.f32.mrb[24].mxu1 }
 0x24f   :  { %v1328_v44 = vadd.f32 %v1327_v33, %v1085_v49  ;;  %v1369_v17 = vadd.f32 %v1368_v25, %v1126_v55  ;;  %v1329_v53 = vpop.f32.mrb[25].mxu0  ;;  %v1370_v34 = vpop.f32.mrb[25].mxu1 }
 0x250   :  { %v1330_v19 = vadd.f32 %v1329_v53, %v1087_v52  ;;  %v1371_v15 = vadd.f32 %v1370_v34, %v1128_v57  ;;  %v1331_v30 = vpop.f32.mrb[26].mxu0  ;;  %v1372_v31 = vpop.f32.mrb[26].mxu1  ;;  %v6922_v52 = vsub.s32 2, %v6918_v27 }
 0x251   :  { %v1375_v16 = vadd.f32 %v1328_v44, %v5334_v0  ;;  %v1332_v28 = vpop.f32.mrb[27].mxu0  ;;  %v1373_v20 = vpop.f32.mrb[27].mxu1 }
 0x252   :  { %v1376_v21 = vadd.f32 %v1330_v19, %v5338_v26  ;;  %v1378_v49 = vadd.f32 %v1371_v15, %v5344_v1  ;;  %v5349_v55 = vrot.slane %v170_v29, %v6922_v52  ;;  %v6923_v28 = vld [vmem:[#allocation67_spill] sm:$0xff] }
 0x253   :  { %v3820_v54 = vmul.f32 -1.442695, %v1375_v16 }
 0x254   :  { %v3821_v56 = vmul.f32 -1.442695, %v1376_v21  ;;  %v3822_v57 = vmul.f32 -1.442695, %v1378_v49  ;;  %v1377_v24 = vadd.f32 %v1369_v17, %v5349_v55  ;;  %v6924_v17 = vld [vmem:[#allocation68_spill] sm:$0xff]  ;;  %v6925_v49 = vld [vmem:[#allocation69_spill] sm:$0xff] }
 0x255   :  { %4131 = vpow2.f32 %v3820_v54 }
 0x256   :  { %4133 = vpow2.f32 %v3821_v56 }
 0x257   :  { %4135 = vpow2.f32 %v3822_v57  ;;  %v6926_v57 = vld [vmem:[#allocation70_spill] sm:$0xff] }
 0x258   :  { %4137 = vtanh.f32 %v1377_v24 }
 0x25f   :  { %v4132_v33 = vpop.eup %4131 }
 0x260   :  { %v4134_v25 = vpop.eup %4133  ;;  %v1382_v62 = vadd.f32 1.0, %v4132_v33 }
 0x261   :  { %v1388_v44 = vadd.f32 1.0, %v4134_v25  ;;  %v4136_v53 = vpop.eup %4135 }
 0x262   :  { %4139 = vrcp.f32 %v1382_v62  ;;  %v4138_v34 = vpop.eup %4137  ;;  %v1395_v31 = vadd.f32 1.0, %v4136_v53 }
 0x263   :  { %4141 = vrcp.f32 %v1388_v44 }
 0x264   :  { %4143 = vrcp.f32 %v1395_v31  ;;  %v6927_v31 = vld [vmem:[#allocation36_spill] sm:$0xff] }
 0x26c   :  { %v4140_v19 = vpop.eup %4139 }
 0x26d   :  { %v4142_v30 = vpop.eup %4141  ;;  %v1399_v15 = vmul.f32 %v4140_v19, %v4138_v34 }
 0x26e   :  { %v1398_v27 = vmul.f32 0.0, %v4142_v30  ;;  %v1442_v29 = vpop.f32.mrb[28].mxu0  ;;  %v1483_v16 = vpop.f32.mrb[28].mxu1 }
 0x26f   :  { %v1490_v20 = vadd.f32 %v1442_v29, %v6923_v28  ;;  %v1492_v21 = vadd.f32 %v1483_v16, %v6924_v17  ;;  %v1444_v54 = vpop.f32.mrb[29].mxu0  ;;  %v1485_v56 = vpop.f32.mrb[29].mxu1 }
 0x270   :  { %v5354_v60 = vadd.f32 %v1399_v15, %v1398_v27  ;;  %v1491_v52 = vadd.f32 %v1444_v54, %v6925_v49  ;;  %v1493_v24 = vadd.f32 %v1485_v56, %v6926_v57  ;;  %v1446_v33 = vpop.f32.mrb[30].mxu0  ;;  %v1487_v25 = vpop.f32.mrb[30].mxu1  ;;  %v6929_v56 = vld [vmem:[#allocation38_spill] sm:$0xff]  ;;  %v6930_v49 = vld [vmem:[#allocation39_spill] sm:$0xff] }
 0x271   :  { %v3823_v62 = vmul.f32 -1.442695, %v1490_v20  ;;  %v1447_v44 = vpop.f32.mrb[31].mxu0  ;;  %v1488_v53 = vpop.f32.mrb[31].mxu1  ;;  %v6928_v20 = vld [vmem:[#allocation37_spill] sm:$0xff]  ;;  %v6933_v57 = vld [vmem:[#allocation42_spill] sm:$0xff] }
 0x272   :  { %4145 = vtanh.f32 %v5354_v60  ;;  %v3824_v34 = vmul.f32 -1.442695, %v1491_v52  ;;  %v3825_v19 = vmul.f32 -1.442695, %v1493_v24  ;;  %v4144_v30 = vpop.eup %4143  ;;  %v6931_v52 = vld [vmem:[#allocation40_spill] sm:$0xff]  ;;  %v6934_v24 = vld [vmem:[#allocation43_spill] sm:$0xff] }
 0x273   :  { %4147 = vpow2.f32 %v3823_v62  ;;  %v6935_v44 = vld [vmem:[#allocation44_spill] sm:$0xff]  ;;  %v6936_v53 = vld [vmem:[#allocation45_spill] sm:$0xff] }
 0x274   :  { %4149 = vpow2.f32 %v3824_v34 }
 0x275   :  { %4151 = vpow2.f32 %v3825_v19 }
 0x276   :  { %4153 = vtanh.f32 %v1492_v21  ;;  %v6932_v21 = vld [vmem:[#allocation41_spill] sm:$0xff] }
 0x27c   :  { %v4146_v29 = vpop.eup %4145 }
 0x27d   :  { %v4148_v15 = vpop.eup %4147  ;;  %v1402_v27 = vmul.f32 %v4146_v29, %v4144_v30  ;;  %v6937_v29 = vld [vmem:[#allocation46_spill] sm:$0xff] }
 0x27e   :  { %v4150_v16 = vpop.eup %4149  ;;  %v1497_v28 = vadd.f32 1.0, %v4148_v15  ;;  %v6938_v15 = vld [vmem:[#allocation47_spill] sm:$0xff] }
 0x27f   :  { %v1503_v17 = vadd.f32 1.0, %v4150_v16  ;;  %v1519_v54 = vpack.c.bf16 %v1402_v27, %v1402_v27  ;;  %v4152_v33 = vpop.eup %4151 }
 0x280   :  { %4155 = vrcp.f32 %v1497_v28  ;;  %v4154_v25 = vpop.eup %4153  ;;  %v1510_v30 = vadd.f32 1.0, %v4152_v33  ;;  %v6939_v28 = vld [vmem:[#allocation48_spill] sm:$0xff] }
 0x281   :  { %4157 = vrcp.f32 %v1503_v17  ;;  %1553 = vmatmul.mubr.bf16.vlgmr.msra.gmra.mrb[32].mxu0 %v1519_v54  ;;  %1594 = vmatmul.mubr.bf16.vlgmr.msra.gmra.mrb[32].mxu1 %v1519_v54  ;;  %v6940_v17 = vld [vmem:[#allocation49_spill] sm:$0xff]  ;;  %v6941_v54 = vld [vmem:[#allocation50_spill] sm:$0xff] }
 0x282   :  { %1603 = vmatpush1.bf16.msra.mxu0 %v6927_v31  ;;  %1644 = vmatpush1.bf16.msra.mxu1 %v6928_v20  ;;  %4159 = vrcp.f32 %v1510_v30  ;;  %v6942_v31 = vld [vmem:[#allocation51_spill] sm:$0xff]  ;;  %v6943_v20 = vld [vmem:[#allocation52_spill] sm:$0xff] }
 0x283   :  { %1604 = vmatprep.subr.bf16.mxu0 %v6929_v56  ;;  %1645 = vmatprep.subr.bf16.mxu1 %v6930_v49  ;;  %v6944_v56 = vld [vmem:[#allocation53_spill] sm:$0xff]  ;;  %v6945_v49 = vld [vmem:[#allocation54_spill] sm:$0xff]  ;;  %v6955_v30 = vld [vmem:[#allocation64_spill] sm:$0xff] }
 0x284   :  { %1634 = vmatprep.mubr.bf16.mxu0 %v6832_v35  ;;  %1675 = vmatprep.mubr.bf16.mxu1 %v6832_v35 }
 0x286   :  { %1605 = vmatpush1.bf16.msra.mxu0 %v6931_v52  ;;  %1646 = vmatpush1.bf16.msra.mxu1 %v6932_v21  ;;  %v6947_v52 = vld [vmem:[#allocation56_spill] sm:$0xff]  ;;  %v6948_v21 = vld [vmem:[#allocation57_spill] sm:$0xff] }
 0x287   :  { %1606 = vmatprep.subr.bf16.mxu0 %v6933_v57  ;;  %1647 = vmatprep.subr.bf16.mxu1 %v6934_v24  ;;  %v6949_v57 = vld [vmem:[#allocation58_spill] sm:$0xff]  ;;  %v6950_v24 = vld [vmem:[#allocation59_spill] sm:$0xff] }
 0x28a   :  { %v4156_v62 = vpop.eup %4155  ;;  %1607 = vmatpush1.bf16.msra.mxu0 %v6935_v44  ;;  %1648 = vmatpush1.bf16.msra.mxu1 %v6936_v53  ;;  %v6952_v44 = vld [vmem:[#allocation61_spill] sm:$0xff]  ;;  %v6953_v53 = vld [vmem:[#allocation62_spill] sm:$0xff] }
 0x28b   :  { %v4158_v34 = vpop.eup %4157  ;;  %v1514_v19 = vmul.f32 %v4156_v62, %v4154_v25  ;;  %1608 = vmatprep.subr.bf16.mxu0 %v6937_v29  ;;  %1649 = vmatprep.subr.bf16.mxu1 %v6938_v15  ;;  %v6951_v62 = vld [vmem:[#allocation60_spill] sm:$0xff]  ;;  %v6956_v29 = vld [vmem:[#allocation65_spill] sm:$0xff] }
 0x28c   :  { %v1513_v27 = vmul.f32 %v4158_v34, %v5258_v14  ;;  %v6946_v14 = vld [vmem:[#allocation55_spill] sm:$0xff]  ;;  %v4160_v33 = vpop.eup %4159 }
 0x28d   :  { %v6954_v34 = vld [vmem:[#allocation63_spill] sm:$0xff] }
 0x28e   :  { %v5374_v16 = vadd.f32 %v1514_v19, %v1513_v27  ;;  %1609 = vmatpush1.bf16.msra.mxu0 %v6939_v28  ;;  %1650 = vmatpush1.bf16.msra.mxu1 %v6940_v17  ;;  %v5397_v27 = vld [vmem:[#allocation3 + $0x4] ss:$16 sps:$4 sm:$0xff]   ;;  %v5400_v28 = vld [vmem:[#allocation3 + $0xc] ss:$16 sps:$4 sm:$0xff]   ;;  %v5405_v17 = vld [vmem:[#allocation3] ss:$16 sps:$4 sm:$0xff]  }
 0x28f   :  { %1610 = vmatprep.subr.bf16.mxu0 %v6941_v54  ;;  %1651 = vmatprep.subr.bf16.mxu1 %v6942_v31  ;;  %v5408_v54 = vld [vmem:[#allocation3 + $0x8] ss:$16 sps:$4 sm:$0xff]   ;;  %v5411_v31 = vld [vmem:[#allocation3 + $0x24] ss:$16 sps:$4 sm:$0xff]  }
 0x290   :  { %4161 = vtanh.f32 %v5374_v16 }
 0x292   :  { %1611 = vmatpush1.bf16.msra.mxu0 %v6943_v20  ;;  %1652 = vmatpush1.bf16.msra.mxu1 %v6944_v56  ;;  %v5414_v20 = vld [vmem:[#allocation3 + $0x2c] ss:$16 sps:$4 sm:$0xff]   ;;  %v5419_v56 = vld [vmem:[#allocation3 + $0x20] ss:$16 sps:$4 sm:$0xff]  }
 0x293   :  { %1612 = vmatprep.subr.bf16.mxu0 %v6945_v49  ;;  %1653 = vmatprep.subr.bf16.mxu1 %v6946_v14  ;;  %6957 = vst [vmem:[#allocation10_spill] sm:$0xff] %v5414_v20  ;;  %6958 = vst [vmem:[#allocation11_spill] sm:$0xff] %v5419_v56  ;;  %v5422_v49 = vld [vmem:[#allocation3 + $0x28] ss:$16 sps:$4 sm:$0xff]   ;;  %v5425_v14 = vld [vmem:[#allocation3 + $0x44] ss:$16 sps:$4 sm:$0xff]  }
 0x294   :  { %6959 = vst [vmem:[#allocation12_spill] sm:$0xff] %v5422_v49  ;;  %6960 = vst [vmem:[#allocation13_spill] sm:$0xff] %v5425_v14 }
 0x296   :  { %1613 = vmatpush1.bf16.msra.mxu0 %v6947_v52  ;;  %1654 = vmatpush1.bf16.msra.mxu1 %v6948_v21  ;;  %v5428_v52 = vld [vmem:[#allocation3 + $0x4c] ss:$16 sps:$4 sm:$0xff]   ;;  %v5431_v21 = vld [vmem:[#allocation3 + $0x40] ss:$16 sps:$4 sm:$0xff]  }
 0x297   :  { %1614 = vmatprep.subr.bf16.mxu0 %v6949_v57  ;;  %1655 = vmatprep.subr.bf16.mxu1 %v6950_v24  ;;  %6961 = vst [vmem:[#allocation14_spill] sm:$0xff] %v5428_v52  ;;  %6962 = vst [vmem:[#allocation15_spill] sm:$0xff] %v5431_v21  ;;  %v5434_v57 = vld [vmem:[#allocation3 + $0x48] ss:$16 sps:$4 sm:$0xff]   ;;  %v5437_v24 = vld [vmem:[#allocation3 + $0x64] ss:$16 sps:$4 sm:$0xff]  }
 0x298   :  { %6963 = vst [vmem:[#allocation16_spill] sm:$0xff] %v5434_v57  ;;  %6964 = vst [vmem:[#allocation17_spill] sm:$0xff] %v5437_v24 }
 0x29a   :  { %v4162_v25 = vpop.eup %4161  ;;  %1615 = vmatpush1.bf16.msra.mxu0 %v6951_v62  ;;  %1656 = vmatpush1.bf16.msra.mxu1 %v6952_v44  ;;  %v5446_v62 = vld [vmem:[#allocation3 + $0x68] ss:$16 sps:$4 sm:$0xff]   ;;  %v5449_v44 = vld [vmem:[#allocation3 + $0x84] ss:$16 sps:$4 sm:$0xff]  }
 0x29b   :  { %1616 = vmatprep.subr.bf16.mxu0 %v6953_v53  ;;  %1657 = vmatprep.subr.bf16.mxu1 %v6954_v34  ;;  %v1517_v19 = vmul.f32 %v4162_v25, %v4160_v33  ;;  %v5440_v33 = vld [vmem:[#allocation3 + $0x6c] ss:$16 sps:$4 sm:$0xff]   ;;  %v5443_v25 = vld [vmem:[#allocation3 + $0x60] ss:$16 sps:$4 sm:$0xff]   ;;  %6967 = vst [vmem:[#allocation20_spill] sm:$0xff] %v5446_v62  ;;  %6968 = vst [vmem:[#allocation21_spill] sm:$0xff] %v5449_v44 }
 0x29c   :  { %6965 = vst [vmem:[#allocation18_spill] sm:$0xff] %v5440_v33  ;;  %6966 = vst [vmem:[#allocation19_spill] sm:$0xff] %v5443_v25  ;;  %v5452_v53 = vld [vmem:[#allocation3 + $0x8c] ss:$16 sps:$4 sm:$0xff]   ;;  %v5455_v34 = vld [vmem:[#allocation3 + $0x80] ss:$16 sps:$4 sm:$0xff]  }
 0x29d   :  { %v5395_v15 = vpack.c.bf16 %v1517_v19, %v1517_v19  ;;  %6969 = vst [vmem:[#allocation22_spill] sm:$0xff] %v5452_v53  ;;  %6970 = vst [vmem:[#allocation23_spill] sm:$0xff] %v5455_v34  ;;  %v5458_v19 = vld [vmem:[#allocation3 + $0x88] ss:$16 sps:$4 sm:$0xff]  }
 0x29e   :  { %1617 = vmatpush1.bf16.msra.mxu0 %v6955_v30  ;;  %1658 = vmatpush1.bf16.msra.mxu1 %v6956_v29  ;;  %6971 = vst [vmem:[#allocation24_spill] sm:$0xff] %v5458_v19  ;;  %v5461_v30 = vld [vmem:[#allocation3 + $0xa4] ss:$16 sps:$4 sm:$0xff]   ;;  %v5464_v29 = vld [vmem:[#allocation3 + $0xac] ss:$16 sps:$4 sm:$0xff]  }
 0x29f   :  { %1717 = vmatprep.subr.bf16.mxu0 %v5397_v27  ;;  %1758 = vmatprep.subr.bf16.mxu1 %v5400_v28  ;;  %6972 = vst [vmem:[#allocation25_spill] sm:$0xff] %v5461_v30  ;;  %6973 = vst [vmem:[#allocation26_spill] sm:$0xff] %v5464_v29 }
 0x2a1   :  { %1635 = vmatmul.mubr.bf16.vlgmr.msra.gmra.mrb[36].mxu0 %v5395_v15  ;;  %1676 = vmatmul.mubr.bf16.vlgmr.msra.gmra.mrb[36].mxu1 %v5395_v15 }
 0x2a2   :  { %1718 = vmatpush1.bf16.msra.mxu0 %v5405_v17  ;;  %1759 = vmatpush1.bf16.msra.mxu1 %v5408_v54 }
 0x2a3   :  { %1719 = vmatprep.subr.bf16.mxu0 %v5411_v31  ;;  %1760 = vmatprep.subr.bf16.mxu1 %v5414_v20 }
 0x2a4   :  { %1749 = vmatprep.mubr.bf16.mxu0 %v6832_v35  ;;  %1790 = vmatprep.mubr.bf16.mxu1 %v6832_v35 }
 0x2a6   :  { %1720 = vmatpush1.bf16.msra.mxu0 %v5419_v56  ;;  %1761 = vmatpush1.bf16.msra.mxu1 %v5422_v49 }
 0x2a7   :  { %1721 = vmatprep.subr.bf16.mxu0 %v5425_v14  ;;  %1762 = vmatprep.subr.bf16.mxu1 %v5428_v52 }
 0x2aa   :  { %1722 = vmatpush1.bf16.msra.mxu0 %v5431_v21  ;;  %1763 = vmatpush1.bf16.msra.mxu1 %v5434_v57 }
 0x2ab   :  { %1723 = vmatprep.subr.bf16.mxu0 %v5437_v24  ;;  %1764 = vmatprep.subr.bf16.mxu1 %v5440_v33 }
 0x2ae   :  { %1724 = vmatpush1.bf16.msra.mxu0 %v5443_v25  ;;  %1765 = vmatpush1.bf16.msra.mxu1 %v5446_v62 }
 0x2af   :  { %1725 = vmatprep.subr.bf16.mxu0 %v5449_v44  ;;  %1766 = vmatprep.subr.bf16.mxu1 %v5452_v53  ;;  %v5467_v44 = vld [vmem:[#allocation3 + $0xa0] ss:$16 sps:$4 sm:$0xff]   ;;  %v5470_v53 = vld [vmem:[#allocation3 + $0xa8] ss:$16 sps:$4 sm:$0xff]  }
 0x2b0   :  { %6974 = vst [vmem:[#allocation27_spill] sm:$0xff] %v5467_v44  ;;  %6975 = vst [vmem:[#allocation28_spill] sm:$0xff] %v5470_v53 }
 0x2b2   :  { %1726 = vmatpush1.bf16.msra.mxu0 %v5455_v34  ;;  %1767 = vmatpush1.bf16.msra.mxu1 %v5458_v19  ;;  %v5473_v34 = vld [vmem:[#allocation3 + $0xc4] ss:$16 sps:$4 sm:$0xff]   ;;  %v5476_v19 = vld [vmem:[#allocation3 + $0xcc] ss:$16 sps:$4 sm:$0xff]  }
 0x2b3   :  { %1727 = vmatprep.subr.bf16.mxu0 %v5461_v30  ;;  %1768 = vmatprep.subr.bf16.mxu1 %v5464_v29  ;;  %6976 = vst [vmem:[#allocation29_spill] sm:$0xff] %v5473_v34  ;;  %6977 = vst [vmem:[#allocation30_spill] sm:$0xff] %v5476_v19  ;;  %v5479_v30 = vld [vmem:[#allocation3 + $0xc0] ss:$16 sps:$4 sm:$0xff]   ;;  %v5482_v29 = vld [vmem:[#allocation3 + $0xc8] ss:$16 sps:$4 sm:$0xff]  }
 0x2b4   :  { %6978 = vst [vmem:[#allocation31_spill] sm:$0xff] %v5479_v30  ;;  %6979 = vst [vmem:[#allocation32_spill] sm:$0xff] %v5482_v29 }
 0x2b6   :  { %1728 = vmatpush1.bf16.msra.mxu0 %v5467_v44  ;;  %1769 = vmatpush1.bf16.msra.mxu1 %v5470_v53  ;;  %v5485_v44 = vld [vmem:[#allocation3 + $0xe4] ss:$16 sps:$4 sm:$0xff]   ;;  %v5488_v53 = vld [vmem:[#allocation3 + $0xec] ss:$16 sps:$4 sm:$0xff]  }
 0x2b7   :  { %1729 = vmatprep.subr.bf16.mxu0 %v5473_v34  ;;  %1770 = vmatprep.subr.bf16.mxu1 %v5476_v19  ;;  %6980 = vst [vmem:[#allocation33_spill] sm:$0xff] %v5485_v44  ;;  %6981 = vst [vmem:[#allocation34_spill] sm:$0xff] %v5488_v53  ;;  %v5491_v34 = vld [vmem:[#allocation3 + $0xe0] ss:$16 sps:$4 sm:$0xff]   ;;  %v5494_v19 = vld [vmem:[#allocation3 + $0xe8] ss:$16 sps:$4 sm:$0xff]  }
 0x2b8   :  { %6982 = vst [vmem:[#allocation35_spill] sm:$0xff] %v5491_v34  ;;  %6983 = vst [vmem:[#allocation66_spill] sm:$0xff] %v5494_v19 }
 0x2ba   :  { %1730 = vmatpush1.bf16.msra.mxu0 %v5479_v30  ;;  %1771 = vmatpush1.bf16.msra.mxu1 %v5482_v29 }
 0x2bb   :  { %1731 = vmatprep.subr.bf16.mxu0 %v5485_v44  ;;  %1772 = vmatprep.subr.bf16.mxu1 %v5488_v53 }
 0x2be   :  { %1732 = vmatpush1.bf16.msra.mxu0 %v5491_v34  ;;  %1773 = vmatpush1.bf16.msra.mxu1 %v5494_v19 }
 0x2bf   :  { %1829 = vmatprep.subr.bf16.mxu0 %v4961_v6  ;;  %1870 = vmatprep.subr.bf16.mxu1 %v4963_v7 }
 0x2c1   :  { %1750 = vmatmul.mubr.bf16.vlgmr.msra.gmra.mrb[40].mxu0 %v5395_v15  ;;  %1791 = vmatmul.mubr.bf16.vlgmr.msra.gmra.mrb[40].mxu1 %v5395_v15 }
 0x2c2   :  { %1830 = vmatpush1.bf16.msra.mxu0 %v4965_v8  ;;  %1871 = vmatpush1.bf16.msra.mxu1 %v4968_v9 }
 0x2c3   :  { %1831 = vmatprep.subr.bf16.mxu0 %v4973_v10  ;;  %1872 = vmatprep.subr.bf16.mxu1 %v4975_v11 }
 0x2c4   :  { %1861 = vmatprep.mubr.bf16.mxu0 %v6832_v35  ;;  %1902 = vmatprep.mubr.bf16.mxu1 %v6832_v35 }
 0x2c6   :  { %1832 = vmatpush1.bf16.msra.mxu0 %v4977_v12  ;;  %1873 = vmatpush1.bf16.msra.mxu1 %v4980_v13 }
 0x2c7   :  { %1833 = vmatprep.subr.bf16.mxu0 %v6892_v36  ;;  %1874 = vmatprep.subr.bf16.mxu1 %v6893_v37 }
 0x2ca   :  { %1834 = vmatpush1.bf16.msra.mxu0 %v6894_v38  ;;  %1875 = vmatpush1.bf16.msra.mxu1 %v6895_v39 }
 0x2cb   :  { %1835 = vmatprep.subr.bf16.mxu0 %v6896_v40  ;;  %1876 = vmatprep.subr.bf16.mxu1 %v6897_v41 }
 0x2ce   :  { %1836 = vmatpush1.bf16.msra.mxu0 %v6898_v42  ;;  %1877 = vmatpush1.bf16.msra.mxu1 %v6899_v43 }
 0x2cf   :  { %1837 = vmatprep.subr.bf16.mxu0 %v6900_v45  ;;  %1878 = vmatprep.subr.bf16.mxu1 %v6901_v46 }
 0x2d2   :  { %1838 = vmatpush1.bf16.msra.mxu0 %v6902_v47  ;;  %1879 = vmatpush1.bf16.msra.mxu1 %v6903_v48 }
 0x2d3   :  { %1839 = vmatprep.subr.bf16.mxu0 %v6904_v50  ;;  %1880 = vmatprep.subr.bf16.mxu1 %v6905_v51 }
 0x2d6   :  { %1840 = vmatpush1.bf16.msra.mxu0 %v6906_v58  ;;  %1881 = vmatpush1.bf16.msra.mxu1 %v6907_v59 }
 0x2d7   :  { %1841 = vmatprep.subr.bf16.mxu0 %v6908_v61  ;;  %1882 = vmatprep.subr.bf16.mxu1 %v6909_v63 }
 0x2da   :  { %1842 = vmatpush1.bf16.msra.mxu0 %v6910_v2  ;;  %1883 = vmatpush1.bf16.msra.mxu1 %v6911_v3 }
 0x2db   :  { %1843 = vmatprep.subr.bf16.mxu0 %v6912_v4  ;;  %1884 = vmatprep.subr.bf16.mxu1 %v6913_v5 }
 0x2de   :  { %1844 = vmatpush1.bf16.msra.mxu0 %v6914_v18  ;;  %1885 = vmatpush1.bf16.msra.mxu1 %v6915_v32 }
 0x2df   :  { %1911 = vmatprep.subr.bf16.mxu0 %v6916_v23  ;;  %1952 = vmatprep.subr.bf16.mxu1 %v6917_v22 }
 0x354   :  { %v1554_v6 = vpop.f32.mrb[32].mxu0  ;;  %v1595_v7 = vpop.f32.mrb[32].mxu1 }
 0x355   :  { %v1556_v8 = vpop.f32.mrb[33].mxu0  ;;  %v1597_v9 = vpop.f32.mrb[33].mxu1 }
 0x356   :  { %v1558_v10 = vpop.f32.mrb[34].mxu0  ;;  %v1599_v11 = vpop.f32.mrb[34].mxu1 }
 0x357   :  { %v1559_v12 = vpop.f32.mrb[35].mxu0  ;;  %v1600_v13 = vpop.f32.mrb[35].mxu1  ;;  %v6984_v11 = vld [vmem:[#allocation71_spill] sm:$0xff] }
 0x358   :  { %v6985_v13 = vld [vmem:[#allocation72_spill] sm:$0xff] }
 0x374   :  { %v1636_v36 = vpop.f32.mrb[36].mxu0  ;;  %v1677_v37 = vpop.f32.mrb[36].mxu1 }
 0x375   :  { %v1637_v38 = vadd.f32 %v1636_v36, %v1554_v6  ;;  %v1678_v39 = vadd.f32 %v1677_v37, %v1595_v7  ;;  %v1638_v40 = vpop.f32.mrb[37].mxu0  ;;  %v1679_v41 = vpop.f32.mrb[37].mxu1 }
 0x376   :  { %v1639_v42 = vadd.f32 %v1638_v40, %v1556_v8  ;;  %v1680_v43 = vadd.f32 %v1679_v41, %v1597_v9  ;;  %v1640_v45 = vpop.f32.mrb[38].mxu0  ;;  %v1681_v46 = vpop.f32.mrb[38].mxu1  ;;  %v6986_v40 = vld [vmem:[#allocation73_spill] sm:$0xff] }
 0x377   :  { %v1684_v47 = vadd.f32 %v1637_v38, %v5334_v0  ;;  %v1641_v48 = vpop.f32.mrb[39].mxu0  ;;  %v1682_v50 = vpop.f32.mrb[39].mxu1  ;;  %v1686_v2 = vadd.f32 %v1678_v39, %v5349_v55 }
 0x378   :  { %v1685_v51 = vadd.f32 %v1639_v42, %v5338_v26  ;;  %v1687_v61 = vadd.f32 %v1680_v43, %v5344_v1  ;;  %v6987_v42 = vld [vmem:[#allocation74_spill] sm:$0xff] }
 0x379   :  { %v3826_v58 = vmul.f32 -1.442695, %v1684_v47 }
 0x37a   :  { %v3827_v59 = vmul.f32 -1.442695, %v1685_v51  ;;  %v3828_v63 = vmul.f32 -1.442695, %v1687_v61 }
 0x37b   :  { %4163 = vpow2.f32 %v3826_v58 }
 0x37c   :  { %4165 = vpow2.f32 %v3827_v59 }
 0x37d   :  { %4167 = vpow2.f32 %v3828_v63 }
 0x37e   :  { %4169 = vtanh.f32 %v1686_v2 }
 0x385   :  { %v4164_v3 = vpop.eup %4163 }
 0x386   :  { %v4166_v4 = vpop.eup %4165  ;;  %v1691_v5 = vadd.f32 1.0, %v4164_v3 }
 0x387   :  { %v1697_v18 = vadd.f32 1.0, %v4166_v4  ;;  %v4168_v32 = vpop.eup %4167 }
 0x388   :  { %4171 = vrcp.f32 %v1691_v5  ;;  %v4170_v23 = vpop.eup %4169  ;;  %v1704_v7 = vadd.f32 1.0, %v4168_v32  ;;  %v5550_v32 = vld [vmem:[#allocation5 + $0x8] ss:$16 sps:$4 sm:$0xff]  }
 0x389   :  { %4173 = vrcp.f32 %v1697_v18  ;;  %v5547_v18 = vld [vmem:[#allocation5] ss:$16 sps:$4 sm:$0xff]  }
 0x38a   :  { %4175 = vrcp.f32 %v1704_v7  ;;  %v5567_v7 = vld [vmem:[#allocation5 + $0x44] ss:$16 sps:$4 sm:$0xff]  }
 0x392   :  { %v4172_v22 = vpop.eup %4171 }
 0x393   :  { %v4174_v15 = vpop.eup %4173  ;;  %v1708_v6 = vmul.f32 %v4172_v22, %v4170_v23  ;;  %v5553_v23 = vld [vmem:[#allocation5 + $0x24] ss:$16 sps:$4 sm:$0xff]   ;;  %v5556_v22 = vld [vmem:[#allocation5 + $0x2c] ss:$16 sps:$4 sm:$0xff]  }
 0x394   :  { %v1707_v8 = vmul.f32 %v4174_v15, %v5354_v60  ;;  %v1751_v9 = vpop.f32.mrb[40].mxu0  ;;  %v1792_v10 = vpop.f32.mrb[40].mxu1  ;;  %v5561_v15 = vld [vmem:[#allocation5 + $0x20] ss:$16 sps:$4 sm:$0xff]  }
 0x395   :  { %v1799_v12 = vadd.f32 %v1751_v9, %v6984_v11  ;;  %v1801_v36 = vadd.f32 %v1792_v10, %v6985_v13  ;;  %v1753_v37 = vpop.f32.mrb[41].mxu0  ;;  %v1794_v38 = vpop.f32.mrb[41].mxu1  ;;  %v5576_v13 = vld [vmem:[#allocation5 + $0x48] ss:$16 sps:$4 sm:$0xff]  }
 0x396   :  { %v5542_v39 = vadd.f32 %v1708_v6, %v1707_v8  ;;  %v1800_v41 = vadd.f32 %v1753_v37, %v6986_v40  ;;  %v1802_v43 = vadd.f32 %v1794_v38, %v6987_v42  ;;  %v1755_v45 = vpop.f32.mrb[42].mxu0  ;;  %v1796_v46 = vpop.f32.mrb[42].mxu1  ;;  %v5564_v6 = vld [vmem:[#allocation5 + $0x28] ss:$16 sps:$4 sm:$0xff]   ;;  %v5570_v8 = vld [vmem:[#allocation5 + $0x4c] ss:$16 sps:$4 sm:$0xff]  }
 0x397   :  { %v3829_v47 = vmul.f32 -1.442695, %v1799_v12  ;;  %v1756_v48 = vpop.f32.mrb[43].mxu0  ;;  %v1797_v60 = vpop.f32.mrb[43].mxu1  ;;  %v5573_v12 = vld [vmem:[#allocation5 + $0x40] ss:$16 sps:$4 sm:$0xff]  }
 0x398   :  { %v3830_v50 = vmul.f32 -1.442695, %v1800_v41  ;;  %4177 = vtanh.f32 %v5542_v39  ;;  %v3831_v51 = vmul.f32 -1.442695, %v1802_v43  ;;  %v4176_v58 = vpop.eup %4175  ;;  %v5579_v40 = vld [vmem:[#allocation5 + $0x64] ss:$16 sps:$4 sm:$0xff]  }
 0x399   :  { %4179 = vpow2.f32 %v3829_v47  ;;  %v5582_v41 = vld [vmem:[#allocation5 + $0x6c] ss:$16 sps:$4 sm:$0xff]   ;;  %v5588_v45 = vld [vmem:[#allocation5 + $0x60] ss:$16 sps:$4 sm:$0xff]   ;;  %v5591_v46 = vld [vmem:[#allocation5 + $0x68] ss:$16 sps:$4 sm:$0xff]  }
 0x39a   :  { %4181 = vpow2.f32 %v3830_v50  ;;  %v5594_v47 = vld [vmem:[#allocation5 + $0x84] ss:$16 sps:$4 sm:$0xff]   ;;  %v5597_v48 = vld [vmem:[#allocation5 + $0x8c] ss:$16 sps:$4 sm:$0xff]   ;;  %v5604_v60 = vld [vmem:[#allocation5 + $0x88] ss:$16 sps:$4 sm:$0xff]  }
 0x39b   :  { %4183 = vpow2.f32 %v3831_v51  ;;  %v5607_v50 = vld [vmem:[#allocation5 + $0xa4] ss:$16 sps:$4 sm:$0xff]   ;;  %v5610_v51 = vld [vmem:[#allocation5 + $0xac] ss:$16 sps:$4 sm:$0xff]  }
 0x39c   :  { %4185 = vtanh.f32 %v1801_v36 }
 0x3a2   :  { %v4178_v59 = vpop.eup %4177 }
 0x3a3   :  { %v4180_v61 = vpop.eup %4179  ;;  %v1711_v63 = vmul.f32 %v4178_v59, %v4176_v58  ;;  %v5613_v58 = vld [vmem:[#allocation5 + $0xa0] ss:$16 sps:$4 sm:$0xff]   ;;  %v5616_v59 = vld [vmem:[#allocation5 + $0xa8] ss:$16 sps:$4 sm:$0xff]  }
 0x3a4   :  { %v4182_v2 = vpop.eup %4181  ;;  %v1806_v3 = vadd.f32 1.0, %v4180_v61  ;;  %v5619_v61 = vld [vmem:[#allocation5 + $0xc4] ss:$16 sps:$4 sm:$0xff]  }
 0x3a5   :  { %v1812_v4 = vadd.f32 1.0, %v4182_v2  ;;  %v1828_v5 = vpack.c.bf16 %v1711_v63, %v1711_v63  ;;  %v4184_v9 = vpop.eup %4183  ;;  %v5622_v63 = vld [vmem:[#allocation5 + $0xcc] ss:$16 sps:$4 sm:$0xff]  }
 0x3a6   :  { %4187 = vrcp.f32 %v1806_v3  ;;  %v4186_v10 = vpop.eup %4185  ;;  %v1819_v38 = vadd.f32 1.0, %v4184_v9  ;;  %v5631_v9 = vld [vmem:[#allocation5 + $0xe4] ss:$16 sps:$4 sm:$0xff]  }
 0x3a7   :  { %4189 = vrcp.f32 %v1812_v4  ;;  %1862 = vmatmul.mubr.bf16.vlgmr.msra.gmra.mrb[44].mxu0 %v1828_v5  ;;  %1903 = vmatmul.mubr.bf16.vlgmr.msra.gmra.mrb[44].mxu1 %v1828_v5  ;;  %v5625_v4 = vld [vmem:[#allocation5 + $0xc0] ss:$16 sps:$4 sm:$0xff]   ;;  %v5628_v5 = vld [vmem:[#allocation5 + $0xc8] ss:$16 sps:$4 sm:$0xff]  }
 0x3a8   :  { %1912 = vmatpush1.bf16.msra.mxu0 %v5547_v18  ;;  %1953 = vmatpush1.bf16.msra.mxu1 %v5550_v32  ;;  %4191 = vrcp.f32 %v1819_v38  ;;  %v5640_v38 = vld [vmem:[#allocation5 + $0xe8] ss:$16 sps:$4 sm:$0xff]  }
 0x3a9   :  { %1913 = vmatprep.subr.bf16.mxu0 %v5553_v23  ;;  %1954 = vmatprep.subr.bf16.mxu1 %v5556_v22 }
 0x3aa   :  { %1943 = vmatprep.mubr.bf16.mxu0 %v6832_v35  ;;  %1984 = vmatprep.mubr.bf16.mxu1 %v6832_v35 }
 0x3ac   :  { %1914 = vmatpush1.bf16.msra.mxu0 %v5561_v15  ;;  %1955 = vmatpush1.bf16.msra.mxu1 %v5564_v6 }
 0x3ad   :  { %1915 = vmatprep.subr.bf16.mxu0 %v5567_v7  ;;  %1956 = vmatprep.subr.bf16.mxu1 %v5570_v8 }
 0x3b0   :  { %v4188_v11 = vpop.eup %4187  ;;  %1916 = vmatpush1.bf16.msra.mxu0 %v5573_v12  ;;  %1957 = vmatpush1.bf16.msra.mxu1 %v5576_v13 }
 0x3b1   :  { %v4190_v36 = vpop.eup %4189  ;;  %v1823_v37 = vmul.f32 %v4188_v11, %v4186_v10  ;;  %1917 = vmatprep.subr.bf16.mxu0 %v5579_v40  ;;  %1958 = vmatprep.subr.bf16.mxu1 %v5582_v41  ;;  %v5634_v10 = vld [vmem:[#allocation5 + $0xec] ss:$16 sps:$4 sm:$0xff]  }
 0x3b2   :  { %v1822_v42 = vmul.f32 %v4190_v36, %v5374_v16  ;;  %v5601_v16 = vld [vmem:[#allocation5 + $0x80] ss:$16 sps:$4 sm:$0xff]   ;;  %v4192_v2 = vpop.eup %4191 }
 0x3b4   :  { %v5586_v43 = vadd.f32 %v1823_v37, %v1822_v42  ;;  %1918 = vmatpush1.bf16.msra.mxu0 %v5588_v45  ;;  %1959 = vmatpush1.bf16.msra.mxu1 %v5591_v46  ;;  %v5637_v37 = vld [vmem:[#allocation5 + $0xe0] ss:$16 sps:$4 sm:$0xff]   ;;  %v6988_v42 = vld [vmem:[#allocation21_spill] sm:$0xff] }
 0x3b5   :  { %1919 = vmatprep.subr.bf16.mxu0 %v5594_v47  ;;  %1960 = vmatprep.subr.bf16.mxu1 %v5597_v48 }
 0x3b6   :  { %4193 = vtanh.f32 %v5586_v43 }
 0x3b8   :  { %1920 = vmatpush1.bf16.msra.mxu0 %v5601_v16  ;;  %1961 = vmatpush1.bf16.msra.mxu1 %v5604_v60 }
 0x3b9   :  { %1921 = vmatprep.subr.bf16.mxu0 %v5607_v50  ;;  %1962 = vmatprep.subr.bf16.mxu1 %v5610_v51 }
 0x3bc   :  { %1922 = vmatpush1.bf16.msra.mxu0 %v5613_v58  ;;  %1963 = vmatpush1.bf16.msra.mxu1 %v5616_v59 }
 0x3bd   :  { %1923 = vmatprep.subr.bf16.mxu0 %v5619_v61  ;;  %1964 = vmatprep.subr.bf16.mxu1 %v5622_v63 }
 0x3c0   :  { %v4194_v3 = vpop.eup %4193  ;;  %1924 = vmatpush1.bf16.msra.mxu0 %v5625_v4  ;;  %1965 = vmatpush1.bf16.msra.mxu1 %v5628_v5 }
 0x3c1   :  { %1925 = vmatprep.subr.bf16.mxu0 %v5631_v9  ;;  %1966 = vmatprep.subr.bf16.mxu1 %v5634_v10  ;;  %v1826_v11 = vmul.f32 %v4194_v3, %v4192_v2  ;;  %v6989_v2 = vld [vmem:[#allocation22_spill] sm:$0xff]  ;;  %v6990_v3 = vld [vmem:[#allocation23_spill] sm:$0xff] }
 0x3c3   :  { %v1827_v36 = vpack.c.bf16 %v1826_v11, %v1826_v11  ;;  %v6991_v11 = vld [vmem:[#allocation24_spill] sm:$0xff] }
 0x3c4   :  { %1926 = vmatpush1.bf16.msra.mxu0 %v5637_v37  ;;  %1967 = vmatpush1.bf16.msra.mxu1 %v5640_v38 }
 0x3c5   :  { %2026 = vmatprep.subr.bf16.mxu0 %v5397_v27  ;;  %2067 = vmatprep.subr.bf16.mxu1 %v5400_v28 }
 0x3c7   :  { %1944 = vmatmul.mubr.bf16.vlgmr.msra.gmra.mrb[48].mxu0 %v1827_v36  ;;  %1985 = vmatmul.mubr.bf16.vlgmr.msra.gmra.mrb[48].mxu1 %v1827_v36 }
 0x3c8   :  { %2027 = vmatpush1.bf16.msra.mxu0 %v5405_v17  ;;  %2068 = vmatpush1.bf16.msra.mxu1 %v5408_v54 }
 0x3c9   :  { %2028 = vmatprep.subr.bf16.mxu0 %v5411_v31  ;;  %2069 = vmatprep.subr.bf16.mxu1 %v5414_v20 }
 0x3ca   :  { %2058 = vmatprep.mubr.bf16.mxu0 %v6832_v35  ;;  %2099 = vmatprep.mubr.bf16.mxu1 %v6832_v35 }
 0x3cc   :  { %2029 = vmatpush1.bf16.msra.mxu0 %v5419_v56  ;;  %2070 = vmatpush1.bf16.msra.mxu1 %v5422_v49 }
 0x3cd   :  { %2030 = vmatprep.subr.bf16.mxu0 %v5425_v14  ;;  %2071 = vmatprep.subr.bf16.mxu1 %v5428_v52  ;;  %v6992_v52 = vld [vmem:[#allocation25_spill] sm:$0xff] }
 0x3d0   :  { %2031 = vmatpush1.bf16.msra.mxu0 %v5431_v21  ;;  %2072 = vmatpush1.bf16.msra.mxu1 %v5434_v57  ;;  %v6993_v21 = vld [vmem:[#allocation26_spill] sm:$0xff]  ;;  %v6994_v57 = vld [vmem:[#allocation27_spill] sm:$0xff] }
 0x3d1   :  { %2032 = vmatprep.subr.bf16.mxu0 %v5437_v24  ;;  %2073 = vmatprep.subr.bf16.mxu1 %v5440_v33  ;;  %v6995_v24 = vld [vmem:[#allocation28_spill] sm:$0xff]  ;;  %v6996_v33 = vld [vmem:[#allocation29_spill] sm:$0xff] }
 0x3d4   :  { %2033 = vmatpush1.bf16.msra.mxu0 %v5443_v25  ;;  %2074 = vmatpush1.bf16.msra.mxu1 %v5446_v62  ;;  %v6997_v25 = vld [vmem:[#allocation30_spill] sm:$0xff] }
 0x3d5   :  { %2034 = vmatprep.subr.bf16.mxu0 %v6988_v42  ;;  %2075 = vmatprep.subr.bf16.mxu1 %v6989_v2 }
 0x3d8   :  { %2035 = vmatpush1.bf16.msra.mxu0 %v6990_v3  ;;  %2076 = vmatpush1.bf16.msra.mxu1 %v6991_v11 }
 0x3d9   :  { %2036 = vmatprep.subr.bf16.mxu0 %v6992_v52  ;;  %2077 = vmatprep.subr.bf16.mxu1 %v6993_v21  ;;  %v5677_v21 = vld [vmem:[#allocation7 + $0x4] ss:$16 sps:$4 sm:$0xff]  }
 0x3da   :  { %6998 = vst [vmem:[#allocation67_spill] sm:$0xff] %v5677_v21 }
 0x3dc   :  { %2037 = vmatpush1.bf16.msra.mxu0 %v6994_v57  ;;  %2078 = vmatpush1.bf16.msra.mxu1 %v6995_v24  ;;  %v5680_v24 = vld [vmem:[#allocation7 + $0xc] ss:$16 sps:$4 sm:$0xff]  }
 0x3dd   :  { %2038 = vmatprep.subr.bf16.mxu0 %v6996_v33  ;;  %2079 = vmatprep.subr.bf16.mxu1 %v6997_v25  ;;  %6999 = vst [vmem:[#allocation68_spill] sm:$0xff] %v5680_v24 }
 0x3e0   :  { %2039 = vmatpush1.bf16.msra.mxu0 %v5479_v30  ;;  %2080 = vmatpush1.bf16.msra.mxu1 %v5482_v29  ;;  %v5683_v30 = vld [vmem:[#allocation7] ss:$16 sps:$4 sm:$0xff]  }
 0x3e1   :  { %2040 = vmatprep.subr.bf16.mxu0 %v5485_v44  ;;  %2081 = vmatprep.subr.bf16.mxu1 %v5488_v53  ;;  %7000 = vst [vmem:[#allocation69_spill] sm:$0xff] %v5683_v30  ;;  %v5686_v44 = vld [vmem:[#allocation7 + $0x8] ss:$16 sps:$4 sm:$0xff]  }
 0x3e2   :  { %7001 = vst [vmem:[#allocation70_spill] sm:$0xff] %v5686_v44 }
 0x3e4   :  { %2041 = vmatpush1.bf16.msra.mxu0 %v5491_v34  ;;  %2082 = vmatpush1.bf16.msra.mxu1 %v5494_v19  ;;  %v5689_v34 = vld [vmem:[#allocation7 + $0x24] ss:$16 sps:$4 sm:$0xff]   ;;  %v5692_v19 = vld [vmem:[#allocation7 + $0x2c] ss:$16 sps:$4 sm:$0xff]  }
 0x3e5   :  { %2138 = vmatprep.subr.bf16.mxu0 %v5677_v21  ;;  %2179 = vmatprep.subr.bf16.mxu1 %v5680_v24  ;;  %7002 = vst [vmem:[#allocation36_spill] sm:$0xff] %v5689_v34  ;;  %7003 = vst [vmem:[#allocation37_spill] sm:$0xff] %v5692_v19  ;;  %v5712_v24 = vld [vmem:[#allocation7 + $0x48] ss:$16 sps:$4 sm:$0xff]  }
 0x3e6   :  { %7009 = vst [vmem:[#allocation43_spill] sm:$0xff] %v5712_v24 }
 0x3e7   :  { %2059 = vmatmul.mubr.bf16.vlgmr.msra.gmra.mrb[52].mxu0 %v1827_v36  ;;  %2100 = vmatmul.mubr.bf16.vlgmr.msra.gmra.mrb[52].mxu1 %v1827_v36  ;;  %v5697_v36 = vld [vmem:[#allocation7 + $0x20] ss:$16 sps:$4 sm:$0xff]  }
 0x3e8   :  { %2139 = vmatpush1.bf16.msra.mxu0 %v5683_v30  ;;  %2180 = vmatpush1.bf16.msra.mxu1 %v5686_v44  ;;  %7004 = vst [vmem:[#allocation38_spill] sm:$0xff] %v5697_v36  ;;  %v5700_v30 = vld [vmem:[#allocation7 + $0x28] ss:$16 sps:$4 sm:$0xff]   ;;  %v5703_v44 = vld [vmem:[#allocation7 + $0x44] ss:$16 sps:$4 sm:$0xff]  }
 0x3e9   :  { %2140 = vmatprep.subr.bf16.mxu0 %v5689_v34  ;;  %2181 = vmatprep.subr.bf16.mxu1 %v5692_v19  ;;  %7005 = vst [vmem:[#allocation39_spill] sm:$0xff] %v5700_v30  ;;  %7006 = vst [vmem:[#allocation40_spill] sm:$0xff] %v5703_v44  ;;  %v5706_v34 = vld [vmem:[#allocation7 + $0x4c] ss:$16 sps:$4 sm:$0xff]   ;;  %v5709_v19 = vld [vmem:[#allocation7 + $0x40] ss:$16 sps:$4 sm:$0xff]  }
 0x3ea   :  { %2170 = vmatprep.mubr.bf16.mxu0 %v6832_v35  ;;  %2211 = vmatprep.mubr.bf16.mxu1 %v6832_v35  ;;  %7007 = vst [vmem:[#allocation41_spill] sm:$0xff] %v5706_v34  ;;  %7008 = vst [vmem:[#allocation42_spill] sm:$0xff] %v5709_v19 }
 0x3ec   :  { %2141 = vmatpush1.bf16.msra.mxu0 %v5697_v36  ;;  %2182 = vmatpush1.bf16.msra.mxu1 %v5700_v30  ;;  %v5715_v36 = vld [vmem:[#allocation7 + $0x64] ss:$16 sps:$4 sm:$0xff]   ;;  %v5718_v30 = vld [vmem:[#allocation7 + $0x6c] ss:$16 sps:$4 sm:$0xff]  }
 0x3ed   :  { %2142 = vmatprep.subr.bf16.mxu0 %v5703_v44  ;;  %2183 = vmatprep.subr.bf16.mxu1 %v5706_v34  ;;  %7010 = vst [vmem:[#allocation44_spill] sm:$0xff] %v5715_v36  ;;  %7011 = vst [vmem:[#allocation45_spill] sm:$0xff] %v5718_v30  ;;  %v5721_v44 = vld [vmem:[#allocation7 + $0x60] ss:$16 sps:$4 sm:$0xff]   ;;  %v5724_v34 = vld [vmem:[#allocation7 + $0x68] ss:$16 sps:$4 sm:$0xff]  }
 0x3ee   :  { %7012 = vst [vmem:[#allocation46_spill] sm:$0xff] %v5721_v44  ;;  %7013 = vst [vmem:[#allocation47_spill] sm:$0xff] %v5724_v34 }
 0x3f0   :  { %2143 = vmatpush1.bf16.msra.mxu0 %v5709_v19  ;;  %2184 = vmatpush1.bf16.msra.mxu1 %v5712_v24  ;;  %v5727_v19 = vld [vmem:[#allocation7 + $0x84] ss:$16 sps:$4 sm:$0xff]   ;;  %v5730_v24 = vld [vmem:[#allocation7 + $0x8c] ss:$16 sps:$4 sm:$0xff]  }
 0x3f1   :  { %2144 = vmatprep.subr.bf16.mxu0 %v5715_v36  ;;  %2185 = vmatprep.subr.bf16.mxu1 %v5718_v30  ;;  %7014 = vst [vmem:[#allocation48_spill] sm:$0xff] %v5727_v19  ;;  %7015 = vst [vmem:[#allocation49_spill] sm:$0xff] %v5730_v24  ;;  %v5733_v36 = vld [vmem:[#allocation7 + $0x80] ss:$16 sps:$4 sm:$0xff]   ;;  %v5736_v30 = vld [vmem:[#allocation7 + $0x88] ss:$16 sps:$4 sm:$0xff]  }
 0x3f2   :  { %7016 = vst [vmem:[#allocation50_spill] sm:$0xff] %v5733_v36  ;;  %7017 = vst [vmem:[#allocation51_spill] sm:$0xff] %v5736_v30 }
 0x3f4   :  { %2145 = vmatpush1.bf16.msra.mxu0 %v5721_v44  ;;  %2186 = vmatpush1.bf16.msra.mxu1 %v5724_v34  ;;  %v5739_v44 = vld [vmem:[#allocation7 + $0xa4] ss:$16 sps:$4 sm:$0xff]   ;;  %v5742_v34 = vld [vmem:[#allocation7 + $0xac] ss:$16 sps:$4 sm:$0xff]  }
 0x3f5   :  { %2146 = vmatprep.subr.bf16.mxu0 %v5727_v19  ;;  %2187 = vmatprep.subr.bf16.mxu1 %v5730_v24  ;;  %7018 = vst [vmem:[#allocation52_spill] sm:$0xff] %v5739_v44  ;;  %7019 = vst [vmem:[#allocation53_spill] sm:$0xff] %v5742_v34  ;;  %v5745_v19 = vld [vmem:[#allocation7 + $0xa0] ss:$16 sps:$4 sm:$0xff]   ;;  %v5748_v24 = vld [vmem:[#allocation7 + $0xa8] ss:$16 sps:$4 sm:$0xff]  }
 0x3f6   :  { %7020 = vst [vmem:[#allocation54_spill] sm:$0xff] %v5745_v19  ;;  %7021 = vst [vmem:[#allocation55_spill] sm:$0xff] %v5748_v24 }
 0x3f8   :  { %2147 = vmatpush1.bf16.msra.mxu0 %v5733_v36  ;;  %2188 = vmatpush1.bf16.msra.mxu1 %v5736_v30  ;;  %v5751_v36 = vld [vmem:[#allocation7 + $0xc4] ss:$16 sps:$4 sm:$0xff]   ;;  %v5754_v30 = vld [vmem:[#allocation7 + $0xcc] ss:$16 sps:$4 sm:$0xff]  }
 0x3f9   :  { %2148 = vmatprep.subr.bf16.mxu0 %v5739_v44  ;;  %2189 = vmatprep.subr.bf16.mxu1 %v5742_v34  ;;  %7022 = vst [vmem:[#allocation56_spill] sm:$0xff] %v5751_v36  ;;  %7023 = vst [vmem:[#allocation57_spill] sm:$0xff] %v5754_v30  ;;  %v5757_v44 = vld [vmem:[#allocation7 + $0xc0] ss:$16 sps:$4 sm:$0xff]   ;;  %v5760_v34 = vld [vmem:[#allocation7 + $0xc8] ss:$16 sps:$4 sm:$0xff]  }
 0x3fa   :  { %7024 = vst [vmem:[#allocation58_spill] sm:$0xff] %v5757_v44  ;;  %7025 = vst [vmem:[#allocation59_spill] sm:$0xff] %v5760_v34 }
 0x3fc   :  { %2149 = vmatpush1.bf16.msra.mxu0 %v5745_v19  ;;  %2190 = vmatpush1.bf16.msra.mxu1 %v5748_v24  ;;  %v5763_v19 = vld [vmem:[#allocation7 + $0xe4] ss:$16 sps:$4 sm:$0xff]   ;;  %v5766_v24 = vld [vmem:[#allocation7 + $0xec] ss:$16 sps:$4 sm:$0xff]  }
 0x3fd   :  { %2150 = vmatprep.subr.bf16.mxu0 %v5751_v36  ;;  %2191 = vmatprep.subr.bf16.mxu1 %v5754_v30  ;;  %7026 = vst [vmem:[#allocation60_spill] sm:$0xff] %v5763_v19  ;;  %7027 = vst [vmem:[#allocation61_spill] sm:$0xff] %v5766_v24  ;;  %v5769_v36 = vld [vmem:[#allocation7 + $0xe0] ss:$16 sps:$4 sm:$0xff]   ;;  %v5772_v30 = vld [vmem:[#allocation7 + $0xe8] ss:$16 sps:$4 sm:$0xff]  }
 0x3fe   :  { %7028 = vst [vmem:[#allocation62_spill] sm:$0xff] %v5769_v36  ;;  %7029 = vst [vmem:[#allocation63_spill] sm:$0xff] %v5772_v30 }
 0x400   :  { %2151 = vmatpush1.bf16.msra.mxu0 %v5757_v44  ;;  %2192 = vmatpush1.bf16.msra.mxu1 %v5760_v34  ;;  %v5775_v44 = vld [vmem:[#allocation5 + $0x4] ss:$16 sps:$4 sm:$0xff]   ;;  %v5778_v34 = vld [vmem:[#allocation5 + $0xc] ss:$16 sps:$4 sm:$0xff]  }
 0x401   :  { %2152 = vmatprep.subr.bf16.mxu0 %v5763_v19  ;;  %2193 = vmatprep.subr.bf16.mxu1 %v5766_v24  ;;  %7030 = vst [vmem:[#allocation64_spill] sm:$0xff] %v5775_v44  ;;  %7031 = vst [vmem:[#allocation65_spill] sm:$0xff] %v5778_v34 }
 0x404   :  { %2153 = vmatpush1.bf16.msra.mxu0 %v5769_v36  ;;  %2194 = vmatpush1.bf16.msra.mxu1 %v5772_v30 }
 0x405   :  { %2220 = vmatprep.subr.bf16.mxu0 %v5775_v44  ;;  %2261 = vmatprep.subr.bf16.mxu1 %v5778_v34 }
 0x47a   :  { %v1863_v19 = vpop.f32.mrb[44].mxu0  ;;  %v1904_v21 = vpop.f32.mrb[44].mxu1 }
 0x47b   :  { %v1865_v53 = vpop.f32.mrb[45].mxu0  ;;  %v1906_v24 = vpop.f32.mrb[45].mxu1 }
 0x47c   :  { %v1867_v29 = vpop.f32.mrb[46].mxu0  ;;  %v1908_v25 = vpop.f32.mrb[46].mxu1 }
 0x47d   :  { %v1868_v33 = vpop.f32.mrb[47].mxu0  ;;  %v1909_v36 = vpop.f32.mrb[47].mxu1 }
 0x49a   :  { %v1945_v57 = vpop.f32.mrb[48].mxu0  ;;  %v1986_v52 = vpop.f32.mrb[48].mxu1 }
 0x49b   :  { %v1946_v11 = vadd.f32 %v1945_v57, %v1863_v19  ;;  %v1987_v30 = vadd.f32 %v1986_v52, %v1904_v21  ;;  %v1947_v3 = vpop.f32.mrb[49].mxu0  ;;  %v1988_v2 = vpop.f32.mrb[49].mxu1 }
 0x49c   :  { %v1948_v42 = vadd.f32 %v1947_v3, %v1865_v53  ;;  %v1989_v44 = vadd.f32 %v1988_v2, %v1906_v24  ;;  %v1949_v62 = vpop.f32.mrb[50].mxu0  ;;  %v1990_v14 = vpop.f32.mrb[50].mxu1  ;;  %v7032_v3 = vld [vmem:[#allocation75_spill] sm:$0xff] }
 0x49d   :  { %v1993_v34 = vadd.f32 %v1946_v11, %v5334_v0  ;;  %v1950_v49 = vpop.f32.mrb[51].mxu0  ;;  %v1991_v56 = vpop.f32.mrb[51].mxu1  ;;  %v1995_v52 = vadd.f32 %v1987_v30, %v5349_v55  ;;  %v7033_v11 = vld [vmem:[#allocation76_spill] sm:$0xff] }
 0x49e   :  { %v1994_v20 = vadd.f32 %v1948_v42, %v5338_v26  ;;  %v1996_v33 = vadd.f32 %v1989_v44, %v5344_v1 }
 0x49f   :  { %v3832_v29 = vmul.f32 -1.442695, %v1993_v34 }
 0x4a0   :  { %v3833_v25 = vmul.f32 -1.442695, %v1994_v20  ;;  %v3834_v57 = vmul.f32 -1.442695, %v1996_v33 }
 0x4a1   :  { %4195 = vpow2.f32 %v3832_v29 }
 0x4a2   :  { %4197 = vpow2.f32 %v3833_v25 }
 0x4a3   :  { %4199 = vpow2.f32 %v3834_v57  ;;  %v7034_v57 = vld [vmem:[#allocation77_spill] sm:$0xff] }
 0x4a4   :  { %4201 = vtanh.f32 %v1995_v52 }
 0x4ab   :  { %v4196_v21 = vpop.eup %4195 }
 0x4ac   :  { %v4198_v53 = vpop.eup %4197  ;;  %v2000_v24 = vadd.f32 1.0, %v4196_v21  ;;  %v7035_v21 = vld [vmem:[#allocation78_spill] sm:$0xff] }
 0x4ad   :  { %v2006_v14 = vadd.f32 1.0, %v4198_v53  ;;  %v4200_v56 = vpop.eup %4199 }
 0x4ae   :  { %4203 = vrcp.f32 %v2000_v24  ;;  %v4202_v49 = vpop.eup %4201  ;;  %v2013_v19 = vadd.f32 1.0, %v4200_v56 }
 0x4af   :  { %4205 = vrcp.f32 %v2006_v14 }
 0x4b0   :  { %4207 = vrcp.f32 %v2013_v19 }
 0x4b8   :  { %v4204_v62 = vpop.eup %4203 }
 0x4b9   :  { %v4206_v34 = vpop.eup %4205  ;;  %v2017_v20 = vmul.f32 %v4204_v62, %v4202_v49 }
 0x4ba   :  { %v2016_v42 = vmul.f32 %v4206_v34, %v5542_v39  ;;  %v2060_v44 = vpop.f32.mrb[52].mxu0  ;;  %v2101_v2 = vpop.f32.mrb[52].mxu1 }
 0x4bb   :  { %v2108_v30 = vadd.f32 %v2060_v44, %v7032_v3  ;;  %v2110_v36 = vadd.f32 %v2101_v2, %v7033_v11  ;;  %v2062_v29 = vpop.f32.mrb[53].mxu0  ;;  %v2103_v25 = vpop.f32.mrb[53].mxu1 }
 0x4bc   :  { %v5788_v33 = vadd.f32 %v2017_v20, %v2016_v42  ;;  %v2109_v52 = vadd.f32 %v2062_v29, %v7034_v57  ;;  %v2111_v53 = vadd.f32 %v2103_v25, %v7035_v21  ;;  %v2064_v24 = vpop.f32.mrb[54].mxu0  ;;  %v2105_v14 = vpop.f32.mrb[54].mxu1 }
 0x4bd   :  { %v3835_v56 = vmul.f32 -1.442695, %v2108_v30  ;;  %v2065_v49 = vpop.f32.mrb[55].mxu0  ;;  %v2106_v39 = vpop.f32.mrb[55].mxu1 }
 0x4be   :  { %v3836_v62 = vmul.f32 -1.442695, %v2109_v52  ;;  %4209 = vtanh.f32 %v5788_v33  ;;  %v3837_v34 = vmul.f32 -1.442695, %v2111_v53  ;;  %v4208_v44 = vpop.eup %4207  ;;  %v7036_v39 = vld [vmem:[#allocation10_spill] sm:$0xff] }
 0x4bf   :  { %4211 = vpow2.f32 %v3835_v56 }
 0x4c0   :  { %4213 = vpow2.f32 %v3836_v62  ;;  %v7037_v62 = vld [vmem:[#allocation11_spill] sm:$0xff] }
 0x4c1   :  { %4215 = vpow2.f32 %v3837_v34  ;;  %v7038_v34 = vld [vmem:[#allocation12_spill] sm:$0xff] }
 0x4c2   :  { %4217 = vtanh.f32 %v2110_v36 }
 0x4c8   :  { %v4210_v2 = vpop.eup %4209 }
 0x4c9   :  { %v4212_v20 = vpop.eup %4211  ;;  %v2020_v42 = vmul.f32 %v4210_v2, %v4208_v44  ;;  %v7041_v44 = vld [vmem:[#allocation15_spill] sm:$0xff] }
 0x4ca   :  { %v4214_v3 = vpop.eup %4213  ;;  %v2115_v11 = vadd.f32 1.0, %v4212_v20  ;;  %v7045_v2 = vld [vmem:[#allocation19_spill] sm:$0xff]  ;;  %v7046_v20 = vld [vmem:[#allocation20_spill] sm:$0xff] }
 0x4cb   :  { %v2121_v29 = vadd.f32 1.0, %v4214_v3  ;;  %v2137_v25 = vpack.c.bf16 %v2020_v42, %v2020_v42  ;;  %v4216_v19 = vpop.eup %4215  ;;  %v7047_v42 = vld [vmem:[#allocation21_spill] sm:$0xff]  ;;  %v7048_v3 = vld [vmem:[#allocation22_spill] sm:$0xff] }
 0x4cc   :  { %4219 = vrcp.f32 %v2115_v11  ;;  %v4218_v30 = vpop.eup %4217  ;;  %v2128_v21 = vadd.f32 1.0, %v4216_v19  ;;  %v7049_v11 = vld [vmem:[#allocation23_spill] sm:$0xff]  ;;  %v7052_v19 = vld [vmem:[#allocation26_spill] sm:$0xff] }
 0x4cd   :  { %4221 = vrcp.f32 %v2121_v29  ;;  %2171 = vmatmul.mubr.bf16.vlgmr.msra.gmra.mrb[56].mxu0 %v2137_v25  ;;  %2212 = vmatmul.mubr.bf16.vlgmr.msra.gmra.mrb[56].mxu1 %v2137_v25  ;;  %v7050_v29 = vld [vmem:[#allocation24_spill] sm:$0xff]  ;;  %v7051_v25 = vld [vmem:[#allocation25_spill] sm:$0xff] }
 0x4ce   :  { %2221 = vmatpush1.bf16.msra.mxu0 %v5547_v18  ;;  %2262 = vmatpush1.bf16.msra.mxu1 %v5550_v32  ;;  %4223 = vrcp.f32 %v2128_v21  ;;  %v7057_v21 = vld [vmem:[#allocation31_spill] sm:$0xff] }
 0x4cf   :  { %2222 = vmatprep.subr.bf16.mxu0 %v5553_v23  ;;  %2263 = vmatprep.subr.bf16.mxu1 %v5556_v22 }
 0x4d0   :  { %2252 = vmatprep.mubr.bf16.mxu0 %v6832_v35  ;;  %2293 = vmatprep.mubr.bf16.mxu1 %v6832_v35 }
 0x4d2   :  { %2223 = vmatpush1.bf16.msra.mxu0 %v5561_v15  ;;  %2264 = vmatpush1.bf16.msra.mxu1 %v5564_v6 }
 0x4d3   :  { %2224 = vmatprep.subr.bf16.mxu0 %v5567_v7  ;;  %2265 = vmatprep.subr.bf16.mxu1 %v5570_v8 }
 0x4d6   :  { %v4220_v36 = vpop.eup %4219  ;;  %2225 = vmatpush1.bf16.msra.mxu0 %v5573_v12  ;;  %2266 = vmatpush1.bf16.msra.mxu1 %v5576_v13 }
 0x4d7   :  { %v4222_v57 = vpop.eup %4221  ;;  %v2132_v52 = vmul.f32 %v4220_v36, %v4218_v30  ;;  %2226 = vmatprep.subr.bf16.mxu0 %v5579_v40  ;;  %2267 = vmatprep.subr.bf16.mxu1 %v5582_v41  ;;  %v7053_v30 = vld [vmem:[#allocation27_spill] sm:$0xff]  ;;  %v7054_v36 = vld [vmem:[#allocation28_spill] sm:$0xff] }
 0x4d8   :  { %v2131_v53 = vmul.f32 %v4222_v57, %v5586_v43  ;;  %v4224_v43 = vpop.eup %4223  ;;  %v7055_v57 = vld [vmem:[#allocation29_spill] sm:$0xff] }
 0x4da   :  { %v5808_v24 = vadd.f32 %v2132_v52, %v2131_v53  ;;  %2227 = vmatpush1.bf16.msra.mxu0 %v5588_v45  ;;  %2268 = vmatpush1.bf16.msra.mxu1 %v5591_v46  ;;  %v7056_v52 = vld [vmem:[#allocation30_spill] sm:$0xff]  ;;  %v7058_v53 = vld [vmem:[#allocation32_spill] sm:$0xff] }
 0x4db   :  { %2228 = vmatprep.subr.bf16.mxu0 %v5594_v47  ;;  %2269 = vmatprep.subr.bf16.mxu1 %v5597_v48 }
 0x4dc   :  { %4225 = vtanh.f32 %v5808_v24 }
 0x4de   :  { %2229 = vmatpush1.bf16.msra.mxu0 %v5601_v16  ;;  %2270 = vmatpush1.bf16.msra.mxu1 %v5604_v60 }
 0x4df   :  { %2230 = vmatprep.subr.bf16.mxu0 %v5607_v50  ;;  %2271 = vmatprep.subr.bf16.mxu1 %v5610_v51 }
 0x4e2   :  { %2231 = vmatpush1.bf16.msra.mxu0 %v5613_v58  ;;  %2272 = vmatpush1.bf16.msra.mxu1 %v5616_v59 }
 0x4e3   :  { %2232 = vmatprep.subr.bf16.mxu0 %v5619_v61  ;;  %2273 = vmatprep.subr.bf16.mxu1 %v5622_v63 }
 0x4e6   :  { %v4226_v14 = vpop.eup %4225  ;;  %2233 = vmatpush1.bf16.msra.mxu0 %v5625_v4  ;;  %2274 = vmatpush1.bf16.msra.mxu1 %v5628_v5 }
 0x4e7   :  { %2234 = vmatprep.subr.bf16.mxu0 %v5631_v9  ;;  %2275 = vmatprep.subr.bf16.mxu1 %v5634_v10  ;;  %v2135_v56 = vmul.f32 %v4226_v14, %v4224_v43  ;;  %v7059_v43 = vld [vmem:[#allocation33_spill] sm:$0xff]  ;;  %v7060_v14 = vld [vmem:[#allocation34_spill] sm:$0xff] }
 0x4e9   :  { %v2136_v49 = vpack.c.bf16 %v2135_v56, %v2135_v56  ;;  %v7061_v56 = vld [vmem:[#allocation35_spill] sm:$0xff] }
 0x4ea   :  { %2235 = vmatpush1.bf16.msra.mxu0 %v5637_v37  ;;  %2276 = vmatpush1.bf16.msra.mxu1 %v5640_v38 }
 0x4eb   :  { %2335 = vmatprep.subr.bf16.mxu0 %v5397_v27  ;;  %2376 = vmatprep.subr.bf16.mxu1 %v5400_v28  ;;  %v7039_v27 = vld [vmem:[#allocation13_spill] sm:$0xff]  ;;  %v7040_v28 = vld [vmem:[#allocation14_spill] sm:$0xff] }
 0x4ed   :  { %2253 = vmatmul.mubr.bf16.vlgmr.msra.gmra.mrb[60].mxu0 %v2136_v49  ;;  %2294 = vmatmul.mubr.bf16.vlgmr.msra.gmra.mrb[60].mxu1 %v2136_v49 }
 0x4ee   :  { %2336 = vmatpush1.bf16.msra.mxu0 %v5405_v17  ;;  %2377 = vmatpush1.bf16.msra.mxu1 %v5408_v54  ;;  %v7042_v17 = vld [vmem:[#allocation16_spill] sm:$0xff]  ;;  %v7043_v54 = vld [vmem:[#allocation17_spill] sm:$0xff] }
 0x4ef   :  { %2337 = vmatprep.subr.bf16.mxu0 %v5411_v31  ;;  %2378 = vmatprep.subr.bf16.mxu1 %v7036_v39  ;;  %v7044_v31 = vld [vmem:[#allocation18_spill] sm:$0xff] }
 0x4f0   :  { %2367 = vmatprep.mubr.bf16.mxu0 %v6832_v35  ;;  %2408 = vmatprep.mubr.bf16.mxu1 %v6832_v35  ;;  %v7062_v39 = vld [vmem:[#allocation66_spill] sm:$0xff] }
 0x4f2   :  { %2338 = vmatpush1.bf16.msra.mxu0 %v7037_v62  ;;  %2379 = vmatpush1.bf16.msra.mxu1 %v7038_v34  ;;  %v7063_v62 = vld [vmem:[#allocation67_spill] sm:$0xff]  ;;  %v7064_v34 = vld [vmem:[#allocation68_spill] sm:$0xff] }
 0x4f3   :  { %2339 = vmatprep.subr.bf16.mxu0 %v7039_v27  ;;  %2380 = vmatprep.subr.bf16.mxu1 %v7040_v28  ;;  %v7065_v27 = vld [vmem:[#allocation69_spill] sm:$0xff]  ;;  %v7066_v28 = vld [vmem:[#allocation70_spill] sm:$0xff] }
 0x4f6   :  { %2340 = vmatpush1.bf16.msra.mxu0 %v7041_v44  ;;  %2381 = vmatpush1.bf16.msra.mxu1 %v7042_v17  ;;  %v7067_v44 = vld [vmem:[#allocation36_spill] sm:$0xff]  ;;  %v7068_v17 = vld [vmem:[#allocation37_spill] sm:$0xff] }
 0x4f7   :  { %2341 = vmatprep.subr.bf16.mxu0 %v7043_v54  ;;  %2382 = vmatprep.subr.bf16.mxu1 %v7044_v31  ;;  %v7069_v54 = vld [vmem:[#allocation38_spill] sm:$0xff]  ;;  %v7070_v31 = vld [vmem:[#allocation39_spill] sm:$0xff] }
 0x4fa   :  { %2342 = vmatpush1.bf16.msra.mxu0 %v7045_v2  ;;  %2383 = vmatpush1.bf16.msra.mxu1 %v7046_v20  ;;  %v7071_v2 = vld [vmem:[#allocation40_spill] sm:$0xff]  ;;  %v7072_v20 = vld [vmem:[#allocation41_spill] sm:$0xff] }
 0x4fb   :  { %2343 = vmatprep.subr.bf16.mxu0 %v7047_v42  ;;  %2384 = vmatprep.subr.bf16.mxu1 %v7048_v3  ;;  %v7074_v42 = vld [vmem:[#allocation43_spill] sm:$0xff]  ;;  %v7075_v3 = vld [vmem:[#allocation44_spill] sm:$0xff] }
 0x4fe   :  { %2344 = vmatpush1.bf16.msra.mxu0 %v7049_v11  ;;  %2385 = vmatpush1.bf16.msra.mxu1 %v7050_v29  ;;  %v7076_v11 = vld [vmem:[#allocation45_spill] sm:$0xff]  ;;  %v7077_v29 = vld [vmem:[#allocation46_spill] sm:$0xff] }
 0x4ff   :  { %2345 = vmatprep.subr.bf16.mxu0 %v7051_v25  ;;  %2386 = vmatprep.subr.bf16.mxu1 %v7052_v19  ;;  %v7078_v25 = vld [vmem:[#allocation47_spill] sm:$0xff]  ;;  %v7079_v19 = vld [vmem:[#allocation48_spill] sm:$0xff] }
 0x502   :  { %2346 = vmatpush1.bf16.msra.mxu0 %v7053_v30  ;;  %2387 = vmatpush1.bf16.msra.mxu1 %v7054_v36  ;;  %v7080_v30 = vld [vmem:[#allocation49_spill] sm:$0xff]  ;;  %v7081_v36 = vld [vmem:[#allocation50_spill] sm:$0xff] }
 0x503   :  { %2347 = vmatprep.subr.bf16.mxu0 %v7055_v57  ;;  %2388 = vmatprep.subr.bf16.mxu1 %v7056_v52  ;;  %v7082_v57 = vld [vmem:[#allocation51_spill] sm:$0xff]  ;;  %v7083_v52 = vld [vmem:[#allocation52_spill] sm:$0xff] }
 0x506   :  { %2348 = vmatpush1.bf16.msra.mxu0 %v7057_v21  ;;  %2389 = vmatpush1.bf16.msra.mxu1 %v7058_v53  ;;  %v7084_v21 = vld [vmem:[#allocation53_spill] sm:$0xff]  ;;  %v7085_v53 = vld [vmem:[#allocation54_spill] sm:$0xff] }
 0x507   :  { %2349 = vmatprep.subr.bf16.mxu0 %v7059_v43  ;;  %2390 = vmatprep.subr.bf16.mxu1 %v7060_v14  ;;  %v7086_v43 = vld [vmem:[#allocation55_spill] sm:$0xff]  ;;  %v7087_v14 = vld [vmem:[#allocation56_spill] sm:$0xff] }
 0x50a   :  { %2350 = vmatpush1.bf16.msra.mxu0 %v7061_v56  ;;  %2391 = vmatpush1.bf16.msra.mxu1 %v7062_v39  ;;  %v7088_v56 = vld [vmem:[#allocation57_spill] sm:$0xff]  ;;  %v7089_v39 = vld [vmem:[#allocation58_spill] sm:$0xff] }
 0x50b   :  { %2447 = vmatprep.subr.bf16.mxu0 %v7063_v62  ;;  %2488 = vmatprep.subr.bf16.mxu1 %v7064_v34 }
 0x50d   :  { %2368 = vmatmul.mubr.bf16.vlgmr.msra.gmra.mrb[64].mxu0 %v2136_v49  ;;  %2409 = vmatmul.mubr.bf16.vlgmr.msra.gmra.mrb[64].mxu1 %v2136_v49  ;;  %v7073_v49 = vld [vmem:[#allocation42_spill] sm:$0xff] }
 0x50e   :  { %2448 = vmatpush1.bf16.msra.mxu0 %v7065_v27  ;;  %2489 = vmatpush1.bf16.msra.mxu1 %v7066_v28 }
 0x50f   :  { %2449 = vmatprep.subr.bf16.mxu0 %v7067_v44  ;;  %2490 = vmatprep.subr.bf16.mxu1 %v7068_v17 }
 0x510   :  { %2479 = vmatprep.mubr.bf16.mxu0 %v6832_v35  ;;  %2520 = vmatprep.mubr.bf16.mxu1 %v6832_v35 }
 0x512   :  { %2450 = vmatpush1.bf16.msra.mxu0 %v7069_v54  ;;  %2491 = vmatpush1.bf16.msra.mxu1 %v7070_v31 }
 0x513   :  { %2451 = vmatprep.subr.bf16.mxu0 %v7071_v2  ;;  %2492 = vmatprep.subr.bf16.mxu1 %v7072_v20 }
 0x516   :  { %2452 = vmatpush1.bf16.msra.mxu0 %v7073_v49  ;;  %2493 = vmatpush1.bf16.msra.mxu1 %v7074_v42 }
 0x517   :  { %2453 = vmatprep.subr.bf16.mxu0 %v7075_v3  ;;  %2494 = vmatprep.subr.bf16.mxu1 %v7076_v11 }
 0x51a   :  { %2454 = vmatpush1.bf16.msra.mxu0 %v7077_v29  ;;  %2495 = vmatpush1.bf16.msra.mxu1 %v7078_v25 }
 0x51b   :  { %2455 = vmatprep.subr.bf16.mxu0 %v7079_v19  ;;  %2496 = vmatprep.subr.bf16.mxu1 %v7080_v30  ;;  %v7090_v19 = vld [vmem:[#allocation59_spill] sm:$0xff]  ;;  %v7091_v30 = vld [vmem:[#allocation60_spill] sm:$0xff] }
 0x51e   :  { %2456 = vmatpush1.bf16.msra.mxu0 %v7081_v36  ;;  %2497 = vmatpush1.bf16.msra.mxu1 %v7082_v57  ;;  %v7092_v36 = vld [vmem:[#allocation61_spill] sm:$0xff]  ;;  %v7093_v57 = vld [vmem:[#allocation62_spill] sm:$0xff] }
 0x51f   :  { %2457 = vmatprep.subr.bf16.mxu0 %v7083_v52  ;;  %2498 = vmatprep.subr.bf16.mxu1 %v7084_v21  ;;  %v7094_v52 = vld [vmem:[#allocation63_spill] sm:$0xff]  ;;  %v7095_v21 = vld [vmem:[#allocation64_spill] sm:$0xff] }
 0x522   :  { %2458 = vmatpush1.bf16.msra.mxu0 %v7085_v53  ;;  %2499 = vmatpush1.bf16.msra.mxu1 %v7086_v43  ;;  %v7096_v53 = vld [vmem:[#allocation65_spill] sm:$0xff] }
 0x523   :  { %2459 = vmatprep.subr.bf16.mxu0 %v7087_v14  ;;  %2500 = vmatprep.subr.bf16.mxu1 %v7088_v56 }
 0x526   :  { %2460 = vmatpush1.bf16.msra.mxu0 %v7089_v39  ;;  %2501 = vmatpush1.bf16.msra.mxu1 %v7090_v19 }
 0x527   :  { %2461 = vmatprep.subr.bf16.mxu0 %v7091_v30  ;;  %2502 = vmatprep.subr.bf16.mxu1 %v7092_v36 }
 0x52a   :  { %2462 = vmatpush1.bf16.msra.mxu0 %v7093_v57  ;;  %2503 = vmatpush1.bf16.msra.mxu1 %v7094_v52 }
 0x52b   :  { %2529 = vmatprep.subr.bf16.mxu0 %v7095_v21  ;;  %2570 = vmatprep.subr.bf16.mxu1 %v7096_v53 }
 0x5a0   :  { %v2172_v43 = vpop.f32.mrb[56].mxu0  ;;  %v2213_v14 = vpop.f32.mrb[56].mxu1 }
 0x5a1   :  { %v2174_v25 = vpop.f32.mrb[57].mxu0  ;;  %v2215_v56 = vpop.f32.mrb[57].mxu1 }
 0x5a2   :  { %v2176_v29 = vpop.f32.mrb[58].mxu0  ;;  %v2217_v39 = vpop.f32.mrb[58].mxu1 }
 0x5a3   :  { %v2177_v11 = vpop.f32.mrb[59].mxu0  ;;  %v2218_v19 = vpop.f32.mrb[59].mxu1 }
 0x5c0   :  { %v2254_v3 = vpop.f32.mrb[60].mxu0  ;;  %v2295_v30 = vpop.f32.mrb[60].mxu1 }
 0x5c1   :  { %v2255_v42 = vadd.f32 %v2254_v3, %v2172_v43  ;;  %v2296_v36 = vadd.f32 %v2295_v30, %v2213_v14  ;;  %v2256_v49 = vpop.f32.mrb[61].mxu0  ;;  %v2297_v57 = vpop.f32.mrb[61].mxu1  ;;  %v7097_v43 = vld [vmem:[#allocation79_spill] sm:$0xff]  ;;  %v7098_v14 = vld [vmem:[#allocation80_spill] sm:$0xff] }
 0x5c2   :  { %v2257_v20 = vadd.f32 %v2256_v49, %v2174_v25  ;;  %v2298_v52 = vadd.f32 %v2297_v57, %v2215_v56  ;;  %v2258_v2 = vpop.f32.mrb[62].mxu0  ;;  %v2299_v21 = vpop.f32.mrb[62].mxu1 }
 0x5c3   :  { %v2302_v53 = vadd.f32 %v2255_v42, %v5334_v0  ;;  %v2259_v31 = vpop.f32.mrb[63].mxu0  ;;  %v2300_v54 = vpop.f32.mrb[63].mxu1  ;;  %v2304_v19 = vadd.f32 %v2296_v36, %v5349_v55 }
 0x5c4   :  { %v2303_v17 = vadd.f32 %v2257_v20, %v5338_v26  ;;  %v2305_v11 = vadd.f32 %v2298_v52, %v5344_v1 }
 0x5c5   :  { %v3838_v29 = vmul.f32 -1.442695, %v2302_v53 }
 0x5c6   :  { %v3839_v39 = vmul.f32 -1.442695, %v2303_v17  ;;  %v3840_v3 = vmul.f32 -1.442695, %v2305_v11 }
 0x5c7   :  { %4227 = vpow2.f32 %v3838_v29 }
 0x5c8   :  { %4229 = vpow2.f32 %v3839_v39 }
 0x5c9   :  { %4231 = vpow2.f32 %v3840_v3  ;;  %v7099_v3 = vld [vmem:[#allocation81_spill] sm:$0xff] }
 0x5ca   :  { %4233 = vtanh.f32 %v2304_v19 }
 0x5d1   :  { %v4228_v30 = vpop.eup %4227 }
 0x5d2   :  { %v4230_v49 = vpop.eup %4229  ;;  %v2309_v25 = vadd.f32 1.0, %v4228_v30  ;;  %v7100_v30 = vld [vmem:[#allocation82_spill] sm:$0xff] }
 0x5d3   :  { %v2315_v2 = vadd.f32 1.0, %v4230_v49  ;;  %v4232_v54 = vpop.eup %4231 }
 0x5d4   :  { %4235 = vrcp.f32 %v2309_v25  ;;  %v4234_v31 = vpop.eup %4233  ;;  %v2322_v57 = vadd.f32 1.0, %v4232_v54 }
 0x5d5   :  { %4237 = vrcp.f32 %v2315_v2 }
 0x5d6   :  { %4239 = vrcp.f32 %v2322_v57 }
 0x5de   :  { %v4236_v20 = vpop.eup %4235 }
 0x5df   :  { %v4238_v42 = vpop.eup %4237  ;;  %v2326_v17 = vmul.f32 %v4236_v20, %v4234_v31 }
 0x5e0   :  { %v2325_v21 = vmul.f32 %v4238_v42, %v5788_v33  ;;  %v2369_v52 = vpop.f32.mrb[64].mxu0  ;;  %v2410_v53 = vpop.f32.mrb[64].mxu1 }
 0x5e1   :  { %v2417_v36 = vadd.f32 %v2369_v52, %v7097_v43  ;;  %v2419_v56 = vadd.f32 %v2410_v53, %v7098_v14  ;;  %v2371_v29 = vpop.f32.mrb[65].mxu0  ;;  %v2412_v39 = vpop.f32.mrb[65].mxu1 }
 0x5e2   :  { %v5906_v11 = vadd.f32 %v2326_v17, %v2325_v21  ;;  %v2418_v19 = vadd.f32 %v2371_v29, %v7099_v3  ;;  %v2420_v49 = vadd.f32 %v2412_v39, %v7100_v30  ;;  %v2373_v25 = vpop.f32.mrb[66].mxu0  ;;  %v2414_v2 = vpop.f32.mrb[66].mxu1  ;;  %v6019_v3 = vld [vmem:[#allocation3 + $0xa0] ss:$16 sps:$4 sm:$0xff]   ;;  %v6025_v30 = vld [vmem:[#allocation3 + $0xc4] ss:$16 sps:$4 sm:$0xff]  }
 0x5e3   :  { %v3841_v54 = vmul.f32 -1.442695, %v2417_v36  ;;  %v2374_v31 = vpop.f32.mrb[67].mxu0  ;;  %v2415_v33 = vpop.f32.mrb[67].mxu1  ;;  %7109 = vst [vmem:[#allocation10_spill] sm:$0xff] %v6019_v3  ;;  %7111 = vst [vmem:[#allocation12_spill] sm:$0xff] %v6025_v30 }
 0x5e4   :  { %v3842_v20 = vmul.f32 -1.442695, %v2418_v19  ;;  %4241 = vtanh.f32 %v5906_v11  ;;  %v3843_v42 = vmul.f32 -1.442695, %v2420_v49  ;;  %v4240_v52 = vpop.eup %4239  ;;  %v6022_v19 = vld [vmem:[#allocation3 + $0xa8] ss:$16 sps:$4 sm:$0xff]  }
 0x5e5   :  { %4243 = vpow2.f32 %v3841_v54  ;;  %7110 = vst [vmem:[#allocation11_spill] sm:$0xff] %v6022_v19  ;;  %v6028_v49 = vld [vmem:[#allocation3 + $0xcc] ss:$16 sps:$4 sm:$0xff]   ;;  %v6031_v25 = vld [vmem:[#allocation3 + $0xc0] ss:$16 sps:$4 sm:$0xff]  }
 0x5e6   :  { %4245 = vpow2.f32 %v3842_v20  ;;  %7112 = vst [vmem:[#allocation13_spill] sm:$0xff] %v6028_v49  ;;  %7113 = vst [vmem:[#allocation14_spill] sm:$0xff] %v6031_v25  ;;  %v6034_v2 = vld [vmem:[#allocation3 + $0xc8] ss:$16 sps:$4 sm:$0xff]   ;;  %v6037_v54 = vld [vmem:[#allocation3 + $0xe4] ss:$16 sps:$4 sm:$0xff]  }
 0x5e7   :  { %4247 = vpow2.f32 %v3843_v42  ;;  %7114 = vst [vmem:[#allocation15_spill] sm:$0xff] %v6034_v2  ;;  %7115 = vst [vmem:[#allocation16_spill] sm:$0xff] %v6037_v54  ;;  %v6040_v31 = vld [vmem:[#allocation3 + $0xec] ss:$16 sps:$4 sm:$0xff]   ;;  %v6043_v33 = vld [vmem:[#allocation3 + $0xe0] ss:$16 sps:$4 sm:$0xff]  }
 0x5e8   :  { %4249 = vtanh.f32 %v2419_v56  ;;  %v6016_v56 = vld [vmem:[#allocation3 + $0xac] ss:$16 sps:$4 sm:$0xff]   ;;  %7116 = vst [vmem:[#allocation17_spill] sm:$0xff] %v6040_v31  ;;  %7117 = vst [vmem:[#allocation18_spill] sm:$0xff] %v6043_v33  ;;  %v6046_v20 = vld [vmem:[#allocation3 + $0xe8] ss:$16 sps:$4 sm:$0xff]  }
 0x5e9   :  { %7108 = vst [vmem:[#allocation78_spill] sm:$0xff] %v6016_v56  ;;  %7118 = vst [vmem:[#allocation19_spill] sm:$0xff] %v6046_v20  ;;  %v7119_v42 = vld [vmem:[#allocation37_spill] sm:$0xff] }
 0x5ee   :  { %v4242_v53 = vpop.eup %4241 }
 0x5ef   :  { %v4244_v17 = vpop.eup %4243  ;;  %v2329_v21 = vmul.f32 %v4242_v53, %v4240_v52  ;;  %v7120_v52 = vld [vmem:[#allocation38_spill] sm:$0xff]  ;;  %v7123_v53 = vld [vmem:[#allocation41_spill] sm:$0xff] }
 0x5f0   :  { %v4246_v43 = vpop.eup %4245  ;;  %v2424_v14 = vadd.f32 1.0, %v4244_v17  ;;  %v7124_v17 = vld [vmem:[#allocation42_spill] sm:$0xff] }
 0x5f1   :  { %v2430_v29 = vadd.f32 1.0, %v4246_v43  ;;  %v2446_v39 = vpack.c.bf16 %v2329_v21, %v2329_v21  ;;  %v4248_v57 = vpop.eup %4247  ;;  %v7128_v21 = vld [vmem:[#allocation46_spill] sm:$0xff]  ;;  %v7129_v43 = vld [vmem:[#allocation47_spill] sm:$0xff] }
 0x5f2   :  { %4251 = vrcp.f32 %v2424_v14  ;;  %v7130_v14 = vld [vmem:[#allocation48_spill] sm:$0xff] }
 0x5f3   :  { %4253 = vrcp.f32 %v2430_v29  ;;  %2480 = vmatmul.mubr.bf16.vlgmr.msra.gmra.mrb[68].mxu0 %v2446_v39  ;;  %2521 = vmatmul.mubr.bf16.vlgmr.msra.gmra.mrb[68].mxu1 %v2446_v39  ;;  %v7131_v29 = vld [vmem:[#allocation49_spill] sm:$0xff]  ;;  %v7132_v39 = vld [vmem:[#allocation50_spill] sm:$0xff] }
 0x5f4   :  { %2530 = vmatpush1.bf16.msra.mxu0 %v5547_v18  ;;  %2571 = vmatpush1.bf16.msra.mxu1 %v5550_v32  ;;  %v4250_v18 = vpop.eup %4249 }
 0x5f5   :  { %2531 = vmatprep.subr.bf16.mxu0 %v5553_v23  ;;  %2572 = vmatprep.subr.bf16.mxu1 %v5556_v22  ;;  %v2437_v22 = vadd.f32 1.0, %v4248_v57  ;;  %v7133_v57 = vld [vmem:[#allocation51_spill] sm:$0xff] }
 0x5f6   :  { %2561 = vmatprep.mubr.bf16.mxu0 %v6832_v35  ;;  %2602 = vmatprep.mubr.bf16.mxu1 %v6832_v35 }
 0x5f7   :  { %4255 = vrcp.f32 %v2437_v22  ;;  %v7138_v22 = vld [vmem:[#allocation56_spill] sm:$0xff] }
 0x5f8   :  { %2532 = vmatpush1.bf16.msra.mxu0 %v5561_v15  ;;  %2573 = vmatpush1.bf16.msra.mxu1 %v5564_v6 }
 0x5f9   :  { %2533 = vmatprep.subr.bf16.mxu0 %v5567_v7  ;;  %2574 = vmatprep.subr.bf16.mxu1 %v5570_v8 }
 0x5fc   :  { %v4252_v36 = vpop.eup %4251  ;;  %2534 = vmatpush1.bf16.msra.mxu0 %v5573_v12  ;;  %2575 = vmatpush1.bf16.msra.mxu1 %v5576_v13 }
 0x5fd   :  { %v4254_v32 = vpop.eup %4253  ;;  %v2441_v23 = vmul.f32 %v4252_v36, %v4250_v18  ;;  %2535 = vmatprep.subr.bf16.mxu0 %v5579_v40  ;;  %2576 = vmatprep.subr.bf16.mxu1 %v5582_v41  ;;  %v5949_v40 = vld [vmem:[#allocation3 + $0x4] ss:$16 sps:$4 sm:$0xff]   ;;  %v5952_v41 = vld [vmem:[#allocation3 + $0xc] ss:$16 sps:$4 sm:$0xff]  }
 0x5fe   :  { %v2440_v15 = vmul.f32 %v4254_v32, %v5808_v24  ;;  %v6013_v24 = vld [vmem:[#allocation3 + $0xa4] ss:$16 sps:$4 sm:$0xff]   ;;  %v7135_v36 = vld [vmem:[#allocation53_spill] sm:$0xff] }
 0x5ff   :  { %7107 = vst [vmem:[#allocation77_spill] sm:$0xff] %v6013_v24  ;;  %v7134_v18 = vld [vmem:[#allocation52_spill] sm:$0xff]  ;;  %v7136_v32 = vld [vmem:[#allocation54_spill] sm:$0xff] }
 0x600   :  { %v5926_v6 = vadd.f32 %v2441_v23, %v2440_v15  ;;  %2536 = vmatpush1.bf16.msra.mxu0 %v5588_v45  ;;  %2577 = vmatpush1.bf16.msra.mxu1 %v5591_v46  ;;  %v5957_v45 = vld [vmem:[#allocation3] ss:$16 sps:$4 sm:$0xff]   ;;  %v5960_v46 = vld [vmem:[#allocation3 + $0x8] ss:$16 sps:$4 sm:$0xff]  }
 0x601   :  { %2537 = vmatprep.subr.bf16.mxu0 %v5594_v47  ;;  %2578 = vmatprep.subr.bf16.mxu1 %v5597_v48  ;;  %v4256_v7 = vpop.eup %4255  ;;  %v5963_v47 = vld [vmem:[#allocation3 + $0x24] ss:$16 sps:$4 sm:$0xff]   ;;  %v5966_v48 = vld [vmem:[#allocation3 + $0x2c] ss:$16 sps:$4 sm:$0xff]  }
 0x602   :  { %4257 = vtanh.f32 %v5926_v6  ;;  %v7137_v23 = vld [vmem:[#allocation55_spill] sm:$0xff]  ;;  %v7139_v15 = vld [vmem:[#allocation57_spill] sm:$0xff] }
 0x604   :  { %2538 = vmatpush1.bf16.msra.mxu0 %v5601_v16  ;;  %2579 = vmatpush1.bf16.msra.mxu1 %v5604_v60  ;;  %v5971_v16 = vld [vmem:[#allocation3 + $0x20] ss:$16 sps:$4 sm:$0xff]   ;;  %v5974_v60 = vld [vmem:[#allocation3 + $0x28] ss:$16 sps:$4 sm:$0xff]  }
 0x605   :  { %2539 = vmatprep.subr.bf16.mxu0 %v5607_v50  ;;  %2580 = vmatprep.subr.bf16.mxu1 %v5610_v51  ;;  %v5977_v50 = vld [vmem:[#allocation3 + $0x44] ss:$16 sps:$4 sm:$0xff]   ;;  %v5980_v51 = vld [vmem:[#allocation3 + $0x4c] ss:$16 sps:$4 sm:$0xff]  }
 0x608   :  { %2540 = vmatpush1.bf16.msra.mxu0 %v5613_v58  ;;  %2581 = vmatpush1.bf16.msra.mxu1 %v5616_v59  ;;  %v5983_v58 = vld [vmem:[#allocation3 + $0x40] ss:$16 sps:$4 sm:$0xff]   ;;  %v5986_v59 = vld [vmem:[#allocation3 + $0x48] ss:$16 sps:$4 sm:$0xff]  }
 0x609   :  { %2541 = vmatprep.subr.bf16.mxu0 %v5619_v61  ;;  %2582 = vmatprep.subr.bf16.mxu1 %v5622_v63  ;;  %v5989_v61 = vld [vmem:[#allocation3 + $0x64] ss:$16 sps:$4 sm:$0xff]   ;;  %v5992_v63 = vld [vmem:[#allocation3 + $0x6c] ss:$16 sps:$4 sm:$0xff]  }
 0x60c   :  { %v4258_v8 = vpop.eup %4257  ;;  %2542 = vmatpush1.bf16.msra.mxu0 %v5625_v4  ;;  %2583 = vmatpush1.bf16.msra.mxu1 %v5628_v5  ;;  %v5995_v4 = vld [vmem:[#allocation3 + $0x60] ss:$16 sps:$4 sm:$0xff]   ;;  %v5998_v5 = vld [vmem:[#allocation3 + $0x68] ss:$16 sps:$4 sm:$0xff]  }
 0x60d   :  { %2543 = vmatprep.subr.bf16.mxu0 %v5631_v9  ;;  %2584 = vmatprep.subr.bf16.mxu1 %v5634_v10  ;;  %v2444_v12 = vmul.f32 %v4258_v8, %v4256_v7  ;;  %7101 = vst [vmem:[#allocation71_spill] sm:$0xff] %v5995_v4  ;;  %7102 = vst [vmem:[#allocation72_spill] sm:$0xff] %v5998_v5  ;;  %v6001_v9 = vld [vmem:[#allocation3 + $0x84] ss:$16 sps:$4 sm:$0xff]   ;;  %v6004_v10 = vld [vmem:[#allocation3 + $0x8c] ss:$16 sps:$4 sm:$0xff]  }
 0x60e   :  { %7103 = vst [vmem:[#allocation73_spill] sm:$0xff] %v6001_v9  ;;  %7104 = vst [vmem:[#allocation74_spill] sm:$0xff] %v6004_v10  ;;  %v7140_v7 = vld [vmem:[#allocation58_spill] sm:$0xff]  ;;  %v7141_v8 = vld [vmem:[#allocation59_spill] sm:$0xff] }
 0x60f   :  { %v5945_v13 = vpack.c.bf16 %v2444_v12, %v2444_v12  ;;  %v7142_v12 = vld [vmem:[#allocation60_spill] sm:$0xff] }
 0x610   :  { %2544 = vmatpush1.bf16.msra.mxu0 %v5637_v37  ;;  %2585 = vmatpush1.bf16.msra.mxu1 %v5640_v38  ;;  %v6007_v37 = vld [vmem:[#allocation3 + $0x80] ss:$16 sps:$4 sm:$0xff]   ;;  %v6010_v38 = vld [vmem:[#allocation3 + $0x88] ss:$16 sps:$4 sm:$0xff]  }
 0x611   :  { %2644 = vmatprep.subr.bf16.mxu0 %v5949_v40  ;;  %2685 = vmatprep.subr.bf16.mxu1 %v5952_v41  ;;  %7105 = vst [vmem:[#allocation75_spill] sm:$0xff] %v6007_v37  ;;  %7106 = vst [vmem:[#allocation76_spill] sm:$0xff] %v6010_v38 }
 0x613   :  { %2562 = vmatmul.mubr.bf16.vlgmr.msra.gmra.mrb[72].mxu0 %v5945_v13  ;;  %2603 = vmatmul.mubr.bf16.vlgmr.msra.gmra.mrb[72].mxu1 %v5945_v13 }
 0x614   :  { %2645 = vmatpush1.bf16.msra.mxu0 %v5957_v45  ;;  %2686 = vmatpush1.bf16.msra.mxu1 %v5960_v46 }
 0x615   :  { %2646 = vmatprep.subr.bf16.mxu0 %v5963_v47  ;;  %2687 = vmatprep.subr.bf16.mxu1 %v5966_v48 }
 0x616   :  { %2676 = vmatprep.mubr.bf16.mxu0 %v6832_v35  ;;  %2717 = vmatprep.mubr.bf16.mxu1 %v6832_v35 }
 0x618   :  { %2647 = vmatpush1.bf16.msra.mxu0 %v5971_v16  ;;  %2688 = vmatpush1.bf16.msra.mxu1 %v5974_v60 }
 0x619   :  { %2648 = vmatprep.subr.bf16.mxu0 %v5977_v50  ;;  %2689 = vmatprep.subr.bf16.mxu1 %v5980_v51 }
 0x61c   :  { %2649 = vmatpush1.bf16.msra.mxu0 %v5983_v58  ;;  %2690 = vmatpush1.bf16.msra.mxu1 %v5986_v59 }
 0x61d   :  { %2650 = vmatprep.subr.bf16.mxu0 %v5989_v61  ;;  %2691 = vmatprep.subr.bf16.mxu1 %v5992_v63 }
 0x620   :  { %2651 = vmatpush1.bf16.msra.mxu0 %v5995_v4  ;;  %2692 = vmatpush1.bf16.msra.mxu1 %v5998_v5 }
 0x621   :  { %2652 = vmatprep.subr.bf16.mxu0 %v6001_v9  ;;  %2693 = vmatprep.subr.bf16.mxu1 %v6004_v10 }
 0x624   :  { %2653 = vmatpush1.bf16.msra.mxu0 %v6007_v37  ;;  %2694 = vmatpush1.bf16.msra.mxu1 %v6010_v38 }
 0x625   :  { %2654 = vmatprep.subr.bf16.mxu0 %v6013_v24  ;;  %2695 = vmatprep.subr.bf16.mxu1 %v6016_v56 }
 0x628   :  { %2655 = vmatpush1.bf16.msra.mxu0 %v6019_v3  ;;  %2696 = vmatpush1.bf16.msra.mxu1 %v6022_v19 }
 0x629   :  { %2656 = vmatprep.subr.bf16.mxu0 %v6025_v30  ;;  %2697 = vmatprep.subr.bf16.mxu1 %v6028_v49 }
 0x62c   :  { %2657 = vmatpush1.bf16.msra.mxu0 %v6031_v25  ;;  %2698 = vmatpush1.bf16.msra.mxu1 %v6034_v2 }
 0x62d   :  { %2658 = vmatprep.subr.bf16.mxu0 %v6037_v54  ;;  %2699 = vmatprep.subr.bf16.mxu1 %v6040_v31 }
 0x630   :  { %2659 = vmatpush1.bf16.msra.mxu0 %v6043_v33  ;;  %2700 = vmatpush1.bf16.msra.mxu1 %v6046_v20 }
 0x631   :  { %2756 = vmatprep.subr.bf16.mxu0 %v7063_v62  ;;  %2797 = vmatprep.subr.bf16.mxu1 %v7064_v34  ;;  %v7121_v62 = vld [vmem:[#allocation39_spill] sm:$0xff]  ;;  %v7122_v34 = vld [vmem:[#allocation40_spill] sm:$0xff] }
 0x633   :  { %2677 = vmatmul.mubr.bf16.vlgmr.msra.gmra.mrb[76].mxu0 %v5945_v13  ;;  %2718 = vmatmul.mubr.bf16.vlgmr.msra.gmra.mrb[76].mxu1 %v5945_v13  ;;  %v7143_v13 = vld [vmem:[#allocation61_spill] sm:$0xff] }
 0x634   :  { %2757 = vmatpush1.bf16.msra.mxu0 %v7065_v27  ;;  %2798 = vmatpush1.bf16.msra.mxu1 %v7066_v28  ;;  %v7125_v27 = vld [vmem:[#allocation43_spill] sm:$0xff]  ;;  %v7126_v28 = vld [vmem:[#allocation44_spill] sm:$0xff] }
 0x635   :  { %2758 = vmatprep.subr.bf16.mxu0 %v7067_v44  ;;  %2799 = vmatprep.subr.bf16.mxu1 %v7119_v42  ;;  %v7127_v44 = vld [vmem:[#allocation45_spill] sm:$0xff]  ;;  %v7144_v42 = vld [vmem:[#allocation62_spill] sm:$0xff] }
 0x636   :  { %2788 = vmatprep.mubr.bf16.mxu0 %v6832_v35  ;;  %2829 = vmatprep.mubr.bf16.mxu1 %v6832_v35 }
 0x638   :  { %2759 = vmatpush1.bf16.msra.mxu0 %v7120_v52  ;;  %2800 = vmatpush1.bf16.msra.mxu1 %v7121_v62  ;;  %v7145_v52 = vld [vmem:[#allocation63_spill] sm:$0xff]  ;;  %v7146_v62 = vld [vmem:[#allocation64_spill] sm:$0xff] }
 0x639   :  { %2760 = vmatprep.subr.bf16.mxu0 %v7122_v34  ;;  %2801 = vmatprep.subr.bf16.mxu1 %v7123_v53  ;;  %v7147_v34 = vld [vmem:[#allocation65_spill] sm:$0xff] }
 0x63c   :  { %2761 = vmatpush1.bf16.msra.mxu0 %v7124_v17  ;;  %2802 = vmatpush1.bf16.msra.mxu1 %v7125_v27 }
 0x63d   :  { %2762 = vmatprep.subr.bf16.mxu0 %v7126_v28  ;;  %2803 = vmatprep.subr.bf16.mxu1 %v7127_v44 }
 0x640   :  { %2763 = vmatpush1.bf16.msra.mxu0 %v7128_v21  ;;  %2804 = vmatpush1.bf16.msra.mxu1 %v7129_v43 }
 0x641   :  { %2764 = vmatprep.subr.bf16.mxu0 %v7130_v14  ;;  %2805 = vmatprep.subr.bf16.mxu1 %v7131_v29 }
 0x644   :  { %2765 = vmatpush1.bf16.msra.mxu0 %v7132_v39  ;;  %2806 = vmatpush1.bf16.msra.mxu1 %v7133_v57 }
 0x645   :  { %2766 = vmatprep.subr.bf16.mxu0 %v7134_v18  ;;  %2807 = vmatprep.subr.bf16.mxu1 %v7135_v36 }
 0x648   :  { %2767 = vmatpush1.bf16.msra.mxu0 %v7136_v32  ;;  %2808 = vmatpush1.bf16.msra.mxu1 %v7137_v23 }
 0x649   :  { %2768 = vmatprep.subr.bf16.mxu0 %v7138_v22  ;;  %2809 = vmatprep.subr.bf16.mxu1 %v7139_v15 }
 0x64c   :  { %2769 = vmatpush1.bf16.msra.mxu0 %v7140_v7  ;;  %2810 = vmatpush1.bf16.msra.mxu1 %v7141_v8 }
 0x64d   :  { %2770 = vmatprep.subr.bf16.mxu0 %v7142_v12  ;;  %2811 = vmatprep.subr.bf16.mxu1 %v7143_v13 }
 0x650   :  { %2771 = vmatpush1.bf16.msra.mxu0 %v7144_v42  ;;  %2812 = vmatpush1.bf16.msra.mxu1 %v7145_v52 }
 0x651   :  { %2838 = vmatprep.subr.bf16.mxu0 %v7146_v62  ;;  %2879 = vmatprep.subr.bf16.mxu1 %v7147_v34 }
 0x6c6   :  { %v2481_v53 = vpop.f32.mrb[68].mxu0  ;;  %v2522_v17 = vpop.f32.mrb[68].mxu1 }
 0x6c7   :  { %v2483_v27 = vpop.f32.mrb[69].mxu0  ;;  %v2524_v28 = vpop.f32.mrb[69].mxu1 }
 0x6c8   :  { %v2485_v44 = vpop.f32.mrb[70].mxu0  ;;  %v2526_v21 = vpop.f32.mrb[70].mxu1 }
 0x6c9   :  { %v2486_v43 = vpop.f32.mrb[71].mxu0  ;;  %v2527_v14 = vpop.f32.mrb[71].mxu1 }
 0x6e6   :  { %v2563_v29 = vpop.f32.mrb[72].mxu0  ;;  %v2604_v39 = vpop.f32.mrb[72].mxu1 }
 0x6e7   :  { %v2564_v57 = vadd.f32 %v2563_v29, %v2481_v53  ;;  %v2605_v18 = vadd.f32 %v2604_v39, %v2522_v17  ;;  %v2565_v36 = vpop.f32.mrb[73].mxu0  ;;  %v2606_v32 = vpop.f32.mrb[73].mxu1 }
 0x6e8   :  { %v2566_v23 = vadd.f32 %v2565_v36, %v2483_v27  ;;  %v2607_v22 = vadd.f32 %v2606_v32, %v2524_v28  ;;  %v2567_v15 = vpop.f32.mrb[74].mxu0  ;;  %v2608_v7 = vpop.f32.mrb[74].mxu1 }
 0x6e9   :  { %v2611_v8 = vadd.f32 %v2564_v57, %v5334_v0  ;;  %v2568_v12 = vpop.f32.mrb[75].mxu0  ;;  %v2609_v13 = vpop.f32.mrb[75].mxu1  ;;  %v2613_v17 = vadd.f32 %v2605_v18, %v5349_v55  ;;  %v7148_v15 = vld [vmem:[#allocation83_spill] sm:$0xff]  ;;  %v7149_v7 = vld [vmem:[#allocation84_spill] sm:$0xff] }
 0x6ea   :  { %v2612_v42 = vadd.f32 %v2566_v23, %v5338_v26  ;;  %v2614_v34 = vadd.f32 %v2607_v22, %v5344_v1 }
 0x6eb   :  { %v3844_v52 = vmul.f32 -1.442695, %v2611_v8 }
 0x6ec   :  { %v3845_v62 = vmul.f32 -1.442695, %v2612_v42  ;;  %v3846_v53 = vmul.f32 -1.442695, %v2614_v34  ;;  %v7151_v34 = vld [vmem:[#allocation86_spill] sm:$0xff] }
 0x6ed   :  { %4259 = vpow2.f32 %v3844_v52  ;;  %v7150_v52 = vld [vmem:[#allocation85_spill] sm:$0xff] }
 0x6ee   :  { %4261 = vpow2.f32 %v3845_v62 }
 0x6ef   :  { %4263 = vpow2.f32 %v3846_v53 }
 0x6f0   :  { %4265 = vtanh.f32 %v2613_v17 }
 0x6f7   :  { %v4260_v44 = vpop.eup %4259 }
 0x6f8   :  { %v4262_v27 = vpop.eup %4261  ;;  %v2618_v28 = vadd.f32 1.0, %v4260_v44 }
 0x6f9   :  { %v2624_v21 = vadd.f32 1.0, %v4262_v27  ;;  %v4264_v43 = vpop.eup %4263 }
 0x6fa   :  { %4267 = vrcp.f32 %v2618_v28  ;;  %v4266_v14 = vpop.eup %4265  ;;  %v2631_v36 = vadd.f32 1.0, %v4264_v43 }
 0x6fb   :  { %4269 = vrcp.f32 %v2624_v21 }
 0x6fc   :  { %4271 = vrcp.f32 %v2631_v36  ;;  %v6099_v36 = vld [vmem:[#allocation5] ss:$16 sps:$4 sm:$0xff]  }
 0x704   :  { %v4268_v29 = vpop.eup %4267 }
 0x705   :  { %v4270_v39 = vpop.eup %4269  ;;  %v2635_v57 = vmul.f32 %v4268_v29, %v4266_v14 }
 0x706   :  { %v2634_v32 = vmul.f32 %v4270_v39, %v5906_v11  ;;  %v2678_v23 = vpop.f32.mrb[76].mxu0  ;;  %v2719_v22 = vpop.f32.mrb[76].mxu1 }
 0x707   :  { %v2726_v18 = vadd.f32 %v2678_v23, %v7148_v15  ;;  %v2728_v8 = vadd.f32 %v2719_v22, %v7149_v7  ;;  %v2680_v12 = vpop.f32.mrb[77].mxu0  ;;  %v2721_v13 = vpop.f32.mrb[77].mxu1  ;;  %v6105_v7 = vld [vmem:[#allocation5 + $0x24] ss:$16 sps:$4 sm:$0xff]  }
 0x708   :  { %v6094_v42 = vadd.f32 %v2635_v57, %v2634_v32  ;;  %v2727_v62 = vadd.f32 %v2680_v12, %v7150_v52  ;;  %v2729_v53 = vadd.f32 %v2721_v13, %v7151_v34  ;;  %v2682_v17 = vpop.f32.mrb[78].mxu0  ;;  %v2723_v44 = vpop.f32.mrb[78].mxu1  ;;  %v6108_v12 = vld [vmem:[#allocation5 + $0x2c] ss:$16 sps:$4 sm:$0xff]   ;;  %v6116_v13 = vld [vmem:[#allocation5 + $0x28] ss:$16 sps:$4 sm:$0xff]  }
 0x709   :  { %v3847_v27 = vmul.f32 -1.442695, %v2726_v18  ;;  %v2683_v28 = vpop.f32.mrb[79].mxu0  ;;  %v2724_v11 = vpop.f32.mrb[79].mxu1  ;;  %v6102_v18 = vld [vmem:[#allocation5 + $0x8] ss:$16 sps:$4 sm:$0xff]  }
 0x70a   :  { %v3848_v21 = vmul.f32 -1.442695, %v2727_v62  ;;  %4273 = vtanh.f32 %v6094_v42  ;;  %v3849_v43 = vmul.f32 -1.442695, %v2729_v53  ;;  %v4272_v14 = vpop.eup %4271  ;;  %v6119_v52 = vld [vmem:[#allocation5 + $0x44] ss:$16 sps:$4 sm:$0xff]  }
 0x70b   :  { %4275 = vpow2.f32 %v3847_v27  ;;  %v6122_v62 = vld [vmem:[#allocation5 + $0x4c] ss:$16 sps:$4 sm:$0xff]   ;;  %v6125_v44 = vld [vmem:[#allocation5 + $0x40] ss:$16 sps:$4 sm:$0xff]   ;;  %v6128_v27 = vld [vmem:[#allocation5 + $0x48] ss:$16 sps:$4 sm:$0xff]  }
 0x70c   :  { %4277 = vpow2.f32 %v3848_v21 }
 0x70d   :  { %4279 = vpow2.f32 %v3849_v43  ;;  %v6131_v43 = vld [vmem:[#allocation5 + $0x64] ss:$16 sps:$4 sm:$0xff]  }
 0x70e   :  { %4281 = vtanh.f32 %v2728_v8  ;;  %v6113_v8 = vld [vmem:[#allocation5 + $0x20] ss:$16 sps:$4 sm:$0xff]  }
 0x714   :  { %v4274_v29 = vpop.eup %4273 }
 0x715   :  { %v4276_v39 = vpop.eup %4275  ;;  %v2638_v57 = vmul.f32 %v4274_v29, %v4272_v14  ;;  %v6134_v14 = vld [vmem:[#allocation5 + $0x6c] ss:$16 sps:$4 sm:$0xff]  }
 0x716   :  { %v4278_v32 = vpop.eup %4277  ;;  %v2733_v23 = vadd.f32 1.0, %v4276_v39 }
 0x717   :  { %v2739_v22 = vadd.f32 1.0, %v4278_v32  ;;  %v2755_v15 = vpack.c.bf16 %v2638_v57, %v2638_v57  ;;  %v4280_v34 = vpop.eup %4279  ;;  %v6140_v57 = vld [vmem:[#allocation5 + $0x60] ss:$16 sps:$4 sm:$0xff]   ;;  %v6143_v32 = vld [vmem:[#allocation5 + $0x68] ss:$16 sps:$4 sm:$0xff]  }
 0x718   :  { %4283 = vrcp.f32 %v2733_v23  ;;  %v4282_v53 = vpop.eup %4281  ;;  %v2746_v21 = vadd.f32 1.0, %v4280_v34  ;;  %v6146_v23 = vld [vmem:[#allocation5 + $0x84] ss:$16 sps:$4 sm:$0xff]  }
 0x719   :  { %4285 = vrcp.f32 %v2739_v22  ;;  %2789 = vmatmul.mubr.bf16.vlgmr.msra.gmra.mrb[80].mxu0 %v2755_v15  ;;  %2830 = vmatmul.mubr.bf16.vlgmr.msra.gmra.mrb[80].mxu1 %v2755_v15  ;;  %v6149_v22 = vld [vmem:[#allocation5 + $0x8c] ss:$16 sps:$4 sm:$0xff]   ;;  %v6156_v15 = vld [vmem:[#allocation5 + $0x88] ss:$16 sps:$4 sm:$0xff]   ;;  %v6159_v34 = vld [vmem:[#allocation5 + $0xa4] ss:$16 sps:$4 sm:$0xff]  }
 0x71a   :  { %2839 = vmatpush1.bf16.msra.mxu0 %v6099_v36  ;;  %2880 = vmatpush1.bf16.msra.mxu1 %v6102_v18  ;;  %4287 = vrcp.f32 %v2746_v21  ;;  %7152 = vst [vmem:[#allocation20_spill] sm:$0xff] %v6149_v22  ;;  %7154 = vst [vmem:[#allocation22_spill] sm:$0xff] %v6156_v15  ;;  %v6174_v21 = vld [vmem:[#allocation5 + $0xcc] ss:$16 sps:$4 sm:$0xff]  }
 0x71b   :  { %2840 = vmatprep.subr.bf16.mxu0 %v6105_v7  ;;  %2881 = vmatprep.subr.bf16.mxu1 %v6108_v12  ;;  %7155 = vst [vmem:[#allocation23_spill] sm:$0xff] %v6159_v34  ;;  %7160 = vst [vmem:[#allocation28_spill] sm:$0xff] %v6174_v21 }
 0x71c   :  { %2870 = vmatprep.mubr.bf16.mxu0 %v6832_v35  ;;  %2911 = vmatprep.mubr.bf16.mxu1 %v6832_v35 }
 0x71e   :  { %2841 = vmatpush1.bf16.msra.mxu0 %v6113_v8  ;;  %2882 = vmatpush1.bf16.msra.mxu1 %v6116_v13 }
 0x71f   :  { %2842 = vmatprep.subr.bf16.mxu0 %v6119_v52  ;;  %2883 = vmatprep.subr.bf16.mxu1 %v6122_v62 }
 0x722   :  { %v4284_v17 = vpop.eup %4283  ;;  %2843 = vmatpush1.bf16.msra.mxu0 %v6125_v44  ;;  %2884 = vmatpush1.bf16.msra.mxu1 %v6128_v27 }
 0x723   :  { %v4286_v28 = vpop.eup %4285  ;;  %v2750_v11 = vmul.f32 %v4284_v17, %v4282_v53  ;;  %2844 = vmatprep.subr.bf16.mxu0 %v6131_v43  ;;  %2885 = vmatprep.subr.bf16.mxu1 %v6134_v14  ;;  %v6162_v53 = vld [vmem:[#allocation5 + $0xac] ss:$16 sps:$4 sm:$0xff]   ;;  %v6165_v17 = vld [vmem:[#allocation5 + $0xa0] ss:$16 sps:$4 sm:$0xff]  }
 0x724   :  { %v2749_v29 = vmul.f32 %v4286_v28, %v5926_v6  ;;  %v6153_v6 = vld [vmem:[#allocation5 + $0x80] ss:$16 sps:$4 sm:$0xff]   ;;  %7156 = vst [vmem:[#allocation24_spill] sm:$0xff] %v6162_v53  ;;  %7157 = vst [vmem:[#allocation25_spill] sm:$0xff] %v6165_v17  ;;  %v6168_v28 = vld [vmem:[#allocation5 + $0xa8] ss:$16 sps:$4 sm:$0xff]  }
 0x725   :  { %7153 = vst [vmem:[#allocation21_spill] sm:$0xff] %v6153_v6  ;;  %7158 = vst [vmem:[#allocation26_spill] sm:$0xff] %v6168_v28 }
 0x726   :  { %v6138_v39 = vadd.f32 %v2750_v11, %v2749_v29  ;;  %2845 = vmatpush1.bf16.msra.mxu0 %v6140_v57  ;;  %2886 = vmatpush1.bf16.msra.mxu1 %v6143_v32  ;;  %v6171_v11 = vld [vmem:[#allocation5 + $0xc4] ss:$16 sps:$4 sm:$0xff]   ;;  %v4288_v29 = vpop.eup %4287 }
 0x727   :  { %2846 = vmatprep.subr.bf16.mxu0 %v6146_v23  ;;  %2887 = vmatprep.subr.bf16.mxu1 %v6149_v22  ;;  %7159 = vst [vmem:[#allocation27_spill] sm:$0xff] %v6171_v11  ;;  %v6192_v22 = vld [vmem:[#allocation5 + $0xe8] ss:$16 sps:$4 sm:$0xff]  }
 0x728   :  { %4289 = vtanh.f32 %v6138_v39 }
 0x72a   :  { %2847 = vmatpush1.bf16.msra.mxu0 %v6153_v6  ;;  %2888 = vmatpush1.bf16.msra.mxu1 %v6156_v15  ;;  %v6177_v15 = vld [vmem:[#allocation5 + $0xc0] ss:$16 sps:$4 sm:$0xff]  }
 0x72b   :  { %2848 = vmatprep.subr.bf16.mxu0 %v6159_v34  ;;  %2889 = vmatprep.subr.bf16.mxu1 %v6162_v53  ;;  %v6180_v53 = vld [vmem:[#allocation5 + $0xc8] ss:$16 sps:$4 sm:$0xff]   ;;  %v6189_v6 = vld [vmem:[#allocation5 + $0xe0] ss:$16 sps:$4 sm:$0xff]  }
 0x72e   :  { %2849 = vmatpush1.bf16.msra.mxu0 %v6165_v17  ;;  %2890 = vmatpush1.bf16.msra.mxu1 %v6168_v28  ;;  %v6183_v17 = vld [vmem:[#allocation5 + $0xe4] ss:$16 sps:$4 sm:$0xff]   ;;  %v6186_v28 = vld [vmem:[#allocation5 + $0xec] ss:$16 sps:$4 sm:$0xff]  }
 0x72f   :  { %2850 = vmatprep.subr.bf16.mxu0 %v6171_v11  ;;  %2891 = vmatprep.subr.bf16.mxu1 %v6174_v21 }
 0x732   :  { %v4290_v34 = vpop.eup %4289  ;;  %2851 = vmatpush1.bf16.msra.mxu0 %v6177_v15  ;;  %2892 = vmatpush1.bf16.msra.mxu1 %v6180_v53 }
 0x733   :  { %2852 = vmatprep.subr.bf16.mxu0 %v6183_v17  ;;  %2893 = vmatprep.subr.bf16.mxu1 %v6186_v28  ;;  %v2753_v11 = vmul.f32 %v4290_v34, %v4288_v29  ;;  %v6229_v34 = vld [vmem:[#allocation7 + $0x4] ss:$16 sps:$4 sm:$0xff]   ;;  %v6235_v29 = vld [vmem:[#allocation7] ss:$16 sps:$4 sm:$0xff]  }
 0x734   :  { %7161 = vst [vmem:[#allocation29_spill] sm:$0xff] %v6229_v34  ;;  %7163 = vst [vmem:[#allocation31_spill] sm:$0xff] %v6235_v29 }
 0x735   :  { %v2754_v21 = vpack.c.bf16 %v2753_v11, %v2753_v11  ;;  %v6232_v11 = vld [vmem:[#allocation7 + $0xc] ss:$16 sps:$4 sm:$0xff]  }
 0x736   :  { %2853 = vmatpush1.bf16.msra.mxu0 %v6189_v6  ;;  %2894 = vmatpush1.bf16.msra.mxu1 %v6192_v22  ;;  %7162 = vst [vmem:[#allocation30_spill] sm:$0xff] %v6232_v11 }
 0x737   :  { %2953 = vmatprep.subr.bf16.mxu0 %v5949_v40  ;;  %2994 = vmatprep.subr.bf16.mxu1 %v5952_v41 }
 0x739   :  { %2871 = vmatmul.mubr.bf16.vlgmr.msra.gmra.mrb[84].mxu0 %v2754_v21  ;;  %2912 = vmatmul.mubr.bf16.vlgmr.msra.gmra.mrb[84].mxu1 %v2754_v21 }
 0x73a   :  { %2954 = vmatpush1.bf16.msra.mxu0 %v5957_v45  ;;  %2995 = vmatpush1.bf16.msra.mxu1 %v5960_v46 }
 0x73b   :  { %2955 = vmatprep.subr.bf16.mxu0 %v5963_v47  ;;  %2996 = vmatprep.subr.bf16.mxu1 %v5966_v48 }
 0x73c   :  { %2985 = vmatprep.mubr.bf16.mxu0 %v6832_v35  ;;  %3026 = vmatprep.mubr.bf16.mxu1 %v6832_v35 }
 0x73e   :  { %2956 = vmatpush1.bf16.msra.mxu0 %v5971_v16  ;;  %2997 = vmatpush1.bf16.msra.mxu1 %v5974_v60 }
 0x73f   :  { %2957 = vmatprep.subr.bf16.mxu0 %v5977_v50  ;;  %2998 = vmatprep.subr.bf16.mxu1 %v5980_v51 }
 0x742   :  { %2958 = vmatpush1.bf16.msra.mxu0 %v5983_v58  ;;  %2999 = vmatpush1.bf16.msra.mxu1 %v5986_v59 }
 0x743   :  { %2959 = vmatprep.subr.bf16.mxu0 %v5989_v61  ;;  %3000 = vmatprep.subr.bf16.mxu1 %v5992_v63 }
 0x746   :  { %2960 = vmatpush1.bf16.msra.mxu0 %v5995_v4  ;;  %3001 = vmatpush1.bf16.msra.mxu1 %v5998_v5 }
 0x747   :  { %2961 = vmatprep.subr.bf16.mxu0 %v6001_v9  ;;  %3002 = vmatprep.subr.bf16.mxu1 %v6004_v10 }
 0x74a   :  { %2962 = vmatpush1.bf16.msra.mxu0 %v6007_v37  ;;  %3003 = vmatpush1.bf16.msra.mxu1 %v6010_v38 }
 0x74b   :  { %2963 = vmatprep.subr.bf16.mxu0 %v6013_v24  ;;  %3004 = vmatprep.subr.bf16.mxu1 %v6016_v56 }
 0x74e   :  { %2964 = vmatpush1.bf16.msra.mxu0 %v6019_v3  ;;  %3005 = vmatpush1.bf16.msra.mxu1 %v6022_v19 }
 0x74f   :  { %2965 = vmatprep.subr.bf16.mxu0 %v6025_v30  ;;  %3006 = vmatprep.subr.bf16.mxu1 %v6028_v49 }
 0x752   :  { %2966 = vmatpush1.bf16.msra.mxu0 %v6031_v25  ;;  %3007 = vmatpush1.bf16.msra.mxu1 %v6034_v2 }
 0x753   :  { %2967 = vmatprep.subr.bf16.mxu0 %v6037_v54  ;;  %3008 = vmatprep.subr.bf16.mxu1 %v6040_v31  ;;  %v6238_v54 = vld [vmem:[#allocation7 + $0x8] ss:$16 sps:$4 sm:$0xff]  }
 0x754   :  { %7164 = vst [vmem:[#allocation32_spill] sm:$0xff] %v6238_v54 }
 0x756   :  { %2968 = vmatpush1.bf16.msra.mxu0 %v6043_v33  ;;  %3009 = vmatpush1.bf16.msra.mxu1 %v6046_v20  ;;  %v6241_v33 = vld [vmem:[#allocation7 + $0x24] ss:$16 sps:$4 sm:$0xff]   ;;  %v6244_v20 = vld [vmem:[#allocation7 + $0x2c] ss:$16 sps:$4 sm:$0xff]  }
 0x757   :  { %3065 = vmatprep.subr.bf16.mxu0 %v6229_v34  ;;  %3106 = vmatprep.subr.bf16.mxu1 %v6232_v11  ;;  %7165 = vst [vmem:[#allocation33_spill] sm:$0xff] %v6241_v33  ;;  %7166 = vst [vmem:[#allocation34_spill] sm:$0xff] %v6244_v20  ;;  %v6264_v11 = vld [vmem:[#allocation7 + $0x48] ss:$16 sps:$4 sm:$0xff]  }
 0x758   :  { %7172 = vst [vmem:[#allocation70_spill] sm:$0xff] %v6264_v11 }
 0x759   :  { %2986 = vmatmul.mubr.bf16.vlgmr.msra.gmra.mrb[88].mxu0 %v2754_v21  ;;  %3027 = vmatmul.mubr.bf16.vlgmr.msra.gmra.mrb[88].mxu1 %v2754_v21  ;;  %v6249_v21 = vld [vmem:[#allocation7 + $0x20] ss:$16 sps:$4 sm:$0xff]  }
 0x75a   :  { %3066 = vmatpush1.bf16.msra.mxu0 %v6235_v29  ;;  %3107 = vmatpush1.bf16.msra.mxu1 %v6238_v54  ;;  %7167 = vst [vmem:[#allocation35_spill] sm:$0xff] %v6249_v21  ;;  %v6252_v29 = vld [vmem:[#allocation7 + $0x28] ss:$16 sps:$4 sm:$0xff]   ;;  %v6255_v54 = vld [vmem:[#allocation7 + $0x44] ss:$16 sps:$4 sm:$0xff]  }
 0x75b   :  { %3067 = vmatprep.subr.bf16.mxu0 %v6241_v33  ;;  %3108 = vmatprep.subr.bf16.mxu1 %v6244_v20  ;;  %7168 = vst [vmem:[#allocation66_spill] sm:$0xff] %v6252_v29  ;;  %7169 = vst [vmem:[#allocation67_spill] sm:$0xff] %v6255_v54  ;;  %v6258_v33 = vld [vmem:[#allocation7 + $0x4c] ss:$16 sps:$4 sm:$0xff]   ;;  %v6261_v20 = vld [vmem:[#allocation7 + $0x40] ss:$16 sps:$4 sm:$0xff]  }
 0x75c   :  { %3097 = vmatprep.mubr.bf16.mxu0 %v6832_v35  ;;  %3138 = vmatprep.mubr.bf16.mxu1 %v6832_v35  ;;  %7170 = vst [vmem:[#allocation68_spill] sm:$0xff] %v6258_v33  ;;  %7171 = vst [vmem:[#allocation69_spill] sm:$0xff] %v6261_v20 }
 0x75e   :  { %3068 = vmatpush1.bf16.msra.mxu0 %v6249_v21  ;;  %3109 = vmatpush1.bf16.msra.mxu1 %v6252_v29  ;;  %v6267_v21 = vld [vmem:[#allocation7 + $0x64] ss:$16 sps:$4 sm:$0xff]   ;;  %v6270_v29 = vld [vmem:[#allocation7 + $0x6c] ss:$16 sps:$4 sm:$0xff]  }
 0x75f   :  { %3069 = vmatprep.subr.bf16.mxu0 %v6255_v54  ;;  %3110 = vmatprep.subr.bf16.mxu1 %v6258_v33  ;;  %7173 = vst [vmem:[#allocation36_spill] sm:$0xff] %v6267_v21  ;;  %7174 = vst [vmem:[#allocation79_spill] sm:$0xff] %v6270_v29  ;;  %v6273_v54 = vld [vmem:[#allocation7 + $0x60] ss:$16 sps:$4 sm:$0xff]   ;;  %v6276_v33 = vld [vmem:[#allocation7 + $0x68] ss:$16 sps:$4 sm:$0xff]  }
 0x760   :  { %7175 = vst [vmem:[#allocation80_spill] sm:$0xff] %v6273_v54  ;;  %7176 = vst [vmem:[#allocation81_spill] sm:$0xff] %v6276_v33 }
 0x762   :  { %3070 = vmatpush1.bf16.msra.mxu0 %v6261_v20  ;;  %3111 = vmatpush1.bf16.msra.mxu1 %v6264_v11  ;;  %v6279_v20 = vld [vmem:[#allocation7 + $0x84] ss:$16 sps:$4 sm:$0xff]   ;;  %v6282_v11 = vld [vmem:[#allocation7 + $0x8c] ss:$16 sps:$4 sm:$0xff]  }
 0x763   :  { %3071 = vmatprep.subr.bf16.mxu0 %v6267_v21  ;;  %3112 = vmatprep.subr.bf16.mxu1 %v6270_v29  ;;  %7177 = vst [vmem:[#allocation82_spill] sm:$0xff] %v6279_v20  ;;  %7178 = vst [vmem:[#allocation37_spill] sm:$0xff] %v6282_v11  ;;  %v6285_v21 = vld [vmem:[#allocation7 + $0x80] ss:$16 sps:$4 sm:$0xff]   ;;  %v6288_v29 = vld [vmem:[#allocation7 + $0x88] ss:$16 sps:$4 sm:$0xff]  }
 0x764   :  { %7179 = vst [vmem:[#allocation38_spill] sm:$0xff] %v6285_v21  ;;  %7180 = vst [vmem:[#allocation39_spill] sm:$0xff] %v6288_v29 }
 0x766   :  { %3072 = vmatpush1.bf16.msra.mxu0 %v6273_v54  ;;  %3113 = vmatpush1.bf16.msra.mxu1 %v6276_v33  ;;  %v6291_v54 = vld [vmem:[#allocation7 + $0xa4] ss:$16 sps:$4 sm:$0xff]   ;;  %v6294_v33 = vld [vmem:[#allocation7 + $0xac] ss:$16 sps:$4 sm:$0xff]  }
 0x767   :  { %3073 = vmatprep.subr.bf16.mxu0 %v6279_v20  ;;  %3114 = vmatprep.subr.bf16.mxu1 %v6282_v11  ;;  %7181 = vst [vmem:[#allocation40_spill] sm:$0xff] %v6291_v54  ;;  %7182 = vst [vmem:[#allocation41_spill] sm:$0xff] %v6294_v33  ;;  %v6297_v20 = vld [vmem:[#allocation7 + $0xa0] ss:$16 sps:$4 sm:$0xff]   ;;  %v6300_v11 = vld [vmem:[#allocation7 + $0xa8] ss:$16 sps:$4 sm:$0xff]  }
 0x768   :  { %7183 = vst [vmem:[#allocation42_spill] sm:$0xff] %v6297_v20  ;;  %7184 = vst [vmem:[#allocation43_spill] sm:$0xff] %v6300_v11 }
 0x76a   :  { %3074 = vmatpush1.bf16.msra.mxu0 %v6285_v21  ;;  %3115 = vmatpush1.bf16.msra.mxu1 %v6288_v29  ;;  %v6303_v21 = vld [vmem:[#allocation7 + $0xc4] ss:$16 sps:$4 sm:$0xff]   ;;  %v6306_v29 = vld [vmem:[#allocation7 + $0xcc] ss:$16 sps:$4 sm:$0xff]  }
 0x76b   :  { %3075 = vmatprep.subr.bf16.mxu0 %v6291_v54  ;;  %3116 = vmatprep.subr.bf16.mxu1 %v6294_v33  ;;  %7185 = vst [vmem:[#allocation44_spill] sm:$0xff] %v6303_v21  ;;  %7186 = vst [vmem:[#allocation45_spill] sm:$0xff] %v6306_v29  ;;  %v6309_v54 = vld [vmem:[#allocation7 + $0xc0] ss:$16 sps:$4 sm:$0xff]   ;;  %v6312_v33 = vld [vmem:[#allocation7 + $0xc8] ss:$16 sps:$4 sm:$0xff]  }
 0x76c   :  { %7187 = vst [vmem:[#allocation46_spill] sm:$0xff] %v6309_v54  ;;  %7188 = vst [vmem:[#allocation47_spill] sm:$0xff] %v6312_v33 }
 0x76e   :  { %3076 = vmatpush1.bf16.msra.mxu0 %v6297_v20  ;;  %3117 = vmatpush1.bf16.msra.mxu1 %v6300_v11  ;;  %v6315_v20 = vld [vmem:[#allocation7 + $0xe4] ss:$16 sps:$4 sm:$0xff]   ;;  %v6318_v11 = vld [vmem:[#allocation7 + $0xec] ss:$16 sps:$4 sm:$0xff]  }
 0x76f   :  { %3077 = vmatprep.subr.bf16.mxu0 %v6303_v21  ;;  %3118 = vmatprep.subr.bf16.mxu1 %v6306_v29  ;;  %7189 = vst [vmem:[#allocation48_spill] sm:$0xff] %v6315_v20  ;;  %7190 = vst [vmem:[#allocation49_spill] sm:$0xff] %v6318_v11  ;;  %v6321_v21 = vld [vmem:[#allocation7 + $0xe0] ss:$16 sps:$4 sm:$0xff]   ;;  %v6324_v29 = vld [vmem:[#allocation7 + $0xe8] ss:$16 sps:$4 sm:$0xff]  }
 0x770   :  { %7191 = vst [vmem:[#allocation50_spill] sm:$0xff] %v6321_v21  ;;  %7192 = vst [vmem:[#allocation51_spill] sm:$0xff] %v6324_v29 }
 0x772   :  { %3078 = vmatpush1.bf16.msra.mxu0 %v6309_v54  ;;  %3119 = vmatpush1.bf16.msra.mxu1 %v6312_v33  ;;  %v6327_v54 = vld [vmem:[#allocation5 + $0x4] ss:$16 sps:$4 sm:$0xff]   ;;  %v6330_v33 = vld [vmem:[#allocation5 + $0xc] ss:$16 sps:$4 sm:$0xff]  }
 0x773   :  { %3079 = vmatprep.subr.bf16.mxu0 %v6315_v20  ;;  %3120 = vmatprep.subr.bf16.mxu1 %v6318_v11  ;;  %7193 = vst [vmem:[#allocation52_spill] sm:$0xff] %v6327_v54  ;;  %7194 = vst [vmem:[#allocation53_spill] sm:$0xff] %v6330_v33 }
 0x776   :  { %3080 = vmatpush1.bf16.msra.mxu0 %v6321_v21  ;;  %3121 = vmatpush1.bf16.msra.mxu1 %v6324_v29 }
 0x777   :  { %3147 = vmatprep.subr.bf16.mxu0 %v6327_v54  ;;  %3188 = vmatprep.subr.bf16.mxu1 %v6330_v33 }
 0x7ec   :  { %v2790_v20 = vpop.f32.mrb[80].mxu0  ;;  %v2831_v34 = vpop.f32.mrb[80].mxu1 }
 0x7ed   :  { %v2792_v31 = vpop.f32.mrb[81].mxu0  ;;  %v2833_v11 = vpop.f32.mrb[81].mxu1 }
 0x7ee   :  { %v2794_v2 = vpop.f32.mrb[82].mxu0  ;;  %v2835_v25 = vpop.f32.mrb[82].mxu1 }
 0x7ef   :  { %v2795_v49 = vpop.f32.mrb[83].mxu0  ;;  %v2836_v21 = vpop.f32.mrb[83].mxu1 }
 0x80c   :  { %v2872_v30 = vpop.f32.mrb[84].mxu0  ;;  %v2913_v19 = vpop.f32.mrb[84].mxu1 }
 0x80d   :  { %v2873_v3 = vadd.f32 %v2872_v30, %v2790_v20  ;;  %v2914_v29 = vadd.f32 %v2913_v19, %v2831_v34  ;;  %v2874_v56 = vpop.f32.mrb[85].mxu0  ;;  %v2915_v24 = vpop.f32.mrb[85].mxu1  ;;  %v7195_v34 = vld [vmem:[#allocation87_spill] sm:$0xff] }
 0x80e   :  { %v2875_v38 = vadd.f32 %v2874_v56, %v2792_v31  ;;  %v2916_v54 = vadd.f32 %v2915_v24, %v2833_v11  ;;  %v2876_v37 = vpop.f32.mrb[86].mxu0  ;;  %v2917_v10 = vpop.f32.mrb[86].mxu1 }
 0x80f   :  { %v2920_v33 = vadd.f32 %v2873_v3, %v5334_v0  ;;  %v2877_v9 = vpop.f32.mrb[87].mxu0  ;;  %v2918_v5 = vpop.f32.mrb[87].mxu1  ;;  %v2922_v19 = vadd.f32 %v2914_v29, %v5349_v55  ;;  %v7196_v29 = vld [vmem:[#allocation88_spill] sm:$0xff] }
 0x810   :  { %v2921_v4 = vadd.f32 %v2875_v38, %v5338_v26  ;;  %v2923_v49 = vadd.f32 %v2916_v54, %v5344_v1 }
 0x811   :  { %v3850_v2 = vmul.f32 -1.442695, %v2920_v33 }
 0x812   :  { %v3851_v25 = vmul.f32 -1.442695, %v2921_v4  ;;  %v3852_v30 = vmul.f32 -1.442695, %v2923_v49 }
 0x813   :  { %4291 = vpow2.f32 %v3850_v2 }
 0x814   :  { %4293 = vpow2.f32 %v3851_v25 }
 0x815   :  { %4295 = vpow2.f32 %v3852_v30  ;;  %v7197_v30 = vld [vmem:[#allocation89_spill] sm:$0xff] }
 0x816   :  { %4297 = vtanh.f32 %v2922_v19 }
 0x81d   :  { %v4292_v20 = vpop.eup %4291 }
 0x81e   :  { %v4294_v56 = vpop.eup %4293  ;;  %v2927_v24 = vadd.f32 1.0, %v4292_v20  ;;  %v7198_v20 = vld [vmem:[#allocation90_spill] sm:$0xff] }
 0x81f   :  { %v2933_v10 = vadd.f32 1.0, %v4294_v56  ;;  %v4296_v5 = vpop.eup %4295 }
 0x820   :  { %4299 = vrcp.f32 %v2927_v24  ;;  %v4298_v9 = vpop.eup %4297  ;;  %v2940_v3 = vadd.f32 1.0, %v4296_v5 }
 0x821   :  { %4301 = vrcp.f32 %v2933_v10 }
 0x822   :  { %4303 = vrcp.f32 %v2940_v3 }
 0x82a   :  { %v4300_v37 = vpop.eup %4299 }
 0x82b   :  { %v4302_v38 = vpop.eup %4301  ;;  %v2944_v4 = vmul.f32 %v4300_v37, %v4298_v9 }
 0x82c   :  { %v2943_v31 = vmul.f32 %v4302_v38, %v6094_v42  ;;  %v2987_v54 = vpop.f32.mrb[88].mxu0  ;;  %v3028_v33 = vpop.f32.mrb[88].mxu1 }
 0x82d   :  { %v3035_v11 = vadd.f32 %v2987_v54, %v7195_v34  ;;  %v3037_v21 = vadd.f32 %v3028_v33, %v7196_v29  ;;  %v2989_v2 = vpop.f32.mrb[89].mxu0  ;;  %v3030_v25 = vpop.f32.mrb[89].mxu1 }
 0x82e   :  { %v6340_v49 = vadd.f32 %v2944_v4, %v2943_v31  ;;  %v3036_v19 = vadd.f32 %v2989_v2, %v7197_v30  ;;  %v3038_v56 = vadd.f32 %v3030_v25, %v7198_v20  ;;  %v2991_v24 = vpop.f32.mrb[90].mxu0  ;;  %v3032_v10 = vpop.f32.mrb[90].mxu1 }
 0x82f   :  { %v3853_v5 = vmul.f32 -1.442695, %v3035_v11  ;;  %v2992_v9 = vpop.f32.mrb[91].mxu0  ;;  %v3033_v42 = vpop.f32.mrb[91].mxu1  ;;  %v7199_v10 = vld [vmem:[#allocation20_spill] sm:$0xff] }
 0x830   :  { %v3854_v37 = vmul.f32 -1.442695, %v3036_v19  ;;  %4305 = vtanh.f32 %v6340_v49  ;;  %v3855_v38 = vmul.f32 -1.442695, %v3038_v56  ;;  %v4304_v54 = vpop.eup %4303  ;;  %v7201_v9 = vld [vmem:[#allocation22_spill] sm:$0xff]  ;;  %v7202_v42 = vld [vmem:[#allocation23_spill] sm:$0xff] }
 0x831   :  { %4307 = vpow2.f32 %v3853_v5  ;;  %v7200_v5 = vld [vmem:[#allocation21_spill] sm:$0xff] }
 0x832   :  { %4309 = vpow2.f32 %v3854_v37  ;;  %v7204_v37 = vld [vmem:[#allocation25_spill] sm:$0xff] }
 0x833   :  { %4311 = vpow2.f32 %v3855_v38  ;;  %v7205_v38 = vld [vmem:[#allocation26_spill] sm:$0xff] }
 0x834   :  { %4313 = vtanh.f32 %v3037_v21 }
 0x83a   :  { %v4306_v33 = vpop.eup %4305 }
 0x83b   :  { %v4308_v4 = vpop.eup %4307  ;;  %v2947_v31 = vmul.f32 %v4306_v33, %v4304_v54  ;;  %v7206_v54 = vld [vmem:[#allocation27_spill] sm:$0xff]  ;;  %v7207_v33 = vld [vmem:[#allocation28_spill] sm:$0xff] }
 0x83c   :  { %v4310_v34 = vpop.eup %4309  ;;  %v3042_v29 = vadd.f32 1.0, %v4308_v4 }
 0x83d   :  { %v3048_v2 = vadd.f32 1.0, %v4310_v34  ;;  %v3064_v25 = vpack.c.bf16 %v2947_v31, %v2947_v31  ;;  %v4312_v3 = vpop.eup %4311 }
 0x83e   :  { %4315 = vrcp.f32 %v3042_v29  ;;  %v4314_v11 = vpop.eup %4313  ;;  %v3055_v20 = vadd.f32 1.0, %v4312_v3  ;;  %v7224_v3 = vld [vmem:[#allocation18_spill] sm:$0xff] }
 0x83f   :  { %4317 = vrcp.f32 %v3048_v2  ;;  %3098 = vmatmul.mubr.bf16.vlgmr.msra.gmra.mrb[92].mxu0 %v3064_v25  ;;  %3139 = vmatmul.mubr.bf16.vlgmr.msra.gmra.mrb[92].mxu1 %v3064_v25  ;;  %v7222_v2 = vld [vmem:[#allocation16_spill] sm:$0xff]  ;;  %v7223_v25 = vld [vmem:[#allocation17_spill] sm:$0xff] }
 0x840   :  { %3148 = vmatpush1.bf16.msra.mxu0 %v6099_v36  ;;  %3189 = vmatpush1.bf16.msra.mxu1 %v6102_v18  ;;  %4319 = vrcp.f32 %v3055_v20  ;;  %v7229_v20 = vld [vmem:[#allocation32_spill] sm:$0xff] }
 0x841   :  { %3149 = vmatprep.subr.bf16.mxu0 %v6105_v7  ;;  %3190 = vmatprep.subr.bf16.mxu1 %v6108_v12 }
 0x842   :  { %3179 = vmatprep.mubr.bf16.mxu0 %v6832_v35  ;;  %3220 = vmatprep.mubr.bf16.mxu1 %v6832_v35 }
 0x844   :  { %3150 = vmatpush1.bf16.msra.mxu0 %v6113_v8  ;;  %3191 = vmatpush1.bf16.msra.mxu1 %v6116_v13 }
 0x845   :  { %3151 = vmatprep.subr.bf16.mxu0 %v6119_v52  ;;  %3192 = vmatprep.subr.bf16.mxu1 %v6122_v62 }
 0x848   :  { %v4316_v21 = vpop.eup %4315  ;;  %3152 = vmatpush1.bf16.msra.mxu0 %v6125_v44  ;;  %3193 = vmatpush1.bf16.msra.mxu1 %v6128_v27 }
 0x849   :  { %v4318_v30 = vpop.eup %4317  ;;  %v3059_v19 = vmul.f32 %v4316_v21, %v4314_v11  ;;  %3153 = vmatprep.subr.bf16.mxu0 %v6131_v43  ;;  %3194 = vmatprep.subr.bf16.mxu1 %v6134_v14  ;;  %v7225_v11 = vld [vmem:[#allocation19_spill] sm:$0xff]  ;;  %v7226_v21 = vld [vmem:[#allocation29_spill] sm:$0xff] }
 0x84a   :  { %v3058_v56 = vmul.f32 %v4318_v30, %v6138_v39  ;;  %v7203_v39 = vld [vmem:[#allocation24_spill] sm:$0xff]  ;;  %v4320_v4 = vpop.eup %4319  ;;  %v7227_v30 = vld [vmem:[#allocation30_spill] sm:$0xff] }
 0x84c   :  { %v6360_v24 = vadd.f32 %v3059_v19, %v3058_v56  ;;  %3154 = vmatpush1.bf16.msra.mxu0 %v6140_v57  ;;  %3195 = vmatpush1.bf16.msra.mxu1 %v6143_v32  ;;  %v7228_v19 = vld [vmem:[#allocation31_spill] sm:$0xff]  ;;  %v7230_v56 = vld [vmem:[#allocation33_spill] sm:$0xff] }
 0x84d   :  { %3155 = vmatprep.subr.bf16.mxu0 %v6146_v23  ;;  %3196 = vmatprep.subr.bf16.mxu1 %v7199_v10 }
 0x84e   :  { %4321 = vtanh.f32 %v6360_v24 }
 0x850   :  { %3156 = vmatpush1.bf16.msra.mxu0 %v7200_v5  ;;  %3197 = vmatpush1.bf16.msra.mxu1 %v7201_v9 }
 0x851   :  { %3157 = vmatprep.subr.bf16.mxu0 %v7202_v42  ;;  %3198 = vmatprep.subr.bf16.mxu1 %v7203_v39 }
 0x854   :  { %3158 = vmatpush1.bf16.msra.mxu0 %v7204_v37  ;;  %3199 = vmatpush1.bf16.msra.mxu1 %v7205_v38 }
 0x855   :  { %3159 = vmatprep.subr.bf16.mxu0 %v7206_v54  ;;  %3200 = vmatprep.subr.bf16.mxu1 %v7207_v33 }
 0x858   :  { %v4322_v31 = vpop.eup %4321  ;;  %3160 = vmatpush1.bf16.msra.mxu0 %v6177_v15  ;;  %3201 = vmatpush1.bf16.msra.mxu1 %v6180_v53 }
 0x859   :  { %3161 = vmatprep.subr.bf16.mxu0 %v6183_v17  ;;  %3202 = vmatprep.subr.bf16.mxu1 %v6186_v28  ;;  %v3062_v34 = vmul.f32 %v4322_v31, %v4320_v4  ;;  %v7231_v4 = vld [vmem:[#allocation34_spill] sm:$0xff]  ;;  %v7232_v31 = vld [vmem:[#allocation35_spill] sm:$0xff] }
 0x85b   :  { %v3063_v29 = vpack.c.bf16 %v3062_v34, %v3062_v34  ;;  %v7233_v34 = vld [vmem:[#allocation66_spill] sm:$0xff] }
 0x85c   :  { %3162 = vmatpush1.bf16.msra.mxu0 %v6189_v6  ;;  %3203 = vmatpush1.bf16.msra.mxu1 %v6192_v22 }
 0x85d   :  { %3262 = vmatprep.subr.bf16.mxu0 %v5949_v40  ;;  %3303 = vmatprep.subr.bf16.mxu1 %v5952_v41  ;;  %v7208_v40 = vld [vmem:[#allocation71_spill] sm:$0xff]  ;;  %v7209_v41 = vld [vmem:[#allocation72_spill] sm:$0xff] }
 0x85f   :  { %3180 = vmatmul.mubr.bf16.vlgmr.msra.gmra.mrb[96].mxu0 %v3063_v29  ;;  %3221 = vmatmul.mubr.bf16.vlgmr.msra.gmra.mrb[96].mxu1 %v3063_v29 }
 0x860   :  { %3263 = vmatpush1.bf16.msra.mxu0 %v5957_v45  ;;  %3304 = vmatpush1.bf16.msra.mxu1 %v5960_v46  ;;  %v7210_v45 = vld [vmem:[#allocation73_spill] sm:$0xff]  ;;  %v7211_v46 = vld [vmem:[#allocation74_spill] sm:$0xff] }
 0x861   :  { %3264 = vmatprep.subr.bf16.mxu0 %v5963_v47  ;;  %3305 = vmatprep.subr.bf16.mxu1 %v5966_v48  ;;  %v7212_v47 = vld [vmem:[#allocation75_spill] sm:$0xff]  ;;  %v7213_v48 = vld [vmem:[#allocation76_spill] sm:$0xff] }
 0x862   :  { %3294 = vmatprep.mubr.bf16.mxu0 %v6832_v35  ;;  %3335 = vmatprep.mubr.bf16.mxu1 %v6832_v35 }
 0x864   :  { %3265 = vmatpush1.bf16.msra.mxu0 %v5971_v16  ;;  %3306 = vmatpush1.bf16.msra.mxu1 %v5974_v60  ;;  %v7214_v16 = vld [vmem:[#allocation77_spill] sm:$0xff]  ;;  %v7215_v60 = vld [vmem:[#allocation78_spill] sm:$0xff] }
 0x865   :  { %3266 = vmatprep.subr.bf16.mxu0 %v5977_v50  ;;  %3307 = vmatprep.subr.bf16.mxu1 %v5980_v51  ;;  %v7216_v50 = vld [vmem:[#allocation10_spill] sm:$0xff]  ;;  %v7217_v51 = vld [vmem:[#allocation11_spill] sm:$0xff] }
 0x868   :  { %3267 = vmatpush1.bf16.msra.mxu0 %v5983_v58  ;;  %3308 = vmatpush1.bf16.msra.mxu1 %v5986_v59  ;;  %v7218_v58 = vld [vmem:[#allocation12_spill] sm:$0xff]  ;;  %v7219_v59 = vld [vmem:[#allocation13_spill] sm:$0xff] }
 0x869   :  { %3268 = vmatprep.subr.bf16.mxu0 %v5989_v61  ;;  %3309 = vmatprep.subr.bf16.mxu1 %v5992_v63  ;;  %v7220_v61 = vld [vmem:[#allocation14_spill] sm:$0xff]  ;;  %v7221_v63 = vld [vmem:[#allocation15_spill] sm:$0xff] }
 0x86c   :  { %3269 = vmatpush1.bf16.msra.mxu0 %v7208_v40  ;;  %3310 = vmatpush1.bf16.msra.mxu1 %v7209_v41  ;;  %v7234_v40 = vld [vmem:[#allocation67_spill] sm:$0xff]  ;;  %v7235_v41 = vld [vmem:[#allocation68_spill] sm:$0xff] }
 0x86d   :  { %3270 = vmatprep.subr.bf16.mxu0 %v7210_v45  ;;  %3311 = vmatprep.subr.bf16.mxu1 %v7211_v46  ;;  %v7237_v45 = vld [vmem:[#allocation70_spill] sm:$0xff]  ;;  %v7238_v46 = vld [vmem:[#allocation36_spill] sm:$0xff] }
 0x870   :  { %3271 = vmatpush1.bf16.msra.mxu0 %v7212_v47  ;;  %3312 = vmatpush1.bf16.msra.mxu1 %v7213_v48  ;;  %v7239_v47 = vld [vmem:[#allocation79_spill] sm:$0xff]  ;;  %v7240_v48 = vld [vmem:[#allocation80_spill] sm:$0xff] }
 0x871   :  { %3272 = vmatprep.subr.bf16.mxu0 %v7214_v16  ;;  %3313 = vmatprep.subr.bf16.mxu1 %v7215_v60  ;;  %v7241_v16 = vld [vmem:[#allocation81_spill] sm:$0xff]  ;;  %v7242_v60 = vld [vmem:[#allocation82_spill] sm:$0xff] }
 0x874   :  { %3273 = vmatpush1.bf16.msra.mxu0 %v7216_v50  ;;  %3314 = vmatpush1.bf16.msra.mxu1 %v7217_v51  ;;  %v7243_v50 = vld [vmem:[#allocation37_spill] sm:$0xff]  ;;  %v7244_v51 = vld [vmem:[#allocation38_spill] sm:$0xff] }
 0x875   :  { %3274 = vmatprep.subr.bf16.mxu0 %v7218_v58  ;;  %3315 = vmatprep.subr.bf16.mxu1 %v7219_v59  ;;  %v7245_v58 = vld [vmem:[#allocation39_spill] sm:$0xff]  ;;  %v7246_v59 = vld [vmem:[#allocation40_spill] sm:$0xff] }
 0x878   :  { %3275 = vmatpush1.bf16.msra.mxu0 %v7220_v61  ;;  %3316 = vmatpush1.bf16.msra.mxu1 %v7221_v63  ;;  %v7247_v61 = vld [vmem:[#allocation41_spill] sm:$0xff]  ;;  %v7248_v63 = vld [vmem:[#allocation42_spill] sm:$0xff] }
 0x879   :  { %3276 = vmatprep.subr.bf16.mxu0 %v7222_v2  ;;  %3317 = vmatprep.subr.bf16.mxu1 %v7223_v25  ;;  %v7249_v2 = vld [vmem:[#allocation43_spill] sm:$0xff]  ;;  %v7250_v25 = vld [vmem:[#allocation44_spill] sm:$0xff] }
 0x87c   :  { %3277 = vmatpush1.bf16.msra.mxu0 %v7224_v3  ;;  %3318 = vmatpush1.bf16.msra.mxu1 %v7225_v11  ;;  %v7251_v3 = vld [vmem:[#allocation45_spill] sm:$0xff]  ;;  %v7252_v11 = vld [vmem:[#allocation46_spill] sm:$0xff] }
 0x87d   :  { %3374 = vmatprep.subr.bf16.mxu0 %v7226_v21  ;;  %3415 = vmatprep.subr.bf16.mxu1 %v7227_v30  ;;  %v7253_v21 = vld [vmem:[#allocation47_spill] sm:$0xff]  ;;  %v7254_v30 = vld [vmem:[#allocation48_spill] sm:$0xff] }
 0x87f   :  { %3295 = vmatmul.mubr.bf16.vlgmr.msra.gmra.mrb[100].mxu0 %v3063_v29  ;;  %3336 = vmatmul.mubr.bf16.vlgmr.msra.gmra.mrb[100].mxu1 %v3063_v29  ;;  %v7236_v29 = vld [vmem:[#allocation69_spill] sm:$0xff] }
 0x880   :  { %3375 = vmatpush1.bf16.msra.mxu0 %v7228_v19  ;;  %3416 = vmatpush1.bf16.msra.mxu1 %v7229_v20  ;;  %v7255_v19 = vld [vmem:[#allocation49_spill] sm:$0xff]  ;;  %v7256_v20 = vld [vmem:[#allocation50_spill] sm:$0xff] }
 0x881   :  { %3376 = vmatprep.subr.bf16.mxu0 %v7230_v56  ;;  %3417 = vmatprep.subr.bf16.mxu1 %v7231_v4  ;;  %v7257_v56 = vld [vmem:[#allocation51_spill] sm:$0xff]  ;;  %v7258_v4 = vld [vmem:[#allocation52_spill] sm:$0xff] }
 0x882   :  { %3406 = vmatprep.mubr.bf16.mxu0 %v6832_v35  ;;  %3447 = vmatprep.mubr.bf16.mxu1 %v6832_v35 }
 0x884   :  { %3377 = vmatpush1.bf16.msra.mxu0 %v7232_v31  ;;  %3418 = vmatpush1.bf16.msra.mxu1 %v7233_v34  ;;  %v7259_v31 = vld [vmem:[#allocation53_spill] sm:$0xff] }
 0x885   :  { %3378 = vmatprep.subr.bf16.mxu0 %v7234_v40  ;;  %3419 = vmatprep.subr.bf16.mxu1 %v7235_v41 }
 0x888   :  { %3379 = vmatpush1.bf16.msra.mxu0 %v7236_v29  ;;  %3420 = vmatpush1.bf16.msra.mxu1 %v7237_v45 }
 0x889   :  { %3380 = vmatprep.subr.bf16.mxu0 %v7238_v46  ;;  %3421 = vmatprep.subr.bf16.mxu1 %v7239_v47 }
 0x88c   :  { %3381 = vmatpush1.bf16.msra.mxu0 %v7240_v48  ;;  %3422 = vmatpush1.bf16.msra.mxu1 %v7241_v16 }
 0x88d   :  { %3382 = vmatprep.subr.bf16.mxu0 %v7242_v60  ;;  %3423 = vmatprep.subr.bf16.mxu1 %v7243_v50 }
 0x890   :  { %3383 = vmatpush1.bf16.msra.mxu0 %v7244_v51  ;;  %3424 = vmatpush1.bf16.msra.mxu1 %v7245_v58 }
 0x891   :  { %3384 = vmatprep.subr.bf16.mxu0 %v7246_v59  ;;  %3425 = vmatprep.subr.bf16.mxu1 %v7247_v61 }
 0x894   :  { %3385 = vmatpush1.bf16.msra.mxu0 %v7248_v63  ;;  %3426 = vmatpush1.bf16.msra.mxu1 %v7249_v2 }
 0x895   :  { %3386 = vmatprep.subr.bf16.mxu0 %v7250_v25  ;;  %3427 = vmatprep.subr.bf16.mxu1 %v7251_v3 }
 0x898   :  { %3387 = vmatpush1.bf16.msra.mxu0 %v7252_v11  ;;  %3428 = vmatpush1.bf16.msra.mxu1 %v7253_v21 }
 0x899   :  { %3388 = vmatprep.subr.bf16.mxu0 %v7254_v30  ;;  %3429 = vmatprep.subr.bf16.mxu1 %v7255_v19 }
 0x89c   :  { %3389 = vmatpush1.bf16.msra.mxu0 %v7256_v20  ;;  %3430 = vmatpush1.bf16.msra.mxu1 %v7257_v56 }
 0x89d   :  { %3456 = vmatprep.subr.bf16.mxu0 %v7258_v4  ;;  %3497 = vmatprep.subr.bf16.mxu1 %v7259_v31 }
 0x912   :  { %v3099_v34 = vpop.f32.mrb[92].mxu0  ;;  %v3140_v40 = vpop.f32.mrb[92].mxu1 }
 0x913   :  { %v3101_v41 = vpop.f32.mrb[93].mxu0  ;;  %v3142_v29 = vpop.f32.mrb[93].mxu1 }
 0x914   :  { %v3103_v45 = vpop.f32.mrb[94].mxu0  ;;  %v3144_v46 = vpop.f32.mrb[94].mxu1 }
 0x915   :  { %v3104_v47 = vpop.f32.mrb[95].mxu0  ;;  %v3145_v48 = vpop.f32.mrb[95].mxu1 }
 0x932   :  { %v3181_v16 = vpop.f32.mrb[96].mxu0  ;;  %v3222_v60 = vpop.f32.mrb[96].mxu1 }
 0x933   :  { %v3182_v50 = vadd.f32 %v3181_v16, %v3099_v34  ;;  %v3223_v51 = vadd.f32 %v3222_v60, %v3140_v40  ;;  %v3183_v58 = vpop.f32.mrb[97].mxu0  ;;  %v3224_v59 = vpop.f32.mrb[97].mxu1 }
 0x934   :  { %v3184_v61 = vadd.f32 %v3183_v58, %v3101_v41  ;;  %v3225_v63 = vadd.f32 %v3224_v59, %v3142_v29  ;;  %v3185_v2 = vpop.f32.mrb[98].mxu0  ;;  %v3226_v25 = vpop.f32.mrb[98].mxu1 }
 0x935   :  { %v3229_v3 = vadd.f32 %v3182_v50, %v5334_v0  ;;  %v3186_v11 = vpop.f32.mrb[99].mxu0  ;;  %v3227_v21 = vpop.f32.mrb[99].mxu1  ;;  %v3231_v31 = vadd.f32 %v3223_v51, %v5349_v55 }
 0x936   :  { %v3230_v30 = vadd.f32 %v3184_v61, %v5338_v26  ;;  %v3232_v56 = vadd.f32 %v3225_v63, %v5344_v1  ;;  %v7260_v61 = vld [vmem:[#allocation91_spill] sm:$0xff]  ;;  %v7261_v63 = vld [vmem:[#allocation92_spill] sm:$0xff]  ;;  %v7262_v21 = vld [vmem:[#allocation93_spill] sm:$0xff] }
 0x937   :  { %v3856_v19 = vmul.f32 -1.442695, %v3229_v3 }
 0x938   :  { %v3857_v20 = vmul.f32 -1.442695, %v3230_v30  ;;  %v3858_v4 = vmul.f32 -1.442695, %v3232_v56 }
 0x939   :  { %4323 = vpow2.f32 %v3856_v19  ;;  %v7263_v19 = vld [vmem:[#allocation94_spill] sm:$0xff] }
 0x93a   :  { %4325 = vpow2.f32 %v3857_v20 }
 0x93b   :  { %4327 = vpow2.f32 %v3858_v4 }
 0x93c   :  { %4329 = vtanh.f32 %v3231_v31 }
 0x943   :  { %v4324_v34 = vpop.eup %4323 }
 0x944   :  { %v4326_v40 = vpop.eup %4325  ;;  %v3236_v41 = vadd.f32 1.0, %v4324_v34 }
 0x945   :  { %v3242_v29 = vadd.f32 1.0, %v4326_v40  ;;  %v4328_v45 = vpop.eup %4327 }
 0x946   :  { %4331 = vrcp.f32 %v3236_v41  ;;  %v4330_v46 = vpop.eup %4329  ;;  %v3249_v60 = vadd.f32 1.0, %v4328_v45 }
 0x947   :  { %4333 = vrcp.f32 %v3242_v29 }
 0x948   :  { %4335 = vrcp.f32 %v3249_v60 }
 0x950   :  { %v4332_v47 = vpop.eup %4331 }
 0x951   :  { %v4334_v48 = vpop.eup %4333  ;;  %v3253_v16 = vmul.f32 %v4332_v47, %v4330_v46 }
 0x952   :  { %v3252_v50 = vmul.f32 %v4334_v48, %v6340_v49  ;;  %v3296_v58 = vpop.f32.mrb[100].mxu0  ;;  %v3337_v59 = vpop.f32.mrb[100].mxu1 }
 0x953   :  { %v3344_v51 = vadd.f32 %v3296_v58, %v7260_v61  ;;  %v3346_v2 = vadd.f32 %v3337_v59, %v7261_v63  ;;  %v3298_v25 = vpop.f32.mrb[101].mxu0  ;;  %v3339_v3 = vpop.f32.mrb[101].mxu1 }
 0x954   :  { %v6458_v11 = vadd.f32 %v3253_v16, %v3252_v50  ;;  %v3345_v30 = vadd.f32 %v3298_v25, %v7262_v21  ;;  %v3347_v20 = vadd.f32 %v3339_v3, %v7263_v19  ;;  %v3300_v56 = vpop.f32.mrb[102].mxu0  ;;  %v3341_v4 = vpop.f32.mrb[102].mxu1 }
 0x955   :  { %v3859_v31 = vmul.f32 -1.442695, %v3344_v51  ;;  %v3301_v34 = vpop.f32.mrb[103].mxu0  ;;  %v3342_v49 = vpop.f32.mrb[103].mxu1 }
 0x956   :  { %v3860_v40 = vmul.f32 -1.442695, %v3345_v30  ;;  %4337 = vtanh.f32 %v6458_v11  ;;  %v3861_v41 = vmul.f32 -1.442695, %v3347_v20  ;;  %v4336_v29 = vpop.eup %4335 }
 0x957   :  { %4339 = vpow2.f32 %v3859_v31 }
 0x958   :  { %4341 = vpow2.f32 %v3860_v40 }
 0x959   :  { %4343 = vpow2.f32 %v3861_v41 }
 0x95a   :  { %4345 = vtanh.f32 %v3346_v2 }
 0x960   :  { %v4338_v45 = vpop.eup %4337 }
 0x961   :  { %v4340_v46 = vpop.eup %4339  ;;  %v3256_v47 = vmul.f32 %v4338_v45, %v4336_v29 }
 0x962   :  { %v4342_v48 = vpop.eup %4341  ;;  %v3351_v16 = vadd.f32 1.0, %v4340_v46 }
 0x963   :  { %v3357_v50 = vadd.f32 1.0, %v4342_v48  ;;  %v3373_v58 = vpack.c.bf16 %v3256_v47, %v3256_v47  ;;  %v4344_v60 = vpop.eup %4343 }
 0x964   :  { %4347 = vrcp.f32 %v3351_v16 }
 0x965   :  { %4349 = vrcp.f32 %v3357_v50  ;;  %3407 = vmatmul.mubr.bf16.vlgmr.msra.gmra.mrb[104].mxu0 %v3373_v58  ;;  %3448 = vmatmul.mubr.bf16.vlgmr.msra.gmra.mrb[104].mxu1 %v3373_v58 }
 0x966   :  { %3457 = vmatpush1.bf16.msra.mxu0 %v6099_v36  ;;  %3498 = vmatpush1.bf16.msra.mxu1 %v6102_v18  ;;  %v4346_v36 = vpop.eup %4345 }
 0x967   :  { %3458 = vmatprep.subr.bf16.mxu0 %v6105_v7  ;;  %3499 = vmatprep.subr.bf16.mxu1 %v6108_v12  ;;  %v3364_v12 = vadd.f32 1.0, %v4344_v60 }
 0x968   :  { %3488 = vmatprep.mubr.bf16.mxu0 %v6832_v35  ;;  %3529 = vmatprep.mubr.bf16.mxu1 %v6832_v35 }
 0x969   :  { %4351 = vrcp.f32 %v3364_v12 }
 0x96a   :  { %3459 = vmatpush1.bf16.msra.mxu0 %v6113_v8  ;;  %3500 = vmatpush1.bf16.msra.mxu1 %v6116_v13 }
 0x96b   :  { %3460 = vmatprep.subr.bf16.mxu0 %v6119_v52  ;;  %3501 = vmatprep.subr.bf16.mxu1 %v6122_v62 }
 0x96e   :  { %v4348_v59 = vpop.eup %4347  ;;  %3461 = vmatpush1.bf16.msra.mxu0 %v6125_v44  ;;  %3502 = vmatpush1.bf16.msra.mxu1 %v6128_v27  ;;  %v4107_v27 = vld [vmem:[%s6538_s7] sm:$0xff]  }
 0x96f   :  { %v4350_v18 = vpop.eup %4349  ;;  %v3368_v7 = vmul.f32 %v4348_v59, %v4346_v36  ;;  %3462 = vmatprep.subr.bf16.mxu0 %v6131_v43  ;;  %3503 = vmatprep.subr.bf16.mxu1 %v6134_v14  ;;  %v4639_v43 = vmov 0.0   ;;  %v4108_v14 = vld [vmem:[%s6538_s7 + $0x8] sm:$0xff]   ;;  %v3865_v36 = vld [vmem:[%s6539_s8] ss:$0 sm:$0xff] }
 0x970   :  { %v3367_v35 = vmul.f32 %v4350_v18, %v6360_v24 }
 0x972   :  { %v3369_v8 = vadd.f32 %v3368_v7, %v3367_v35  ;;  %3463 = vmatpush1.bf16.msra.mxu0 %v6140_v57  ;;  %3504 = vmatpush1.bf16.msra.mxu1 %v6143_v32  ;;  %v4109_v57 = vld [vmem:[%s6538_s7 + $0x10] sm:$0xff]   ;;  %v4110_v32 = vld [vmem:[%s6538_s7 + $0x18] sm:$0xff]  }
 0x973   :  { %3464 = vmatprep.subr.bf16.mxu0 %v6146_v23  ;;  %3505 = vmatprep.subr.bf16.mxu1 %v7199_v10  ;;  %v4352_v13 = vpop.eup %4351  ;;  %v4111_v23 = vld [vmem:[%s6538_s7 + $0x20] sm:$0xff]  }
 0x974   :  { %4353 = vtanh.f32 %v3369_v8 }
 0x976   :  { %3465 = vmatpush1.bf16.msra.mxu0 %v7200_v5  ;;  %3506 = vmatpush1.bf16.msra.mxu1 %v7201_v9 }
 0x977   :  { %3466 = vmatprep.subr.bf16.mxu0 %v7202_v42  ;;  %3507 = vmatprep.subr.bf16.mxu1 %v7203_v39 }
 0x97a   :  { %3467 = vmatpush1.bf16.msra.mxu0 %v7204_v37  ;;  %3508 = vmatpush1.bf16.msra.mxu1 %v7205_v38 }
 0x97b   :  { %3468 = vmatprep.subr.bf16.mxu0 %v7206_v54  ;;  %3509 = vmatprep.subr.bf16.mxu1 %v7207_v33 }
 0x97e   :  { %v4354_v52 = vpop.eup %4353  ;;  %3469 = vmatpush1.bf16.msra.mxu0 %v6177_v15  ;;  %3510 = vmatpush1.bf16.msra.mxu1 %v6180_v53  ;;  %v4114_v15 = vld [vmem:[%s6538_s7 + $0x38] sm:$0xff]  }
 0x97f   :  { %3470 = vmatprep.subr.bf16.mxu0 %v6183_v17  ;;  %3511 = vmatprep.subr.bf16.mxu1 %v6186_v28  ;;  %v3371_v62 = vmul.f32 %v4354_v52, %v4352_v13 }
 0x981   :  { %v3372_v44 = vpack.c.bf16 %v3371_v62, %v3371_v62 }
 0x982   :  { %3471 = vmatpush1.bf16.msra.mxu0 %v6189_v6  ;;  %3512 = vmatpush1.bf16.msra.mxu1 %v6192_v22  ;;  %v4112_v22 = vld [vmem:[%s6538_s7 + $0x28] sm:$0xff]   ;;  %v4113_v6 = vld [vmem:[%s6538_s7 + $0x30] sm:$0xff]  }
 0x983   :  { %3883 = vmatprep.subr.bf16.mxu0 %v4639_v43 }
 0x985   :  { %3489 = vmatmul.mubr.bf16.vlgmr.msra.gmra.mrb[108].mxu0 %v3372_v44  ;;  %3530 = vmatmul.mubr.bf16.vlgmr.msra.gmra.mrb[108].mxu1 %v3372_v44 }
 0x986   :  { %3884 = vmatpush3.bf16.msra.mxu0 %v4107_v27  ;;  %3899 = vmatprep.mubr.msk.bf16.mxu0 %vm4640_vm0, %v4639_v43 }
 0x987   :  { %3885 = vmatprep.subr.bf16.mxu0 %v4639_v43 }
 0x98a   :  { %3886 = vmatpush3.bf16.msra.mxu0 %v4108_v14 }
 0x98b   :  { %3887 = vmatprep.subr.bf16.mxu0 %v4639_v43 }
 0x98e   :  { %3888 = vmatpush3.bf16.msra.mxu0 %v4109_v57 }
 0x98f   :  { %3889 = vmatprep.subr.bf16.mxu0 %v4639_v43 }
 0x992   :  { %3890 = vmatpush3.bf16.msra.mxu0 %v4110_v32 }
 0x993   :  { %3891 = vmatprep.subr.bf16.mxu0 %v4639_v43 }
 0x996   :  { %3892 = vmatpush3.bf16.msra.mxu0 %v4111_v23 }
 0x997   :  { %3893 = vmatprep.subr.bf16.mxu0 %v4639_v43 }
 0x99a   :  { %3894 = vmatpush3.bf16.msra.mxu0 %v4112_v22 }
 0x99b   :  { %3895 = vmatprep.subr.bf16.mxu0 %v4639_v43 }
 0x99e   :  { %3896 = vmatpush3.bf16.msra.mxu0 %v4113_v6 }
 0x99f   :  { %3897 = vmatprep.subr.bf16.mxu0 %v4639_v43 }
 0x9a2   :  { %3898 = vmatpush3.bf16.msra.mxu0 %v4114_v15 }
 0xa38   :  { %v3408_v53 = vpop.f32.mrb[104].mxu0  ;;  %v3449_v17 = vpop.f32.mrb[104].mxu1 }
 0xa39   :  { %v3410_v28 = vpop.f32.mrb[105].mxu0  ;;  %v3451_v24 = vpop.f32.mrb[105].mxu1 }
 0xa3a   :  { %v3412_v10 = vpop.f32.mrb[106].mxu0  ;;  %v3453_v5 = vpop.f32.mrb[106].mxu1 }
 0xa3b   :  { %v3413_v9 = vpop.f32.mrb[107].mxu0  ;;  %v3454_v42 = vpop.f32.mrb[107].mxu1 }
 0xa58   :  { %v3490_v39 = vpop.f32.mrb[108].mxu0  ;;  %v3531_v37 = vpop.f32.mrb[108].mxu1 }
 0xa59   :  { %v3491_v38 = vadd.f32 %v3490_v39, %v3408_v53  ;;  %v3532_v54 = vadd.f32 %v3531_v37, %v3449_v17  ;;  %v3492_v33 = vpop.f32.mrb[109].mxu0  ;;  %v3533_v61 = vpop.f32.mrb[109].mxu1 }
 0xa5a   :  { %v3493_v51 = vadd.f32 %v3492_v33, %v3410_v28  ;;  %v3534_v63 = vadd.f32 %v3533_v61, %v3451_v24  ;;  %v3494_v2 = vpop.f32.mrb[110].mxu0  ;;  %v3535_v25 = vpop.f32.mrb[110].mxu1 }
 0xa5b   :  { %v3538_v3 = vadd.f32 %v3491_v38, %v5334_v0  ;;  %v3495_v21 = vpop.f32.mrb[111].mxu0  ;;  %v3536_v30 = vpop.f32.mrb[111].mxu1  ;;  %v3540_v34 = vadd.f32 %v3532_v54, %v5349_v55 }
 0xa5c   :  { %v3539_v19 = vadd.f32 %v3493_v51, %v5338_v26  ;;  %v3541_v4 = vadd.f32 %v3534_v63, %v5344_v1 }
 0xa5d   :  { %v3862_v20 = vmul.f32 -1.442695, %v3538_v3 }
 0xa5e   :  { %v3863_v56 = vmul.f32 -1.442695, %v3539_v19  ;;  %v3864_v31 = vmul.f32 -1.442695, %v3541_v4 }
 0xa5f   :  { %4355 = vpow2.f32 %v3862_v20 }
 0xa60   :  { %4357 = vpow2.f32 %v3863_v56 }
 0xa61   :  { %4359 = vpow2.f32 %v3864_v31 }
 0xa62   :  { %4361 = vtanh.f32 %v3540_v34 }
 0xa69   :  { %v4356_v49 = vpop.eup %4355 }
 0xa6a   :  { %v4358_v40 = vpop.eup %4357  ;;  %v3545_v41 = vadd.f32 1.0, %v4356_v49 }
 0xa6b   :  { %v3551_v29 = vadd.f32 1.0, %v4358_v40  ;;  %v4360_v0 = vpop.eup %4359 }
 0xa6c   :  { %4363 = vrcp.f32 %v3545_v41  ;;  %v4362_v45 = vpop.eup %4361  ;;  %v3558_v48 = vadd.f32 1.0, %v4360_v0 }
 0xa6d   :  { %4365 = vrcp.f32 %v3551_v29 }
 0xa6e   :  { %4367 = vrcp.f32 %v3558_v48 }
 0xa76   :  { %v4364_v26 = vpop.eup %4363 }
 0xa77   :  { %v4366_v46 = vpop.eup %4365  ;;  %v3562_v47 = vmul.f32 %v4364_v26, %v4362_v45 }
 0xa78   :  { %v3561_v16 = vmul.f32 %v4366_v46, %v6458_v11  ;;  %v4368_v55 = vpop.eup %4367 }
 0xa7a   :  { %v3563_v1 = vadd.f32 %v3562_v47, %v3561_v16 }
 0xa7c   :  { %4369 = vtanh.f32 %v3563_v1 }
 0xa86   :  { %v4370_v50 = vpop.eup %4369 }
 0xa87   :  { %v3565_v58 = vmul.f32 %v4370_v50, %v4368_v55 }
 0xa89   :  { %v3566_v60 = vpack.c.bf16 %v3565_v58, %v3565_v58 }
 0xa8b   :  { %3900 = vmatmul.mubr.bf16.vlgmr.msra.gmra.mrb[112].mxu0 %v3566_v60 }
 0xb5e   :  { %v3672_v59 = vpop.f32.mrb[112].mxu0 }
 0xb5f   :  { %v3673_v18 = vadd.f32 %v3865_v36, %v3672_v59  ;;  %v3901_v7 = vpop.f32.mrb[113].mxu0 }
 0xb60   :  { %v3675_v12 = vpop.f32.mrb[114].mxu0 }
 0xb61   :  { %3678 = vst [vmem:[%s6540_s9] sm:$0xff] %v3673_v18  ;;  %v3902_v11 = vpop.f32.mrb[115].mxu0 }
 0xb62   :  { %3683 = vsyncpa [#allocation4], 1 }
 0xb63   :  { %3684 = vsyncpa [#allocation6], 1 }

</bundles_post_ra>
